<compile_context>
chip_gen: v7x
topology: tpu7x:2x2x1
jax: 0.10.0
libtpu: 0.0.40
codegen_flags: <defaults>
</compile_context>

<pallas_src>
import functools

import jax
import jax.numpy as jnp
import numpy as np
from jax import lax
from jax.experimental import pallas as pl
from jax.experimental.pallas import tpu as pltpu


def _relposemb_kernel(q_ref, w_ref, out_ref, *, X):
    """One grid step = `rows = Bblk * X` output rows (row = (batch, x)).

    q_ref   : (rows, Y*D)        VMEM  row (b,x) holds q[b,x,y,:] for all y
    w_ref   : (X, Y*D, Y*R*R)    VMEM  per-x combined width+height weights
    out_ref : (rows, Y*R*R)      VMEM  lane-dense; row-major view of (B,N,R*R)
    """
    rows, cols = out_ref.shape
    # x-class of every row (rows are ordered (batch, x)); full-width so the
    # select below is a plain wide VPU op, no narrow-lane broadcasting.
    x_of = lax.broadcasted_iota(jnp.int32, (rows, cols), 0) % X
    q = q_ref[...]
    for x in range(X):
        # One MXU matmul per x-class: the weight already contains BOTH shifts in
        # final (y, i, j) lane order, so there is no epilogue besides the select.
        px = jnp.dot(q, w_ref[x], preferred_element_type=jnp.float32)
        contrib = jnp.where(x_of == x, px, 0.0).astype(out_ref.dtype)
        if x == 0:
            out_ref[...] = contrib
        else:
            # Stream into out_ref: bounds live values instead of holding a big
            # (rows, cols) register accumulator across all X matmuls.
            out_ref[...] = out_ref[...] + contrib


def _build_weights(rel_width, rel_height, X, Y, R, dtype):
    """Weight stack (X, Y*D, Y*R*R) with

        W[x, y*D + d, y'*R*R + i*R + j]
            = delta(y, y') * (rel_w[R-1 + j - y, d] + rel_h[R-1 + i - x, d])

    so q_row(b,x) @ W[x] directly yields the RelPosEmb logits for that row in the
    final (y, i, j) lane order.  Exact rewrite of rel_to_abs for block <= rel_size.
    """
    D = rel_width.shape[1]
    RR = R * R
    f32 = jnp.float32
    # width: wsh[y, j, d] = rel_w[R-1 + j - y, d]
    jidx = (R - 1) + jnp.arange(R)[None, :] - jnp.arange(Y)[:, None]      # (Y, R)
    wsh = rel_width.astype(f32)[jidx]                                     # (Y, R, D)
    w_w = jnp.broadcast_to(wsh[:, None, :, :], (Y, R, R, D))              # (Y, i, j, D)
    w_w = jnp.transpose(w_w, (0, 3, 1, 2)).reshape(Y, D, RR)              # (Y, D, i*R+j)
    # height: hsh[x, i, d] = rel_h[R-1 + i - x, d]
    iidx = (R - 1) + jnp.arange(R)[None, :] - jnp.arange(X)[:, None]      # (X, R)
    hsh = rel_height.astype(f32)[iidx]                                    # (X, R, D)
    w_h = jnp.broadcast_to(hsh[:, :, None, :], (X, R, R, D))              # (X, i, j, D)
    w_h = jnp.transpose(w_h, (0, 3, 1, 2)).reshape(X, D, RR)              # (X, D, i*R+j)
    blk = w_w[None] + w_h[:, None]                                        # (X, Y, D, RR)
    eye = jnp.eye(Y, dtype=f32)
    W = jnp.einsum('xydr,yz->xydzr', blk, eye).reshape(X, Y * D, Y * RR)
    return W.astype(dtype)


def _device_kind():
    try:
        return jax.devices()[0].device_kind.lower()
    except Exception:
        return ""


def _pick_batch_block(B, X, Y, D, R, q_itemsize):
    """Pick batches per grid step (per perf review):
      * rows = Bblk*X aims for the MXU M target (128 on v5e, 256 on v6e/v7x),
      * no forced grid splitting on single-TC chips; on v7x keep >=2 steps only
        when batch allows it,
      * rows respects the dtype sublane tile (8 for 4-byte, 16 for 2-byte)
        unless one block covers the full array,
      * q/out double buffers plus the (double buffered, constant-index) weight
        stack stay inside a conservative VMEM budget valid on v5e/v6e/v7x.
    Returns (Bblk, estimated per-step VMEM bytes)."""
    kind = _device_kind()
    target_rows = 128 if "v5" in kind else 256
    multi_tc = "v7" in kind                      # only v7x has 2 TensorCores/chip
    sub = max(8, 32 // max(1, q_itemsize))
    RR = R * R
    budget = 24 << 20                            # fits every chip's scoped VMEM

    w_bytes = 2 * X * (Y * D) * (Y * RR) * q_itemsize   # weight, double buffered

    def step_bytes(c):
        rows = c * X
        return (2 * rows * Y * D * q_itemsize            # q block (x2 buffers)
                + 2 * rows * Y * RR * 4                   # f32 out block (x2)
                + w_bytes)

    feasible = [c for c in range(1, B + 1)
                if B % c == 0
                and ((c * X) % sub == 0 or c == B)
                and step_bytes(c) <= budget]
    if not feasible:
        return 1, step_bytes(1)

    reach = [c for c in feasible if c * X >= target_rows]
    multi = [c for c in feasible if B // c >= 2]
    if reach:
        best = min(reach)                        # hit MXU target, keep steps for overlap
        if multi_tc and B // best < 2 and multi:
            best = max(multi)                    # keep both v7x TensorCores busy
    else:
        best = max(multi) if (multi_tc and multi) else max(feasible)
    return best, step_bytes(best)


def rel_pos_emb(q, rel_height, rel_width, block_size):
    """Pallas implementation of RelPosEmb.forward.

    q: (B, N, D), N = block_size * Y.  Returns (B, N, R*R) float32.
    """
    B, N, D = q.shape
    X = block_size
    assert N % X == 0, "sequence length must be divisible by block_size"
    Y = N // X
    M = rel_height.shape[0]
    R = (M + 1) // 2
    assert rel_height.shape == (M, D) and rel_width.shape == (M, D)
    # TODO(synk): block_size > rel_size branch of rel_to_abs (zero-padded wrap) is
    # not implemented; the shifted-slice identity is exact for block_size <= rel_size.
    assert X <= R and Y <= R
    RR = R * R

    w = _build_weights(rel_width, rel_height, X, Y, R, q.dtype)   # (X, Y*D, Y*RR)
    q2 = q.reshape(B * X, Y * D)              # row (b,x), columns (y,d) -- free view

    Bblk, est_bytes = _pick_batch_block(B, X, Y, D, R, q2.dtype.itemsize)
    rows = Bblk * X
    grid = (B // Bblk,)
    vmem_limit = int(min(56 << 20, max(32 << 20, est_bytes + (8 << 20))))

    kernel = functools.partial(_relposemb_kernel, X=X)
    cost = pl.CostEstimate(
        flops=2 * (B * X) * X * (Y * D) * (Y * RR),
        transcendentals=0,
        bytes_accessed=(q2.size + w.size) * q2.dtype.itemsize + B * N * RR * 4,
    )

    out2 = pl.pallas_call(
        kernel,
        out_shape=jax.ShapeDtypeStruct((B * X, Y * RR), jnp.float32),
        grid_spec=pltpu.PrefetchScalarGridSpec(
            num_scalar_prefetch=0,
            grid=grid,
            in_specs=[
                pl.BlockSpec((rows, Y * D), lambda b: (b, 0)),
                # Constant block index -> weight stack is DMA'd once per core.
                pl.BlockSpec((X, Y * D, Y * RR), lambda b: (0, 0, 0)),
            ],
            out_specs=pl.BlockSpec((rows, Y * RR), lambda b: (b, 0)),
        ),
        compiler_params=pltpu.CompilerParams(
            dimension_semantics=("parallel",),
            vmem_limit_bytes=vmem_limit,
        ),
        cost_estimate=cost,
    )(q2, w)

    # (B*X, Y*R*R) row-major is exactly (B, N, R*R) row-major.
    return out2.reshape(B, N, RR)


# ---------------- pure-JAX reference (literal port of the torch code) ----------------
def _rel_to_abs_ref(x):
    b, l, m = x.shape
    r = (m + 1) // 2
    x = jnp.concatenate([x, jnp.zeros((b, l, 1), x.dtype)], axis=2)
    flat_x = x.reshape(b, l * (m + 1))
    flat_x = jnp.concatenate([flat_x, jnp.zeros((b, m - l), x.dtype)], axis=1)
    final_x = flat_x.reshape(b, l + 1, m)
    return final_x[:, :l, m - r:]


def _relative_logits_1d_ref(q, rel_k):
    b, h, w, _ = q.shape
    r = (rel_k.shape[0] + 1) // 2
    logits = jnp.einsum('bxyd,rd->bxyr', q, rel_k)
    logits = logits.reshape(b * h, w, rel_k.shape[0])
    logits = _rel_to_abs_ref(logits)
    logits = logits.reshape(b, h, w, r)
    logits = jnp.broadcast_to(logits[:, :, None, :, :], (b, h, r, w, r))
    return logits


def relposemb_ref(q, rel_height, rel_width, block):
    b, n, c = q.shape
    X = block
    Y = n // block
    R = (rel_width.shape[0] + 1) // 2
    q4 = q.reshape(b, X, Y, c)
    lw = _relative_logits_1d_ref(q4, rel_width)                    # (b, X, R, Y, R)
    lw = jnp.transpose(lw, (0, 1, 3, 2, 4)).reshape(b, X * Y, R * R)
    qt = jnp.transpose(q4, (0, 2, 1, 3))
    lh = _relative_logits_1d_ref(qt, rel_height)                   # (b, Y, R, X, R)
    lh = jnp.transpose(lh, (0, 3, 1, 4, 2)).reshape(b, X * Y, R * R)
    return lw + lh


if __name__ == "__main__":
    # Small deterministic config: block_size = rel_size = 8, dim_head = 32, batch = 2.
    block_size = 8
    rel_size = 8
    dim_head = 32
    batch = 2

    key = jax.random.PRNGKey(0)
    k1, k2, k3 = jax.random.split(key, 3)
    scale = dim_head ** (-0.5)
    rel_height = jax.random.normal(k1, (rel_size * 2 - 1, dim_head), jnp.float32) * scale
    rel_width = jax.random.normal(k2, (rel_size * 2 - 1, dim_head), jnp.float32) * scale
    q = jax.random.normal(k3, (batch, block_size * block_size, dim_head), jnp.float32)

    out = rel_pos_emb(q, rel_height, rel_width, block_size)
    out = jax.block_until_ready(out)

    ref = relposemb_ref(q, rel_height, rel_width, block_size)
    np.testing.assert_allclose(np.asarray(out), np.asarray(ref), rtol=1e-4, atol=1e-4)
    print("KERNEL_OK")
</pallas_src>

<mosaic_0001>
module attributes {stable_mosaic.version = 11 : i64} {
  func.func @_relposemb_kernel(%arg0: i32, %arg1: memref<16x256xf32, #tpu.memory_space<vmem>>, %arg2: memref<8x256x512xf32, #tpu.memory_space<vmem>>, %arg3: memref<16x512xf32, #tpu.memory_space<vmem>>) attributes {dimension_semantics = [#tpu.dimension_semantics<parallel>], iteration_bounds = array<i64: 1>, scalar_prefetch = 0 : i64, scratch_operands = 0 : i64, tpu.core_type = #tpu.core_type<tc>, window_params = [{transform_indices = @transform_0, window_bounds = array<i64: 16, 256>}, {pipeline_mode = #tpu.pipeline_mode<synchronous>, transform_indices = @transform_1, window_bounds = array<i64: 8, 256, 512>}, {transform_indices = @transform_2, window_bounds = array<i64: 16, 512>}]} {
    %0 = tpu.iota {dimensions = array<i32: 0>} : vector<16x512xi32>
    %c8_i32 = arith.constant 8 : i32
    %c0_i32 = arith.constant 0 : i32
    %1 = arith.cmpi eq, %c8_i32, %c0_i32 : i32
    %c1_i32 = arith.constant 1 : i32
    %2 = arith.select %1, %c1_i32, %c8_i32 : i32
    %3 = vector.broadcast %2 : i32 to vector<16x512xi32>
    %4 = arith.remsi %0, %3 : vector<16x512xi32>
    %c0_i32_0 = arith.constant 0 : i32
    %5 = vector.broadcast %c0_i32_0 : i32 to vector<16x512xi32>
    %6 = arith.cmpi ne, %4, %5 : vector<16x512xi32>
    %c0_i32_1 = arith.constant 0 : i32
    %7 = vector.broadcast %c0_i32_1 : i32 to vector<16x512xi32>
    %8 = arith.cmpi slt, %4, %7 : vector<16x512xi32>
    %c0_i32_2 = arith.constant 0 : i32
    %9 = arith.cmpi slt, %2, %c0_i32_2 : i32
    %10 = vector.broadcast %9 : i1 to vector<16x512xi1>
    %11 = vector.broadcast %10 : vector<16x512xi1> to vector<16x512xi1>
    %12 = arith.xori %8, %11 : vector<16x512xi1>
    %13 = arith.andi %12, %6 : vector<16x512xi1>
    %14 = vector.broadcast %2 : i32 to vector<16x512xi32>
    %15 = arith.addi %4, %14 : vector<16x512xi32>
    %16 = arith.select %13, %15, %4 : vector<16x512xi1>, vector<16x512xi32>
    %c0 = arith.constant 0 : index
    %c0_3 = arith.constant 0 : index
    %17 = vector.load %arg1[%c0, %c0_3] : memref<16x256xf32, #tpu.memory_space<vmem>>, vector<16x256xf32>
    %c0_4 = arith.constant 0 : index
    %c0_5 = arith.constant 0 : index
    %c0_6 = arith.constant 0 : index
    %18 = vector.load %arg2[%c0_4, %c0_5, %c0_6] : memref<8x256x512xf32, #tpu.memory_space<vmem>>, vector<1x256x512xf32>
    %19 = vector.shape_cast %18 : vector<1x256x512xf32> to vector<256x512xf32>
    %cst = arith.constant dense<0.000000e+00> : vector<16x512xf32>
    %20 = tpu.matmul %17, %19, %cst {dimension_numbers = #tpu.dot_dimension_numbers<[1], [0], [0], [1], [0, 0, 1, 1], [], []>} : vector<16x256xf32>, vector<256x512xf32>, vector<16x512xf32> -> vector<16x512xf32>
    %c0_i32_7 = arith.constant 0 : i32
    %21 = vector.broadcast %c0_i32_7 : i32 to vector<16x512xi32>
    %22 = arith.cmpi eq, %16, %21 : vector<16x512xi32>
    %cst_8 = arith.constant 0.000000e+00 : f32
    %23 = vector.broadcast %cst_8 : f32 to vector<16x512xf32>
    %24 = arith.select %22, %20, %23 : vector<16x512xi1>, vector<16x512xf32>
    %c0_9 = arith.constant 0 : index
    %c0_10 = arith.constant 0 : index
    %25 = vector.load %arg3[%c0_9, %c0_10] : memref<16x512xf32, #tpu.memory_space<vmem>>, vector<16x512xf32>
    tpu.vector_store %arg3[%c0_9, %c0_10], %24 {strides = array<i32>} : memref<16x512xf32, #tpu.memory_space<vmem>>, vector<16x512xf32>,
    %c1 = arith.constant 1 : index
    %c0_11 = arith.constant 0 : index
    %c0_12 = arith.constant 0 : index
    %26 = vector.load %arg2[%c1, %c0_11, %c0_12] : memref<8x256x512xf32, #tpu.memory_space<vmem>>, vector<1x256x512xf32>
    %27 = vector.shape_cast %26 : vector<1x256x512xf32> to vector<256x512xf32>
    %cst_13 = arith.constant dense<0.000000e+00> : vector<16x512xf32>
    %28 = tpu.matmul %17, %27, %cst_13 {dimension_numbers = #tpu.dot_dimension_numbers<[1], [0], [0], [1], [0, 0, 1, 1], [], []>} : vector<16x256xf32>, vector<256x512xf32>, vector<16x512xf32> -> vector<16x512xf32>
    %c1_i32_14 = arith.constant 1 : i32
    %29 = vector.broadcast %c1_i32_14 : i32 to vector<16x512xi32>
    %30 = arith.cmpi eq, %16, %29 : vector<16x512xi32>
    %cst_15 = arith.constant 0.000000e+00 : f32
    %31 = vector.broadcast %cst_15 : f32 to vector<16x512xf32>
    %32 = arith.select %30, %28, %31 : vector<16x512xi1>, vector<16x512xf32>
    %c0_16 = arith.constant 0 : index
    %c0_17 = arith.constant 0 : index
    %33 = vector.load %arg3[%c0_16, %c0_17] : memref<16x512xf32, #tpu.memory_space<vmem>>, vector<16x512xf32>
    %34 = arith.addf %33, %32 : vector<16x512xf32>
    %c0_18 = arith.constant 0 : index
    %c0_19 = arith.constant 0 : index
    %35 = vector.load %arg3[%c0_18, %c0_19] : memref<16x512xf32, #tpu.memory_space<vmem>>, vector<16x512xf32>
    tpu.vector_store %arg3[%c0_18, %c0_19], %34 {strides = array<i32>} : memref<16x512xf32, #tpu.memory_space<vmem>>, vector<16x512xf32>,
    %c2 = arith.constant 2 : index
    %c0_20 = arith.constant 0 : index
    %c0_21 = arith.constant 0 : index
    %36 = vector.load %arg2[%c2, %c0_20, %c0_21] : memref<8x256x512xf32, #tpu.memory_space<vmem>>, vector<1x256x512xf32>
    %37 = vector.shape_cast %36 : vector<1x256x512xf32> to vector<256x512xf32>
    %cst_22 = arith.constant dense<0.000000e+00> : vector<16x512xf32>
    %38 = tpu.matmul %17, %37, %cst_22 {dimension_numbers = #tpu.dot_dimension_numbers<[1], [0], [0], [1], [0, 0, 1, 1], [], []>} : vector<16x256xf32>, vector<256x512xf32>, vector<16x512xf32> -> vector<16x512xf32>
    %c2_i32 = arith.constant 2 : i32
    %39 = vector.broadcast %c2_i32 : i32 to vector<16x512xi32>
    %40 = arith.cmpi eq, %16, %39 : vector<16x512xi32>
    %cst_23 = arith.constant 0.000000e+00 : f32
    %41 = vector.broadcast %cst_23 : f32 to vector<16x512xf32>
    %42 = arith.select %40, %38, %41 : vector<16x512xi1>, vector<16x512xf32>
    %c0_24 = arith.constant 0 : index
    %c0_25 = arith.constant 0 : index
    %43 = vector.load %arg3[%c0_24, %c0_25] : memref<16x512xf32, #tpu.memory_space<vmem>>, vector<16x512xf32>
    %44 = arith.addf %43, %42 : vector<16x512xf32>
    %c0_26 = arith.constant 0 : index
    %c0_27 = arith.constant 0 : index
    %45 = vector.load %arg3[%c0_26, %c0_27] : memref<16x512xf32, #tpu.memory_space<vmem>>, vector<16x512xf32>
    tpu.vector_store %arg3[%c0_26, %c0_27], %44 {strides = array<i32>} : memref<16x512xf32, #tpu.memory_space<vmem>>, vector<16x512xf32>,
    %c3 = arith.constant 3 : index
    %c0_28 = arith.constant 0 : index
    %c0_29 = arith.constant 0 : index
    %46 = vector.load %arg2[%c3, %c0_28, %c0_29] : memref<8x256x512xf32, #tpu.memory_space<vmem>>, vector<1x256x512xf32>
    %47 = vector.shape_cast %46 : vector<1x256x512xf32> to vector<256x512xf32>
    %cst_30 = arith.constant dense<0.000000e+00> : vector<16x512xf32>
    %48 = tpu.matmul %17, %47, %cst_30 {dimension_numbers = #tpu.dot_dimension_numbers<[1], [0], [0], [1], [0, 0, 1, 1], [], []>} : vector<16x256xf32>, vector<256x512xf32>, vector<16x512xf32> -> vector<16x512xf32>
    %c3_i32 = arith.constant 3 : i32
    %49 = vector.broadcast %c3_i32 : i32 to vector<16x512xi32>
    %50 = arith.cmpi eq, %16, %49 : vector<16x512xi32>
    %cst_31 = arith.constant 0.000000e+00 : f32
    %51 = vector.broadcast %cst_31 : f32 to vector<16x512xf32>
    %52 = arith.select %50, %48, %51 : vector<16x512xi1>, vector<16x512xf32>
    %c0_32 = arith.constant 0 : index
    %c0_33 = arith.constant 0 : index
    %53 = vector.load %arg3[%c0_32, %c0_33] : memref<16x512xf32, #tpu.memory_space<vmem>>, vector<16x512xf32>
    %54 = arith.addf %53, %52 : vector<16x512xf32>
    %c0_34 = arith.constant 0 : index
    %c0_35 = arith.constant 0 : index
    %55 = vector.load %arg3[%c0_34, %c0_35] : memref<16x512xf32, #tpu.memory_space<vmem>>, vector<16x512xf32>
    tpu.vector_store %arg3[%c0_34, %c0_35], %54 {strides = array<i32>} : memref<16x512xf32, #tpu.memory_space<vmem>>, vector<16x512xf32>,
    %c4 = arith.constant 4 : index
    %c0_36 = arith.constant 0 : index
    %c0_37 = arith.constant 0 : index
    %56 = vector.load %arg2[%c4, %c0_36, %c0_37] : memref<8x256x512xf32, #tpu.memory_space<vmem>>, vector<1x256x512xf32>
    %57 = vector.shape_cast %56 : vector<1x256x512xf32> to vector<256x512xf32>
    %cst_38 = arith.constant dense<0.000000e+00> : vector<16x512xf32>
    %58 = tpu.matmul %17, %57, %cst_38 {dimension_numbers = #tpu.dot_dimension_numbers<[1], [0], [0], [1], [0, 0, 1, 1], [], []>} : vector<16x256xf32>, vector<256x512xf32>, vector<16x512xf32> -> vector<16x512xf32>
    %c4_i32 = arith.constant 4 : i32
    %59 = vector.broadcast %c4_i32 : i32 to vector<16x512xi32>
    %60 = arith.cmpi eq, %16, %59 : vector<16x512xi32>
    %cst_39 = arith.constant 0.000000e+00 : f32
    %61 = vector.broadcast %cst_39 : f32 to vector<16x512xf32>
    %62 = arith.select %60, %58, %61 : vector<16x512xi1>, vector<16x512xf32>
    %c0_40 = arith.constant 0 : index
    %c0_41 = arith.constant 0 : index
    %63 = vector.load %arg3[%c0_40, %c0_41] : memref<16x512xf32, #tpu.memory_space<vmem>>, vector<16x512xf32>
    %64 = arith.addf %63, %62 : vector<16x512xf32>
    %c0_42 = arith.constant 0 : index
    %c0_43 = arith.constant 0 : index
    %65 = vector.load %arg3[%c0_42, %c0_43] : memref<16x512xf32, #tpu.memory_space<vmem>>, vector<16x512xf32>
    tpu.vector_store %arg3[%c0_42, %c0_43], %64 {strides = array<i32>} : memref<16x512xf32, #tpu.memory_space<vmem>>, vector<16x512xf32>,
    %c5 = arith.constant 5 : index
    %c0_44 = arith.constant 0 : index
    %c0_45 = arith.constant 0 : index
    %66 = vector.load %arg2[%c5, %c0_44, %c0_45] : memref<8x256x512xf32, #tpu.memory_space<vmem>>, vector<1x256x512xf32>
    %67 = vector.shape_cast %66 : vector<1x256x512xf32> to vector<256x512xf32>
    %cst_46 = arith.constant dense<0.000000e+00> : vector<16x512xf32>
    %68 = tpu.matmul %17, %67, %cst_46 {dimension_numbers = #tpu.dot_dimension_numbers<[1], [0], [0], [1], [0, 0, 1, 1], [], []>} : vector<16x256xf32>, vector<256x512xf32>, vector<16x512xf32> -> vector<16x512xf32>
    %c5_i32 = arith.constant 5 : i32
    %69 = vector.broadcast %c5_i32 : i32 to vector<16x512xi32>
    %70 = arith.cmpi eq, %16, %69 : vector<16x512xi32>
    %cst_47 = arith.constant 0.000000e+00 : f32
    %71 = vector.broadcast %cst_47 : f32 to vector<16x512xf32>
    %72 = arith.select %70, %68, %71 : vector<16x512xi1>, vector<16x512xf32>
    %c0_48 = arith.constant 0 : index
    %c0_49 = arith.constant 0 : index
    %73 = vector.load %arg3[%c0_48, %c0_49] : memref<16x512xf32, #tpu.memory_space<vmem>>, vector<16x512xf32>
    %74 = arith.addf %73, %72 : vector<16x512xf32>
    %c0_50 = arith.constant 0 : index
    %c0_51 = arith.constant 0 : index
    %75 = vector.load %arg3[%c0_50, %c0_51] : memref<16x512xf32, #tpu.memory_space<vmem>>, vector<16x512xf32>
    tpu.vector_store %arg3[%c0_50, %c0_51], %74 {strides = array<i32>} : memref<16x512xf32, #tpu.memory_space<vmem>>, vector<16x512xf32>,
    %c6 = arith.constant 6 : index
    %c0_52 = arith.constant 0 : index
    %c0_53 = arith.constant 0 : index
    %76 = vector.load %arg2[%c6, %c0_52, %c0_53] : memref<8x256x512xf32, #tpu.memory_space<vmem>>, vector<1x256x512xf32>
    %77 = vector.shape_cast %76 : vector<1x256x512xf32> to vector<256x512xf32>
    %cst_54 = arith.constant dense<0.000000e+00> : vector<16x512xf32>
    %78 = tpu.matmul %17, %77, %cst_54 {dimension_numbers = #tpu.dot_dimension_numbers<[1], [0], [0], [1], [0, 0, 1, 1], [], []>} : vector<16x256xf32>, vector<256x512xf32>, vector<16x512xf32> -> vector<16x512xf32>
    %c6_i32 = arith.constant 6 : i32
    %79 = vector.broadcast %c6_i32 : i32 to vector<16x512xi32>
    %80 = arith.cmpi eq, %16, %79 : vector<16x512xi32>
    %cst_55 = arith.constant 0.000000e+00 : f32
    %81 = vector.broadcast %cst_55 : f32 to vector<16x512xf32>
    %82 = arith.select %80, %78, %81 : vector<16x512xi1>, vector<16x512xf32>
    %c0_56 = arith.constant 0 : index
    %c0_57 = arith.constant 0 : index
    %83 = vector.load %arg3[%c0_56, %c0_57] : memref<16x512xf32, #tpu.memory_space<vmem>>, vector<16x512xf32>
    %84 = arith.addf %83, %82 : vector<16x512xf32>
    %c0_58 = arith.constant 0 : index
    %c0_59 = arith.constant 0 : index
    %85 = vector.load %arg3[%c0_58, %c0_59] : memref<16x512xf32, #tpu.memory_space<vmem>>, vector<16x512xf32>
    tpu.vector_store %arg3[%c0_58, %c0_59], %84 {strides = array<i32>} : memref<16x512xf32, #tpu.memory_space<vmem>>, vector<16x512xf32>,
    %c7 = arith.constant 7 : index
    %c0_60 = arith.constant 0 : index
    %c0_61 = arith.constant 0 : index
    %86 = vector.load %arg2[%c7, %c0_60, %c0_61] : memref<8x256x512xf32, #tpu.memory_space<vmem>>, vector<1x256x512xf32>
    %87 = vector.shape_cast %86 : vector<1x256x512xf32> to vector<256x512xf32>
    %cst_62 = arith.constant dense<0.000000e+00> : vector<16x512xf32>
    %88 = tpu.matmul %17, %87, %cst_62 {dimension_numbers = #tpu.dot_dimension_numbers<[1], [0], [0], [1], [0, 0, 1, 1], [], []>} : vector<16x256xf32>, vector<256x512xf32>, vector<16x512xf32> -> vector<16x512xf32>
    %c7_i32 = arith.constant 7 : i32
    %89 = vector.broadcast %c7_i32 : i32 to vector<16x512xi32>
    %90 = arith.cmpi eq, %16, %89 : vector<16x512xi32>
    %cst_63 = arith.constant 0.000000e+00 : f32
    %91 = vector.broadcast %cst_63 : f32 to vector<16x512xf32>
    %92 = arith.select %90, %88, %91 : vector<16x512xi1>, vector<16x512xf32>
    %c0_64 = arith.constant 0 : index
    %c0_65 = arith.constant 0 : index
    %93 = vector.load %arg3[%c0_64, %c0_65] : memref<16x512xf32, #tpu.memory_space<vmem>>, vector<16x512xf32>
    %94 = arith.addf %93, %92 : vector<16x512xf32>
    %c0_66 = arith.constant 0 : index
    %c0_67 = arith.constant 0 : index
    %95 = vector.load %arg3[%c0_66, %c0_67] : memref<16x512xf32, #tpu.memory_space<vmem>>, vector<16x512xf32>
    tpu.vector_store %arg3[%c0_66, %c0_67], %94 {strides = array<i32>} : memref<16x512xf32, #tpu.memory_space<vmem>>, vector<16x512xf32>,
    return
  }
  func.func @transform_0(%arg0: i32) -> (i32, i32) {
    %c0_i32 = arith.constant 0 : i32
    %c0_i32_0 = arith.constant 0 : i32
    return %arg0, %c0_i32 : i32, i32
  }
  func.func @transform_1(%arg0: i32) -> (i32, i32, i32) {
    %c0_i32 = arith.constant 0 : i32
    %c0_i32_0 = arith.constant 0 : i32
    %c0_i32_1 = arith.constant 0 : i32
    %c0_i32_2 = arith.constant 0 : i32
    return %c0_i32, %c0_i32_0, %c0_i32_1 : i32, i32, i32
  }
  func.func @transform_2(%arg0: i32) -> (i32, i32) {
    %c0_i32 = arith.constant 0 : i32
    %c0_i32_0 = arith.constant 0 : i32
    return %arg0, %c0_i32 : i32, i32
  }
}

</mosaic_0001>

<bundles_post_ra>
// kernel: tpu_custom_call.1
= control target key start
LH: loop header
LB: loop body
LE: loop exit
PB: predicated region body
PF: predicated region fallthrough
CT: control target
= control target key end

     0   :  { %7 = vsyncpa [#allocation3], 0  ;;  %s4077_s0 = inlined_call_operand.hbm [shape: f32[16,256], index: 0, kind: input, shape index: {}]   ;;  %s4078_s1 = inlined_call_operand.hbm [shape: f32[8,256,512], index: 1, kind: input, shape index: {}]   ;;  %s4079_s2 = inlined_call_operand.hbm [shape: f32[16,512], index: 2, kind: output, shape index: {}]  }
   0x1   :  { %8 = vsyncpa [#allocation6], 0 }
   0x2   :  { %9 = vsyncpa [#allocation4], 0  ;;  %s3723_s9 = smov [#allocation2]   ;;  %s3651_s13 = scalar_lea.hbm %s4077_s0, 512 }
   0x3   :  { %s15_s10 = sshll.u32 %s3723_s9, 4  ;;  %p3652_p0 = scmp.ne.s32.totalorder %s4077_s0, %s3651_s13  ;;  %s16_s10 = int_to_ptr.vmem [resolvable:$true] %s15_s10 }
   0x4   :  { %p3655_p1 = scmp.lt.u32.totalorder %s3651_s13, %s4077_s0 }
   0x6   :  { %p3657_p2 = pnand %p3655_p1, %p3652_p0 }
   0x8   :  { %3660 = shalt.err (!%p3657_p2)
}
   0x9   :  { %s3661_s18 = scalar_lea.vmem %s16_s10, 512  ;;  %p3666_p4 = scmp.lt.s32.totalorder %s16_s10, %s16_s10 }
   0xa   :  { %p3662_p3 = scmp.ne.s32.totalorder %s16_s10, %s3661_s18  ;;  %p3667_p5 = scmp.lt.s32.totalorder %s3661_s18, %s3661_s18 }
   0xc   :  { %p3668_p6 = por %p3667_p5, %p3666_p4 }
   0xe   :  { %p3669_p7 = pnand %p3668_p6, %p3662_p3 }
  0x10   :  { %3672 = shalt.err (!%p3669_p7)
}
  0x11   :  { %s3724_s19 = smov 256   ;;  %s3725_s20 = smov 16  }
  0x12   :  { %21 = dma.hbm_to_vmem [thread:$0]  %s4077_s0, 512, %s16_s10, [#allocation3], %s3724_s19, %s3724_s19, %s3725_s20  }
  0x13   :  { %s3726_s23 = smov [#allocation5]   ;;  %s3673_s27 = scalar_lea.hbm %s4078_s1, 131072 }
  0x14   :  { %s27_s24 = sshll.u32 %s3726_s23, 4  ;;  %p3674_p8 = scmp.ne.s32.totalorder %s4078_s1, %s3673_s27  ;;  %s28_s24 = int_to_ptr.vmem [resolvable:$true] %s27_s24 }
  0x15   :  { %p3677_p9 = scmp.lt.u32.totalorder %s3673_s27, %s4078_s1 }
  0x17   :  { %p3679_p10 = pnand %p3677_p9, %p3674_p8 }
  0x19   :  { %3682 = shalt.err (!%p3679_p10)
}
  0x1a   :  { %s3683_s4 = scalar_lea.vmem %s28_s24, 131072  ;;  %p3688_p12 = scmp.lt.s32.totalorder %s28_s24, %s28_s24 }
  0x1b   :  { %p3684_p11 = scmp.ne.s32.totalorder %s28_s24, %s3683_s4  ;;  %p3689_p13 = scmp.lt.s32.totalorder %s3683_s4, %s3683_s4 }
  0x1d   :  { %p3690_p0 = por %p3689_p13, %p3688_p12 }
  0x1f   :  { %p3691_p1 = pnand %p3690_p0, %p3684_p11 }
  0x21   :  { %3694 = shalt.err (!%p3691_p1)
}
  0x22   :  { %s3727_s0 = smov 512   ;;  %s3728_s5 = smov 32  }
  0x23   :  { %33 = dma.hbm_to_vmem [thread:$0]  %s4078_s1, 131072, %s28_s24, [#allocation6], %s3727_s0, %s3727_s0, %s3728_s5  }
  0x24   :  { %3717 = dma.done.wait [#allocation3], 512  }
  0x25   :  { %3718 = vsyncadd [#allocation3], 4294966784 }
  0x26   :  { %3719 = dma.done.wait [#allocation6], 131072  }
  0x27   :  { %3720 = vsyncadd [#allocation6], 4294836224  ;;  %v72_v0 = vld [vmem:[#allocation5 + $0x8] sm:$0xff]  ;;  %v74_v2 = vld [vmem:[#allocation5 + $0x18] sm:$0xff]  ;;  %s3729_s1 = smov [#allocation7]  }
  0x28   :  { %v76_v1 = vld [vmem:[#allocation5 + $0x28] sm:$0xff]  ;;  %v78_v4 = vld [vmem:[#allocation5 + $0x38] sm:$0xff]  ;;  %v71_v5 = vld [vmem:[#allocation5] sm:$0xff]  ;;  %s2595_s8 = sshll.u32 %s3729_s1, 4  ;;  %s2596_s8 = int_to_ptr.vmem [resolvable:$true] %s2595_s8 }
  0x29   :  { %v2608_v3 = vpack.c.bf16 %v76_v1, %v72_v0  ;;  %v75_v6 = vld [vmem:[#allocation5 + $0x20] sm:$0xff]  ;;  %v2672_v7 = vpack.c.bf16 %v78_v4, %v74_v2  ;;  %v73_v9 = vld [vmem:[#allocation5 + $0x10] sm:$0xff]  ;;  %v80_v11 = vld [vmem:[#allocation5 + $0x48] sm:$0xff]  ;;  %s3695_s9 = scalar_lea.vmem %s2596_s8, 1024  ;;  %p3700_p3 = scmp.lt.s32.totalorder %s2596_s8, %s2596_s8 }
  0x2a   :  { %v2610_v8 = vpack.c.bf16 %v75_v6, %v71_v5  ;;  %v77_v10 = vld [vmem:[#allocation5 + $0x30] sm:$0xff]  ;;  %v84_v13 = vld [vmem:[#allocation5 + $0x68] sm:$0xff]  ;;  %v82_v14 = vld [vmem:[#allocation5 + $0x58] sm:$0xff]  ;;  %p3696_p2 = scmp.ne.s32.totalorder %s2596_s8, %s3695_s9  ;;  %p3701_p4 = scmp.lt.s32.totalorder %s3695_s9, %s3695_s9 }
  0x2b   :  { %2609 = vmatprep.subr.bf16.mxu0 %v2608_v3  ;;  %v2674_v12 = vpack.c.bf16 %v77_v10, %v73_v9  ;;  %v86_v15 = vld [vmem:[#allocation5 + $0x78] sm:$0xff]  ;;  %2673 = vmatprep.subr.bf16.mxu1 %v2672_v7  ;;  %v2612_v16 = vpack.c.bf16 %v84_v13, %v80_v11  ;;  %v79_v18 = vld [vmem:[#allocation5 + $0x40] sm:$0xff]  ;;  %v81_v20 = vld [vmem:[#allocation5 + $0x50] sm:$0xff] }
  0x2c   :  { %2611 = vmatpush1.bf16.msra.mxu0 %v2610_v8  ;;  %v2676_v17 = vpack.c.bf16 %v86_v15, %v82_v14  ;;  %v83_v19 = vld [vmem:[#allocation5 + $0x60] sm:$0xff]  ;;  %v85_v22 = vld [vmem:[#allocation5 + $0x70] sm:$0xff]  ;;  %v88_v23 = vld [vmem:[#allocation5 + $0x88] sm:$0xff]  ;;  %p3702_p5 = por %p3701_p4, %p3700_p3 }
  0x2d   :  { %2675 = vmatpush1.bf16.msra.mxu1 %v2674_v12  ;;  %v2614_v21 = vpack.c.bf16 %v83_v19, %v79_v18  ;;  %v92_v24 = vld [vmem:[#allocation5 + $0xa8] sm:$0xff]  ;;  %2613 = vmatprep.subr.bf16.mxu0 %v2612_v16  ;;  %v2678_v25 = vpack.c.bf16 %v85_v22, %v81_v20  ;;  %v90_v27 = vld [vmem:[#allocation5 + $0x98] sm:$0xff]  ;;  %v87_v29 = vld [vmem:[#allocation5 + $0x80] sm:$0xff] }
  0x2e   :  { %2677 = vmatprep.subr.bf16.mxu1 %v2676_v17  ;;  %v2616_v26 = vpack.c.bf16 %v92_v24, %v88_v23  ;;  %v94_v28 = vld [vmem:[#allocation5 + $0xb8] sm:$0xff]  ;;  %v91_v31 = vld [vmem:[#allocation5 + $0xa0] sm:$0xff]  ;;  %v89_v32 = vld [vmem:[#allocation5 + $0x90] sm:$0xff]  ;;  %p3703_p6 = pnand %p3702_p5, %p3696_p2 }
  0x2f   :  { %v2680_v30 = vpack.c.bf16 %v94_v28, %v90_v27  ;;  %v93_v33 = vld [vmem:[#allocation5 + $0xb0] sm:$0xff]  ;;  %v2618_v34 = vpack.c.bf16 %v91_v31, %v87_v29  ;;  %v96_v35 = vld [vmem:[#allocation5 + $0xc8] sm:$0xff]  ;;  %v98_v37 = vld [vmem:[#allocation5 + $0xd8] sm:$0xff] }
  0x30   :  { %2615 = vmatpush1.bf16.msra.mxu0 %v2614_v21  ;;  %v100_v36 = vld [vmem:[#allocation5 + $0xe8] sm:$0xff]  ;;  %v2682_v38 = vpack.c.bf16 %v93_v33, %v89_v32  ;;  %v102_v40 = vld [vmem:[#allocation5 + $0xf8] sm:$0xff]  ;;  %v95_v41 = vld [vmem:[#allocation5 + $0xc0] sm:$0xff] }
  0x31   :  { %2679 = vmatpush1.bf16.msra.mxu1 %v2678_v25  ;;  %2617 = vmatprep.subr.bf16.mxu0 %v2616_v26  ;;  %v2620_v39 = vpack.c.bf16 %v100_v36, %v96_v35  ;;  %v99_v42 = vld [vmem:[#allocation5 + $0xe0] sm:$0xff]  ;;  %v2684_v43 = vpack.c.bf16 %v102_v40, %v98_v37  ;;  %v97_v44 = vld [vmem:[#allocation5 + $0xd0] sm:$0xff]  ;;  %v104_v46 = vld [vmem:[#allocation5 + $0x108] sm:$0xff] }
  0x32   :  { %2681 = vmatprep.subr.bf16.mxu1 %v2680_v30  ;;  %v101_v45 = vld [vmem:[#allocation5 + $0xf0] sm:$0xff]  ;;  %v108_v47 = vld [vmem:[#allocation5 + $0x128] sm:$0xff]  ;;  %v106_v48 = vld [vmem:[#allocation5 + $0x118] sm:$0xff]  ;;  %v2622_v50 = vpack.c.bf16 %v99_v42, %v95_v41 }
  0x33   :  { %v110_v49 = vld [vmem:[#allocation5 + $0x138] sm:$0xff]  ;;  %v2686_v51 = vpack.c.bf16 %v101_v45, %v97_v44  ;;  %v2624_v52 = vpack.c.bf16 %v108_v47, %v104_v46  ;;  %v103_v53 = vld [vmem:[#allocation5 + $0x100] sm:$0xff]  ;;  %v105_v55 = vld [vmem:[#allocation5 + $0x110] sm:$0xff] }
  0x34   :  { %2619 = vmatpush1.bf16.msra.mxu0 %v2618_v34  ;;  %v107_v54 = vld [vmem:[#allocation5 + $0x120] sm:$0xff]  ;;  %v2688_v56 = vpack.c.bf16 %v110_v49, %v106_v48  ;;  %v109_v57 = vld [vmem:[#allocation5 + $0x130] sm:$0xff]  ;;  %v112_v58 = vld [vmem:[#allocation5 + $0x148] sm:$0xff] }
  0x35   :  { %2683 = vmatpush1.bf16.msra.mxu1 %v2682_v38  ;;  %2621 = vmatprep.subr.bf16.mxu0 %v2620_v39  ;;  %v116_v59 = vld [vmem:[#allocation5 + $0x168] sm:$0xff]  ;;  %v114_v60 = vld [vmem:[#allocation5 + $0x158] sm:$0xff]  ;;  %v2626_v62 = vpack.c.bf16 %v107_v54, %v103_v53  ;;  %v2690_v63 = vpack.c.bf16 %v109_v57, %v105_v55  ;;  %v111_v1 = vld [vmem:[#allocation5 + $0x140] sm:$0xff] }
  0x36   :  { %2685 = vmatprep.subr.bf16.mxu1 %v2684_v43  ;;  %v118_v61 = vld [vmem:[#allocation5 + $0x178] sm:$0xff]  ;;  %v2628_v0 = vpack.c.bf16 %v116_v59, %v112_v58  ;;  %v115_v2 = vld [vmem:[#allocation5 + $0x160] sm:$0xff]  ;;  %v113_v3 = vld [vmem:[#allocation5 + $0x150] sm:$0xff] }
  0x37   :  { %v2692_v4 = vpack.c.bf16 %v118_v61, %v114_v60  ;;  %v117_v5 = vld [vmem:[#allocation5 + $0x170] sm:$0xff]  ;;  %v120_v6 = vld [vmem:[#allocation5 + $0x188] sm:$0xff]  ;;  %v122_v8 = vld [vmem:[#allocation5 + $0x198] sm:$0xff]  ;;  %v2630_v10 = vpack.c.bf16 %v115_v2, %v111_v1 }
  0x38   :  { %2623 = vmatpush1.bf16.msra.mxu0 %v2622_v50  ;;  %v124_v7 = vld [vmem:[#allocation5 + $0x1a8] sm:$0xff]  ;;  %v126_v9 = vld [vmem:[#allocation5 + $0x1b8] sm:$0xff]  ;;  %v2694_v11 = vpack.c.bf16 %v117_v5, %v113_v3  ;;  %v119_v13 = vld [vmem:[#allocation5 + $0x180] sm:$0xff] }
  0x39   :  { %2687 = vmatpush1.bf16.msra.mxu1 %v2686_v51  ;;  %2625 = vmatprep.subr.bf16.mxu0 %v2624_v52  ;;  %v2632_v12 = vpack.c.bf16 %v124_v7, %v120_v6  ;;  %v123_v14 = vld [vmem:[#allocation5 + $0x1a0] sm:$0xff]  ;;  %v121_v15 = vld [vmem:[#allocation5 + $0x190] sm:$0xff]  ;;  %v2696_v16 = vpack.c.bf16 %v126_v9, %v122_v8  ;;  %v128_v18 = vld [vmem:[#allocation5 + $0x1c8] sm:$0xff] }
  0x3a   :  { %2689 = vmatprep.subr.bf16.mxu1 %v2688_v56  ;;  %v125_v17 = vld [vmem:[#allocation5 + $0x1b0] sm:$0xff]  ;;  %v132_v19 = vld [vmem:[#allocation5 + $0x1e8] sm:$0xff]  ;;  %v130_v20 = vld [vmem:[#allocation5 + $0x1d8] sm:$0xff]  ;;  %v2634_v22 = vpack.c.bf16 %v123_v14, %v119_v13 }
  0x3b   :  { %v134_v21 = vld [vmem:[#allocation5 + $0x1f8] sm:$0xff]  ;;  %v2698_v23 = vpack.c.bf16 %v125_v17, %v121_v15  ;;  %v2636_v24 = vpack.c.bf16 %v132_v19, %v128_v18  ;;  %v127_v25 = vld [vmem:[#allocation5 + $0x1c0] sm:$0xff]  ;;  %v129_v27 = vld [vmem:[#allocation5 + $0x1d0] sm:$0xff] }
  0x3c   :  { %2627 = vmatpush1.bf16.msra.mxu0 %v2626_v62  ;;  %v131_v26 = vld [vmem:[#allocation5 + $0x1e0] sm:$0xff]  ;;  %v2700_v28 = vpack.c.bf16 %v134_v21, %v130_v20  ;;  %v133_v29 = vld [vmem:[#allocation5 + $0x1f0] sm:$0xff]  ;;  %v136_v30 = vld [vmem:[#allocation5 + $0x208] sm:$0xff] }
  0x3d   :  { %2691 = vmatpush1.bf16.msra.mxu1 %v2690_v63  ;;  %2629 = vmatprep.subr.bf16.mxu0 %v2628_v0  ;;  %v140_v31 = vld [vmem:[#allocation5 + $0x228] sm:$0xff]  ;;  %v138_v32 = vld [vmem:[#allocation5 + $0x218] sm:$0xff]  ;;  %v2638_v34 = vpack.c.bf16 %v131_v26, %v127_v25  ;;  %v2702_v35 = vpack.c.bf16 %v133_v29, %v129_v27  ;;  %v135_v37 = vld [vmem:[#allocation5 + $0x200] sm:$0xff] }
  0x3e   :  { %2693 = vmatprep.subr.bf16.mxu1 %v2692_v4  ;;  %v142_v33 = vld [vmem:[#allocation5 + $0x238] sm:$0xff]  ;;  %v2640_v36 = vpack.c.bf16 %v140_v31, %v136_v30  ;;  %v139_v38 = vld [vmem:[#allocation5 + $0x220] sm:$0xff]  ;;  %v137_v39 = vld [vmem:[#allocation5 + $0x210] sm:$0xff] }
  0x3f   :  { %v2704_v40 = vpack.c.bf16 %v142_v33, %v138_v32  ;;  %v141_v41 = vld [vmem:[#allocation5 + $0x230] sm:$0xff]  ;;  %v144_v42 = vld [vmem:[#allocation5 + $0x248] sm:$0xff]  ;;  %v146_v44 = vld [vmem:[#allocation5 + $0x258] sm:$0xff]  ;;  %v2642_v46 = vpack.c.bf16 %v139_v38, %v135_v37 }
  0x40   :  { %2631 = vmatpush1.bf16.msra.mxu0 %v2630_v10  ;;  %v148_v43 = vld [vmem:[#allocation5 + $0x268] sm:$0xff]  ;;  %v150_v45 = vld [vmem:[#allocation5 + $0x278] sm:$0xff]  ;;  %v2706_v47 = vpack.c.bf16 %v141_v41, %v137_v39  ;;  %v143_v49 = vld [vmem:[#allocation5 + $0x240] sm:$0xff] }
  0x41   :  { %2695 = vmatpush1.bf16.msra.mxu1 %v2694_v11  ;;  %2633 = vmatprep.subr.bf16.mxu0 %v2632_v12  ;;  %v2644_v48 = vpack.c.bf16 %v148_v43, %v144_v42  ;;  %v147_v50 = vld [vmem:[#allocation5 + $0x260] sm:$0xff]  ;;  %v145_v51 = vld [vmem:[#allocation5 + $0x250] sm:$0xff]  ;;  %v2708_v52 = vpack.c.bf16 %v150_v45, %v146_v44  ;;  %v152_v54 = vld [vmem:[#allocation5 + $0x288] sm:$0xff] }
  0x42   :  { %2697 = vmatprep.subr.bf16.mxu1 %v2696_v16  ;;  %v149_v53 = vld [vmem:[#allocation5 + $0x270] sm:$0xff]  ;;  %v156_v55 = vld [vmem:[#allocation5 + $0x2a8] sm:$0xff]  ;;  %v154_v56 = vld [vmem:[#allocation5 + $0x298] sm:$0xff]  ;;  %v2646_v58 = vpack.c.bf16 %v147_v50, %v143_v49 }
  0x43   :  { %v158_v57 = vld [vmem:[#allocation5 + $0x2b8] sm:$0xff]  ;;  %v2710_v59 = vpack.c.bf16 %v149_v53, %v145_v51  ;;  %v2648_v60 = vpack.c.bf16 %v156_v55, %v152_v54  ;;  %v151_v61 = vld [vmem:[#allocation5 + $0x280] sm:$0xff]  ;;  %v153_v63 = vld [vmem:[#allocation5 + $0x290] sm:$0xff] }
  0x44   :  { %2635 = vmatpush1.bf16.msra.mxu0 %v2634_v22  ;;  %v155_v62 = vld [vmem:[#allocation5 + $0x2a0] sm:$0xff]  ;;  %v2712_v0 = vpack.c.bf16 %v158_v57, %v154_v56  ;;  %v157_v1 = vld [vmem:[#allocation5 + $0x2b0] sm:$0xff]  ;;  %v160_v2 = vld [vmem:[#allocation5 + $0x2c8] sm:$0xff] }
  0x45   :  { %2699 = vmatpush1.bf16.msra.mxu1 %v2698_v23  ;;  %2637 = vmatprep.subr.bf16.mxu0 %v2636_v24  ;;  %v164_v3 = vld [vmem:[#allocation5 + $0x2e8] sm:$0xff]  ;;  %v162_v4 = vld [vmem:[#allocation5 + $0x2d8] sm:$0xff]  ;;  %v2650_v6 = vpack.c.bf16 %v155_v62, %v151_v61  ;;  %v159_v7 = vld [vmem:[#allocation5 + $0x2c0] sm:$0xff]  ;;  %v2714_v8 = vpack.c.bf16 %v157_v1, %v153_v63 }
  0x46   :  { %2701 = vmatprep.subr.bf16.mxu1 %v2700_v28  ;;  %v166_v5 = vld [vmem:[#allocation5 + $0x2f8] sm:$0xff]  ;;  %v2652_v9 = vpack.c.bf16 %v164_v3, %v160_v2  ;;  %v163_v10 = vld [vmem:[#allocation5 + $0x2e0] sm:$0xff]  ;;  %v161_v11 = vld [vmem:[#allocation5 + $0x2d0] sm:$0xff] }
  0x47   :  { %v165_v12 = vld [vmem:[#allocation5 + $0x2f0] sm:$0xff]  ;;  %v2716_v13 = vpack.c.bf16 %v166_v5, %v162_v4  ;;  %v168_v14 = vld [vmem:[#allocation5 + $0x308] sm:$0xff]  ;;  %v170_v17 = vld [vmem:[#allocation5 + $0x318] sm:$0xff]  ;;  %v2654_v19 = vpack.c.bf16 %v163_v10, %v159_v7 }
  0x48   :  { %2639 = vmatpush1.bf16.msra.mxu0 %v2638_v34  ;;  %v172_v15 = vld [vmem:[#allocation5 + $0x328] sm:$0xff]  ;;  %v174_v18 = vld [vmem:[#allocation5 + $0x338] sm:$0xff]  ;;  %v2718_v20 = vpack.c.bf16 %v165_v12, %v161_v11  ;;  %v167_v22 = vld [vmem:[#allocation5 + $0x300] sm:$0xff] }
  0x49   :  { %2703 = vmatpush1.bf16.msra.mxu1 %v2702_v35  ;;  %2641 = vmatprep.subr.bf16.mxu0 %v2640_v36  ;;  %v3772_v16 = vld [vmem:[#allocation2 + $0x8] sm:$0xff]  ;;  %v2656_v21 = vpack.c.bf16 %v172_v15, %v168_v14  ;;  %v171_v23 = vld [vmem:[#allocation5 + $0x320] sm:$0xff]  ;;  %v169_v24 = vld [vmem:[#allocation5 + $0x310] sm:$0xff]  ;;  %v2720_v25 = vpack.c.bf16 %v174_v18, %v170_v17 }
  0x4a   :  { %2705 = vmatprep.subr.bf16.mxu1 %v2704_v40  ;;  %263 = vmatprep.mubr.f32.mxu0 %v3772_v16  ;;  %v173_v26 = vld [vmem:[#allocation5 + $0x330] sm:$0xff]  ;;  %v176_v27 = vld [vmem:[#allocation5 + $0x348] sm:$0xff]  ;;  %v178_v29 = vld [vmem:[#allocation5 + $0x358] sm:$0xff]  ;;  %v2658_v31 = vpack.c.bf16 %v171_v23, %v167_v22 }
  0x4b   :  { %340 = vmatprep.mubr.f32.mxu1 %v3772_v16  ;;  %v180_v28 = vld [vmem:[#allocation5 + $0x368] sm:$0xff]  ;;  %v182_v30 = vld [vmem:[#allocation5 + $0x378] sm:$0xff]  ;;  %v2722_v32 = vpack.c.bf16 %v173_v26, %v169_v24  ;;  %v175_v34 = vld [vmem:[#allocation5 + $0x340] sm:$0xff] }
  0x4c   :  { %2643 = vmatpush1.bf16.msra.mxu0 %v2642_v46  ;;  %v2660_v33 = vpack.c.bf16 %v180_v28, %v176_v27  ;;  %v179_v35 = vld [vmem:[#allocation5 + $0x360] sm:$0xff]  ;;  %v177_v36 = vld [vmem:[#allocation5 + $0x350] sm:$0xff]  ;;  %v2724_v37 = vpack.c.bf16 %v182_v30, %v178_v29  ;;  %v184_v39 = vld [vmem:[#allocation5 + $0x388] sm:$0xff] }
  0x4d   :  { %2707 = vmatpush1.bf16.msra.mxu1 %v2706_v47  ;;  %2645 = vmatprep.subr.bf16.mxu0 %v2644_v48  ;;  %v181_v38 = vld [vmem:[#allocation5 + $0x370] sm:$0xff]  ;;  %v188_v40 = vld [vmem:[#allocation5 + $0x3a8] sm:$0xff]  ;;  %v186_v41 = vld [vmem:[#allocation5 + $0x398] sm:$0xff]  ;;  %v2662_v43 = vpack.c.bf16 %v179_v35, %v175_v34 }
  0x4e   :  { %2709 = vmatprep.subr.bf16.mxu1 %v2708_v52  ;;  %v190_v42 = vld [vmem:[#allocation5 + $0x3b8] sm:$0xff]  ;;  %v2726_v44 = vpack.c.bf16 %v181_v38, %v177_v36  ;;  %v2664_v45 = vpack.c.bf16 %v188_v40, %v184_v39  ;;  %v183_v46 = vld [vmem:[#allocation5 + $0x380] sm:$0xff]  ;;  %v185_v48 = vld [vmem:[#allocation5 + $0x390] sm:$0xff] }
  0x4f   :  { %v187_v47 = vld [vmem:[#allocation5 + $0x3a0] sm:$0xff]  ;;  %v2728_v49 = vpack.c.bf16 %v190_v42, %v186_v41  ;;  %v189_v50 = vld [vmem:[#allocation5 + $0x3b0] sm:$0xff]  ;;  %v192_v51 = vld [vmem:[#allocation5 + $0x3c8] sm:$0xff] }
  0x50   :  { %2647 = vmatpush1.bf16.msra.mxu0 %v2646_v58  ;;  %v196_v52 = vld [vmem:[#allocation5 + $0x3e8] sm:$0xff]  ;;  %v194_v53 = vld [vmem:[#allocation5 + $0x3d8] sm:$0xff]  ;;  %v2666_v55 = vpack.c.bf16 %v187_v47, %v183_v46  ;;  %v2730_v56 = vpack.c.bf16 %v189_v50, %v185_v48  ;;  %v191_v58 = vld [vmem:[#allocation5 + $0x3c0] sm:$0xff] }
  0x51   :  { %2711 = vmatpush1.bf16.msra.mxu1 %v2710_v59  ;;  %2649 = vmatprep.subr.bf16.mxu0 %v2648_v60  ;;  %v198_v54 = vld [vmem:[#allocation5 + $0x3f8] sm:$0xff]  ;;  %v2668_v57 = vpack.c.bf16 %v196_v52, %v192_v51  ;;  %v195_v59 = vld [vmem:[#allocation5 + $0x3e0] sm:$0xff]  ;;  %v193_v60 = vld [vmem:[#allocation5 + $0x3d0] sm:$0xff] }
  0x52   :  { %2713 = vmatprep.subr.bf16.mxu1 %v2712_v0  ;;  %v2732_v61 = vpack.c.bf16 %v198_v54, %v194_v53  ;;  %v197_v62 = vld [vmem:[#allocation5 + $0x3f0] sm:$0xff]  ;;  %v373_v63 = vld [vmem:[#allocation5 + $0x408] sm:$0xff]  ;;  %v375_v1 = vld [vmem:[#allocation5 + $0x418] sm:$0xff]  ;;  %v2670_v3 = vpack.c.bf16 %v195_v59, %v191_v58 }
  0x53   :  { %v377_v0 = vld [vmem:[#allocation5 + $0x428] sm:$0xff]  ;;  %v379_v2 = vld [vmem:[#allocation5 + $0x438] sm:$0xff]  ;;  %v2734_v4 = vpack.c.bf16 %v197_v62, %v193_v60  ;;  %v376_v7 = vld [vmem:[#allocation5 + $0x420] sm:$0xff] }
  0x54   :  { %2651 = vmatpush1.bf16.msra.mxu0 %v2650_v6  ;;  %v2736_v5 = vpack.c.bf16 %v377_v0, %v373_v63  ;;  %v372_v6 = vld [vmem:[#allocation5 + $0x400] sm:$0xff]  ;;  %v378_v10 = vld [vmem:[#allocation5 + $0x430] sm:$0xff]  ;;  %v381_v11 = vld [vmem:[#allocation5 + $0x448] sm:$0xff] }
  0x55   :  { %2715 = vmatpush1.bf16.msra.mxu1 %v2714_v8  ;;  %2653 = vmatprep.subr.bf16.mxu0 %v2652_v9  ;;  %v374_v8 = vld [vmem:[#allocation5 + $0x410] sm:$0xff]  ;;  %v2800_v9 = vpack.c.bf16 %v379_v2, %v375_v1  ;;  %v385_v12 = vld [vmem:[#allocation5 + $0x468] sm:$0xff]  ;;  %v387_v14 = vld [vmem:[#allocation5 + $0x478] sm:$0xff]  ;;  %v2738_v17 = vpack.c.bf16 %v376_v7, %v372_v6 }
  0x56   :  { %2717 = vmatprep.subr.bf16.mxu1 %v2716_v13  ;;  %v383_v13 = vld [vmem:[#allocation5 + $0x458] sm:$0xff]  ;;  %v3776_v15 = vld [vmem:[#allocation2] sm:$0xff]  ;;  %v2802_v18 = vpack.c.bf16 %v378_v10, %v374_v8  ;;  %v382_v22 = vld [vmem:[#allocation5 + $0x450] sm:$0xff] }
  0x57   :  { %v2804_v23 = vpack.c.bf16 %v387_v14, %v383_v13  ;;  %v386_v24 = vld [vmem:[#allocation5 + $0x470] sm:$0xff]  ;;  %v393_v26 = vld [vmem:[#allocation5 + $0x4a8] sm:$0xff]  ;;  %v391_v27 = vld [vmem:[#allocation5 + $0x498] sm:$0xff] }
  0x58   :  { %2655 = vmatpush1.bf16.msra.mxu0 %v2654_v19  ;;  %v2740_v19 = vpack.c.bf16 %v385_v12, %v381_v11  ;;  %v395_v28 = vld [vmem:[#allocation5 + $0x4b8] sm:$0xff]  ;;  %v2806_v30 = vpack.c.bf16 %v386_v24, %v382_v22  ;;  %v390_v34 = vld [vmem:[#allocation5 + $0x490] sm:$0xff]  ;;  %v401_v38 = vld [vmem:[#allocation5 + $0x4e8] sm:$0xff] }
  0x59   :  { %2719 = vmatpush1.bf16.msra.mxu1 %v2718_v20  ;;  %2657 = vmatprep.subr.bf16.mxu0 %v2656_v21  ;;  %v380_v20 = vld [vmem:[#allocation5 + $0x440] sm:$0xff]  ;;  %v2808_v35 = vpack.c.bf16 %v395_v28, %v391_v27  ;;  %v394_v36 = vld [vmem:[#allocation5 + $0x4b0] sm:$0xff]  ;;  %v399_v39 = vld [vmem:[#allocation5 + $0x4d8] sm:$0xff] }
  0x5a   :  { %2721 = vmatprep.subr.bf16.mxu1 %v2720_v25  ;;  %v384_v21 = vld [vmem:[#allocation5 + $0x460] sm:$0xff]  ;;  %v389_v25 = vld [vmem:[#allocation5 + $0x488] sm:$0xff]  ;;  %v403_v40 = vld [vmem:[#allocation5 + $0x4f8] sm:$0xff]  ;;  %v2810_v42 = vpack.c.bf16 %v394_v36, %v390_v34 }
  0x5b   :  { %v2742_v29 = vpack.c.bf16 %v384_v21, %v380_v20  ;;  %v398_v46 = vld [vmem:[#allocation5 + $0x4d0] sm:$0xff]  ;;  %v2812_v47 = vpack.c.bf16 %v403_v40, %v399_v39  ;;  %v409_v50 = vld [vmem:[#allocation5 + $0x528] sm:$0xff]  ;;  %v407_v51 = vld [vmem:[#allocation5 + $0x518] sm:$0xff] }
  0x5c   :  { %2659 = vmatpush1.bf16.msra.mxu0 %v2658_v31  ;;  %v2744_v31 = vpack.c.bf16 %v393_v26, %v389_v25  ;;  %v402_v48 = vld [vmem:[#allocation5 + $0x4f0] sm:$0xff]  ;;  %v411_v52 = vld [vmem:[#allocation5 + $0x538] sm:$0xff]  ;;  %v417_v62 = vld [vmem:[#allocation5 + $0x568] sm:$0xff] }
  0x5d   :  { %2723 = vmatpush1.bf16.msra.mxu1 %v2722_v32  ;;  %2661 = vmatprep.subr.bf16.mxu0 %v2660_v33  ;;  %v388_v32 = vld [vmem:[#allocation5 + $0x480] sm:$0xff]  ;;  %v2814_v54 = vpack.c.bf16 %v402_v48, %v398_v46  ;;  %v406_v58 = vld [vmem:[#allocation5 + $0x510] sm:$0xff]  ;;  %v2816_v59 = vpack.c.bf16 %v411_v52, %v407_v51  ;;  %v415_v63 = vld [vmem:[#allocation5 + $0x558] sm:$0xff] }
  0x5e   :  { %2725 = vmatprep.subr.bf16.mxu1 %v2724_v37  ;;  %v392_v33 = vld [vmem:[#allocation5 + $0x4a0] sm:$0xff]  ;;  %v397_v37 = vld [vmem:[#allocation5 + $0x4c8] sm:$0xff]  ;;  %v410_v60 = vld [vmem:[#allocation5 + $0x530] sm:$0xff] }
  0x5f   :  { %v2746_v41 = vpack.c.bf16 %v392_v33, %v388_v32  ;;  %v419_v0 = vld [vmem:[#allocation5 + $0x578] sm:$0xff]  ;;  %v2818_v2 = vpack.c.bf16 %v410_v60, %v406_v58  ;;  %v414_v6 = vld [vmem:[#allocation5 + $0x550] sm:$0xff]  ;;  %v425_v10 = vld [vmem:[#allocation5 + $0x5a8] sm:$0xff] }
  0x60   :  { %2663 = vmatpush1.bf16.msra.mxu0 %v2662_v43  ;;  %v2748_v43 = vpack.c.bf16 %v401_v38, %v397_v37  ;;  %v2820_v7 = vpack.c.bf16 %v419_v0, %v415_v63  ;;  %v418_v8 = vld [vmem:[#allocation5 + $0x570] sm:$0xff]  ;;  %v423_v11 = vld [vmem:[#allocation5 + $0x598] sm:$0xff]  ;;  %v420_v20 = vld [vmem:[#allocation5 + $0x580] sm:$0xff] }
  0x61   :  { %2727 = vmatpush1.bf16.msra.mxu1 %v2726_v44  ;;  %2665 = vmatprep.subr.bf16.mxu0 %v2664_v45  ;;  %v396_v44 = vld [vmem:[#allocation5 + $0x4c0] sm:$0xff]  ;;  %v427_v12 = vld [vmem:[#allocation5 + $0x5b8] sm:$0xff]  ;;  %v422_v22 = vld [vmem:[#allocation5 + $0x590] sm:$0xff] }
  0x62   :  { %2729 = vmatprep.subr.bf16.mxu1 %v2728_v49  ;;  %v400_v45 = vld [vmem:[#allocation5 + $0x4e0] sm:$0xff]  ;;  %v405_v49 = vld [vmem:[#allocation5 + $0x508] sm:$0xff]  ;;  %v3780_v13 = vld [vmem:[#allocation2 + $0x18] sm:$0xff] }
  0x63   :  { %v2750_v53 = vpack.c.bf16 %v400_v45, %v396_v44  ;;  %v424_v21 = vld [vmem:[#allocation5 + $0x5a0] sm:$0xff]  ;;  %v426_v24 = vld [vmem:[#allocation5 + $0x5b0] sm:$0xff]  ;;  %v429_v25 = vld [vmem:[#allocation5 + $0x5c8] sm:$0xff] }
  0x64   :  { %2667 = vmatpush1.bf16.msra.mxu0 %v2666_v55  ;;  %v2752_v55 = vpack.c.bf16 %v409_v50, %v405_v49  ;;  %v433_v26 = vld [vmem:[#allocation5 + $0x5e8] sm:$0xff]  ;;  %v431_v27 = vld [vmem:[#allocation5 + $0x5d8] sm:$0xff]  ;;  %v428_v32 = vld [vmem:[#allocation5 + $0x5c0] sm:$0xff] }
  0x65   :  { %2731 = vmatpush1.bf16.msra.mxu1 %v2730_v56  ;;  %2669 = vmatprep.subr.bf16.mxu0 %v2668_v57  ;;  %v404_v56 = vld [vmem:[#allocation5 + $0x500] sm:$0xff]  ;;  %v435_v28 = vld [vmem:[#allocation5 + $0x5f8] sm:$0xff]  ;;  %v430_v34 = vld [vmem:[#allocation5 + $0x5d0] sm:$0xff] }
  0x66   :  { %2733 = vmatprep.subr.bf16.mxu1 %v2732_v61  ;;  %v408_v57 = vld [vmem:[#allocation5 + $0x520] sm:$0xff]  ;;  %v413_v61 = vld [vmem:[#allocation5 + $0x548] sm:$0xff]  ;;  %v434_v36 = vld [vmem:[#allocation5 + $0x5f0] sm:$0xff] }
  0x67   :  { %v2754_v1 = vpack.c.bf16 %v408_v57, %v404_v56  ;;  %v432_v33 = vld [vmem:[#allocation5 + $0x5e0] sm:$0xff]  ;;  %v437_v37 = vld [vmem:[#allocation5 + $0x608] sm:$0xff]  ;;  %v439_v39 = vld [vmem:[#allocation5 + $0x618] sm:$0xff] }
  0x68   :  { %2671 = vmatpush1.bf16.msra.mxu0 %v2670_v3  ;;  %v2756_v3 = vpack.c.bf16 %v417_v62, %v413_v61  ;;  %v441_v38 = vld [vmem:[#allocation5 + $0x628] sm:$0xff]  ;;  %v443_v40 = vld [vmem:[#allocation5 + $0x638] sm:$0xff]  ;;  %v436_v44 = vld [vmem:[#allocation5 + $0x600] sm:$0xff] }
  0x69   :  { %2735 = vmatpush1.bf16.msra.mxu1 %v2734_v4  ;;  %2737 = vmatprep.subr.bf16.mxu0 %v2736_v5  ;;  %v412_v4 = vld [vmem:[#allocation5 + $0x540] sm:$0xff]  ;;  %v438_v46 = vld [vmem:[#allocation5 + $0x610] sm:$0xff]  ;;  %v445_v49 = vld [vmem:[#allocation5 + $0x648] sm:$0xff] }
  0x6a   :  { %2801 = vmatprep.subr.bf16.mxu1 %v2800_v9  ;;  %v416_v5 = vld [vmem:[#allocation5 + $0x560] sm:$0xff]  ;;  %v421_v9 = vld [vmem:[#allocation5 + $0x588] sm:$0xff]  ;;  %v442_v48 = vld [vmem:[#allocation5 + $0x630] sm:$0xff] }
  0x6b   :  { %264 = vmatmul.mubr.f32.vlgmr.msra.gmra.mrb[0].mxu0 %v3776_v15  ;;  %v2758_v14 = vpack.c.bf16 %v416_v5, %v412_v4  ;;  %v440_v45 = vld [vmem:[#allocation5 + $0x620] sm:$0xff]  ;;  %v449_v50 = vld [vmem:[#allocation5 + $0x668] sm:$0xff]  ;;  %v447_v51 = vld [vmem:[#allocation5 + $0x658] sm:$0xff] }
  0x6c   :  { %341 = vmatmul.mubr.f32.vlgmr.msra.gmra.mrb[0].mxu1 %v3776_v15  ;;  %2739 = vmatpush1.bf16.msra.mxu0 %v2738_v17  ;;  %v3783_v17 = vld [vmem:[#allocation2 + $0x10] sm:$0xff]  ;;  %v451_v52 = vld [vmem:[#allocation5 + $0x678] sm:$0xff]  ;;  %v444_v56 = vld [vmem:[#allocation5 + $0x640] sm:$0xff] }
  0x6d   :  { %2803 = vmatpush1.bf16.msra.mxu1 %v2802_v18  ;;  %2741 = vmatprep.subr.bf16.mxu0 %v2740_v19  ;;  %v2822_v18 = vpack.c.bf16 %v418_v8, %v414_v6  ;;  %v2760_v19 = vpack.c.bf16 %v425_v10, %v421_v9  ;;  %v448_v57 = vld [vmem:[#allocation5 + $0x660] sm:$0xff]  ;;  %v446_v58 = vld [vmem:[#allocation5 + $0x650] sm:$0xff]  ;;  %v453_v61 = vld [vmem:[#allocation5 + $0x688] sm:$0xff] }
  0x6e   :  { %2805 = vmatprep.subr.bf16.mxu1 %v2804_v23  ;;  %269 = vmatprep.mubr.f32.mxu0 %v3780_v13  ;;  %v2824_v23 = vpack.c.bf16 %v427_v12, %v423_v11  ;;  %v450_v60 = vld [vmem:[#allocation5 + $0x670] sm:$0xff]  ;;  %v457_v62 = vld [vmem:[#allocation5 + $0x6a8] sm:$0xff]  ;;  %v455_v63 = vld [vmem:[#allocation5 + $0x698] sm:$0xff] }
  0x6f   :  { %346 = vmatprep.mubr.f32.mxu1 %v3780_v13  ;;  %270 = vmatmul.mubr.f32.gmra.mrb[2].mxu0 %v3783_v17  ;;  %v459_v0 = vld [vmem:[#allocation5 + $0x6b8] sm:$0xff]  ;;  %v452_v4 = vld [vmem:[#allocation5 + $0x680] sm:$0xff]  ;;  %v454_v6 = vld [vmem:[#allocation5 + $0x690] sm:$0xff] }
  0x70   :  { %2743 = vmatpush1.bf16.msra.mxu0 %v2742_v29  ;;  %347 = vmatmul.mubr.f32.gmra.mrb[2].mxu1 %v3783_v17  ;;  %v2762_v29 = vpack.c.bf16 %v424_v21, %v420_v20  ;;  %v456_v5 = vld [vmem:[#allocation5 + $0x6a0] sm:$0xff]  ;;  %v458_v8 = vld [vmem:[#allocation5 + $0x6b0] sm:$0xff]  ;;  %v461_v9 = vld [vmem:[#allocation5 + $0x6c8] sm:$0xff] }
  0x71   :  { %2807 = vmatpush1.bf16.msra.mxu1 %v2806_v30  ;;  %2745 = vmatprep.subr.bf16.mxu0 %v2744_v31  ;;  %v2826_v30 = vpack.c.bf16 %v426_v24, %v422_v22  ;;  %v2764_v31 = vpack.c.bf16 %v433_v26, %v429_v25  ;;  %v465_v10 = vld [vmem:[#allocation5 + $0x6e8] sm:$0xff]  ;;  %v463_v11 = vld [vmem:[#allocation5 + $0x6d8] sm:$0xff]  ;;  %v460_v20 = vld [vmem:[#allocation5 + $0x6c0] sm:$0xff] }
  0x72   :  { %2809 = vmatprep.subr.bf16.mxu1 %v2808_v35  ;;  %564 = vmatprep.mubr.f32.mxu0 %v3772_v16  ;;  %v2828_v35 = vpack.c.bf16 %v435_v28, %v431_v27  ;;  %v467_v12 = vld [vmem:[#allocation5 + $0x6f8] sm:$0xff]  ;;  %v464_v21 = vld [vmem:[#allocation5 + $0x6e0] sm:$0xff]  ;;  %v462_v22 = vld [vmem:[#allocation5 + $0x6d0] sm:$0xff] }
  0x73   :  { %641 = vmatprep.mubr.f32.mxu1 %v3772_v16  ;;  %v466_v24 = vld [vmem:[#allocation5 + $0x6f0] sm:$0xff]  ;;  %v469_v25 = vld [vmem:[#allocation5 + $0x708] sm:$0xff]  ;;  %v471_v27 = vld [vmem:[#allocation5 + $0x718] sm:$0xff] }
  0x74   :  { %2747 = vmatpush1.bf16.msra.mxu0 %v2746_v41  ;;  %v2766_v41 = vpack.c.bf16 %v432_v33, %v428_v32  ;;  %v473_v26 = vld [vmem:[#allocation5 + $0x728] sm:$0xff]  ;;  %v475_v28 = vld [vmem:[#allocation5 + $0x738] sm:$0xff]  ;;  %v468_v32 = vld [vmem:[#allocation5 + $0x700] sm:$0xff] }
  0x75   :  { %2811 = vmatpush1.bf16.msra.mxu1 %v2810_v42  ;;  %2749 = vmatprep.subr.bf16.mxu0 %v2748_v43  ;;  %v2830_v42 = vpack.c.bf16 %v434_v36, %v430_v34  ;;  %v2768_v43 = vpack.c.bf16 %v441_v38, %v437_v37  ;;  %v472_v33 = vld [vmem:[#allocation5 + $0x720] sm:$0xff]  ;;  %v470_v34 = vld [vmem:[#allocation5 + $0x710] sm:$0xff]  ;;  %v477_v37 = vld [vmem:[#allocation5 + $0x748] sm:$0xff] }
  0x76   :  { %2813 = vmatprep.subr.bf16.mxu1 %v2812_v47  ;;  %v2832_v47 = vpack.c.bf16 %v443_v40, %v439_v39  ;;  %v474_v36 = vld [vmem:[#allocation5 + $0x730] sm:$0xff]  ;;  %v481_v38 = vld [vmem:[#allocation5 + $0x768] sm:$0xff]  ;;  %v479_v39 = vld [vmem:[#allocation5 + $0x758] sm:$0xff] }
  0x77   :  { %v483_v40 = vld [vmem:[#allocation5 + $0x778] sm:$0xff] }
  0x78   :  { %2751 = vmatpush1.bf16.msra.mxu0 %v2750_v53  ;;  %v2770_v53 = vpack.c.bf16 %v440_v45, %v436_v44  ;;  %v476_v44 = vld [vmem:[#allocation5 + $0x740] sm:$0xff] }
  0x79   :  { %2815 = vmatpush1.bf16.msra.mxu1 %v2814_v54  ;;  %2753 = vmatprep.subr.bf16.mxu0 %v2752_v55  ;;  %v2834_v54 = vpack.c.bf16 %v442_v48, %v438_v46  ;;  %v2772_v55 = vpack.c.bf16 %v449_v50, %v445_v49  ;;  %v480_v45 = vld [vmem:[#allocation5 + $0x760] sm:$0xff]  ;;  %v478_v46 = vld [vmem:[#allocation5 + $0x750] sm:$0xff]  ;;  %v485_v49 = vld [vmem:[#allocation5 + $0x788] sm:$0xff] }
  0x7a   :  { %2817 = vmatprep.subr.bf16.mxu1 %v2816_v59  ;;  %v2836_v59 = vpack.c.bf16 %v451_v52, %v447_v51  ;;  %v482_v48 = vld [vmem:[#allocation5 + $0x770] sm:$0xff]  ;;  %v489_v50 = vld [vmem:[#allocation5 + $0x7a8] sm:$0xff]  ;;  %v487_v51 = vld [vmem:[#allocation5 + $0x798] sm:$0xff] }
  0x7b   :  { %v491_v52 = vld [vmem:[#allocation5 + $0x7b8] sm:$0xff] }
  0x7c   :  { %2755 = vmatpush1.bf16.msra.mxu0 %v2754_v1  ;;  %v2774_v1 = vpack.c.bf16 %v448_v57, %v444_v56  ;;  %v484_v56 = vld [vmem:[#allocation5 + $0x780] sm:$0xff] }
  0x7d   :  { %2819 = vmatpush1.bf16.msra.mxu1 %v2818_v2  ;;  %2757 = vmatprep.subr.bf16.mxu0 %v2756_v3  ;;  %v2838_v2 = vpack.c.bf16 %v450_v60, %v446_v58  ;;  %v2776_v3 = vpack.c.bf16 %v457_v62, %v453_v61  ;;  %v488_v57 = vld [vmem:[#allocation5 + $0x7a0] sm:$0xff]  ;;  %v486_v58 = vld [vmem:[#allocation5 + $0x790] sm:$0xff]  ;;  %v493_v61 = vld [vmem:[#allocation5 + $0x7c8] sm:$0xff] }
  0x7e   :  { %2821 = vmatprep.subr.bf16.mxu1 %v2820_v7  ;;  %v2840_v7 = vpack.c.bf16 %v459_v0, %v455_v63  ;;  %v490_v60 = vld [vmem:[#allocation5 + $0x7b0] sm:$0xff]  ;;  %v497_v62 = vld [vmem:[#allocation5 + $0x7e8] sm:$0xff]  ;;  %v495_v63 = vld [vmem:[#allocation5 + $0x7d8] sm:$0xff] }
  0x7f   :  { %v499_v0 = vld [vmem:[#allocation5 + $0x7f8] sm:$0xff] }
  0x80   :  { %2759 = vmatpush1.bf16.msra.mxu0 %v2758_v14  ;;  %v2778_v14 = vpack.c.bf16 %v456_v5, %v452_v4  ;;  %v492_v4 = vld [vmem:[#allocation5 + $0x7c0] sm:$0xff] }
  0x81   :  { %2823 = vmatpush1.bf16.msra.mxu1 %v2822_v18  ;;  %2761 = vmatprep.subr.bf16.mxu0 %v2760_v19  ;;  %v2842_v18 = vpack.c.bf16 %v458_v8, %v454_v6  ;;  %v2780_v19 = vpack.c.bf16 %v465_v10, %v461_v9  ;;  %v496_v5 = vld [vmem:[#allocation5 + $0x7e0] sm:$0xff]  ;;  %v494_v6 = vld [vmem:[#allocation5 + $0x7d0] sm:$0xff]  ;;  %v690_v9 = vld [vmem:[#allocation5 + $0x808] sm:$0xff] }
  0x82   :  { %2825 = vmatprep.subr.bf16.mxu1 %v2824_v23  ;;  %v2844_v23 = vpack.c.bf16 %v467_v12, %v463_v11  ;;  %v498_v8 = vld [vmem:[#allocation5 + $0x7f0] sm:$0xff]  ;;  %v694_v10 = vld [vmem:[#allocation5 + $0x828] sm:$0xff]  ;;  %v692_v11 = vld [vmem:[#allocation5 + $0x818] sm:$0xff] }
  0x83   :  { %v696_v12 = vld [vmem:[#allocation5 + $0x838] sm:$0xff] }
  0x84   :  { %2763 = vmatpush1.bf16.msra.mxu0 %v2762_v29  ;;  %v2782_v29 = vpack.c.bf16 %v464_v21, %v460_v20  ;;  %v689_v20 = vld [vmem:[#allocation5 + $0x800] sm:$0xff] }
  0x85   :  { %2827 = vmatpush1.bf16.msra.mxu1 %v2826_v30  ;;  %2765 = vmatprep.subr.bf16.mxu0 %v2764_v31  ;;  %v2846_v30 = vpack.c.bf16 %v466_v24, %v462_v22  ;;  %v2784_v31 = vpack.c.bf16 %v473_v26, %v469_v25  ;;  %v693_v21 = vld [vmem:[#allocation5 + $0x820] sm:$0xff]  ;;  %v2928_v22 = vpack.c.bf16 %v696_v12, %v692_v11  ;;  %v695_v24 = vld [vmem:[#allocation5 + $0x830] sm:$0xff]  ;;  %v698_v25 = vld [vmem:[#allocation5 + $0x848] sm:$0xff] }
  0x86   :  { %2829 = vmatprep.subr.bf16.mxu1 %v2828_v35  ;;  %v2848_v35 = vpack.c.bf16 %v475_v28, %v471_v27  ;;  %v702_v26 = vld [vmem:[#allocation5 + $0x868] sm:$0xff]  ;;  %v2866_v27 = vpack.c.bf16 %v693_v21, %v689_v20  ;;  %v700_v28 = vld [vmem:[#allocation5 + $0x858] sm:$0xff]  ;;  %v731_v20 = vld [vmem:[#allocation5 + $0x950] sm:$0xff] }
  0x87   :  { %v736_v11 = vld [vmem:[#allocation5 + $0x978] sm:$0xff] }
  0x88   :  { %2767 = vmatpush1.bf16.msra.mxu0 %v2766_v41  ;;  %v2786_v41 = vpack.c.bf16 %v472_v33, %v468_v32  ;;  %v701_v32 = vld [vmem:[#allocation5 + $0x860] sm:$0xff]  ;;  %v699_v33 = vld [vmem:[#allocation5 + $0x850] sm:$0xff] }
  0x89   :  { %2831 = vmatpush1.bf16.msra.mxu1 %v2830_v42  ;;  %2769 = vmatprep.subr.bf16.mxu0 %v2768_v43  ;;  %v2850_v42 = vpack.c.bf16 %v474_v36, %v470_v34  ;;  %v2788_v43 = vpack.c.bf16 %v481_v38, %v477_v37  ;;  %v2868_v34 = vpack.c.bf16 %v702_v26, %v698_v25  ;;  %v706_v36 = vld [vmem:[#allocation5 + $0x888] sm:$0xff]  ;;  %v740_v25 = vld [vmem:[#allocation5 + $0x998] sm:$0xff] }
  0x8a   :  { %2833 = vmatprep.subr.bf16.mxu1 %v2832_v47  ;;  %v2852_v47 = vpack.c.bf16 %v483_v40, %v479_v39  ;;  %v710_v37 = vld [vmem:[#allocation5 + $0x8a8] sm:$0xff]  ;;  %v708_v39 = vld [vmem:[#allocation5 + $0x898] sm:$0xff] }
  0x8b   :  { %v712_v40 = vld [vmem:[#allocation5 + $0x8b8] sm:$0xff] }
  0x8c   :  { %2771 = vmatpush1.bf16.msra.mxu0 %v2770_v53  ;;  %v2790_v53 = vpack.c.bf16 %v480_v45, %v476_v44  ;;  %v705_v44 = vld [vmem:[#allocation5 + $0x880] sm:$0xff]  ;;  %v744_v26 = vld [vmem:[#allocation5 + $0x9b8] sm:$0xff] }
  0x8d   :  { %2835 = vmatpush1.bf16.msra.mxu1 %v2834_v54  ;;  %2773 = vmatprep.subr.bf16.mxu0 %v2772_v55  ;;  %v2854_v54 = vpack.c.bf16 %v482_v48, %v478_v46  ;;  %v2792_v55 = vpack.c.bf16 %v489_v50, %v485_v49  ;;  %v709_v45 = vld [vmem:[#allocation5 + $0x8a0] sm:$0xff]  ;;  %v707_v46 = vld [vmem:[#allocation5 + $0x890] sm:$0xff]  ;;  %v714_v49 = vld [vmem:[#allocation5 + $0x8c8] sm:$0xff] }
  0x8e   :  { %2837 = vmatprep.subr.bf16.mxu1 %v2836_v59  ;;  %v2856_v59 = vpack.c.bf16 %v491_v52, %v487_v51  ;;  %v711_v48 = vld [vmem:[#allocation5 + $0x8b0] sm:$0xff]  ;;  %v718_v50 = vld [vmem:[#allocation5 + $0x8e8] sm:$0xff]  ;;  %v720_v51 = vld [vmem:[#allocation5 + $0x8f8] sm:$0xff]  ;;  %v2874_v52 = vpack.c.bf16 %v709_v45, %v705_v44 }
  0x8f   :  { %v747_v44 = vld [vmem:[#allocation5 + $0x9d0] sm:$0xff] }
  0x90   :  { %2775 = vmatpush1.bf16.msra.mxu0 %v2774_v1  ;;  %v2794_v1 = vpack.c.bf16 %v488_v57, %v484_v56  ;;  %v717_v56 = vld [vmem:[#allocation5 + $0x8e0] sm:$0xff]  ;;  %v715_v57 = vld [vmem:[#allocation5 + $0x8d0] sm:$0xff] }
  0x91   :  { %2839 = vmatpush1.bf16.msra.mxu1 %v2838_v2  ;;  %2777 = vmatprep.subr.bf16.mxu0 %v2776_v3  ;;  %v2858_v2 = vpack.c.bf16 %v490_v60, %v486_v58  ;;  %v2796_v3 = vpack.c.bf16 %v497_v62, %v493_v61  ;;  %v722_v60 = vld [vmem:[#allocation5 + $0x908] sm:$0xff]  ;;  %v724_v62 = vld [vmem:[#allocation5 + $0x918] sm:$0xff] }
  0x92   :  { %2841 = vmatprep.subr.bf16.mxu1 %v2840_v7  ;;  %v2860_v7 = vpack.c.bf16 %v499_v0, %v495_v63  ;;  %v726_v61 = vld [vmem:[#allocation5 + $0x928] sm:$0xff]  ;;  %v728_v63 = vld [vmem:[#allocation5 + $0x938] sm:$0xff] }
  0x94   :  { %2779 = vmatpush1.bf16.msra.mxu0 %v2778_v14  ;;  %v2798_v14 = vpack.c.bf16 %v496_v5, %v492_v4  ;;  %v725_v4 = vld [vmem:[#allocation5 + $0x920] sm:$0xff]  ;;  %v723_v5 = vld [vmem:[#allocation5 + $0x910] sm:$0xff] }
  0x95   :  { %2843 = vmatpush1.bf16.msra.mxu1 %v2842_v18  ;;  %2781 = vmatprep.subr.bf16.mxu0 %v2780_v19  ;;  %v2862_v18 = vpack.c.bf16 %v498_v8, %v494_v6  ;;  %v2864_v19 = vpack.c.bf16 %v694_v10, %v690_v9  ;;  %v2944_v6 = vpack.c.bf16 %v728_v63, %v724_v62  ;;  %v730_v8 = vld [vmem:[#allocation5 + $0x948] sm:$0xff]  ;;  %v732_v10 = vld [vmem:[#allocation5 + $0x958] sm:$0xff] }
  0x96   :  { %2845 = vmatprep.subr.bf16.mxu1 %v2844_v23  ;;  %v691_v23 = vld [vmem:[#allocation5 + $0x810] sm:$0xff]  ;;  %v734_v9 = vld [vmem:[#allocation5 + $0x968] sm:$0xff]  ;;  %v2948_v21 = vpack.c.bf16 %v736_v11, %v732_v10 }
  0x98   :  { %2783 = vmatpush1.bf16.msra.mxu0 %v2782_v29  ;;  %v704_v29 = vld [vmem:[#allocation5 + $0x878] sm:$0xff] }
  0x99   :  { %2847 = vmatpush1.bf16.msra.mxu1 %v2846_v30  ;;  %2785 = vmatprep.subr.bf16.mxu0 %v2784_v31  ;;  %v2930_v30 = vpack.c.bf16 %v695_v24, %v691_v23  ;;  %v697_v31 = vld [vmem:[#allocation5 + $0x840] sm:$0xff]  ;;  %v2932_v38 = vpack.c.bf16 %v704_v29, %v700_v28  ;;  %v738_v23 = vld [vmem:[#allocation5 + $0x988] sm:$0xff] }
  0x9a   :  { %2849 = vmatprep.subr.bf16.mxu1 %v2848_v35  ;;  %v703_v35 = vld [vmem:[#allocation5 + $0x870] sm:$0xff]  ;;  %v742_v24 = vld [vmem:[#allocation5 + $0x9a8] sm:$0xff] }
  0x9b   :  { %v2888_v29 = vpack.c.bf16 %v742_v24, %v738_v23  ;;  %v780_v23 = vld [vmem:[#allocation5 + $0xad8] sm:$0xff] }
  0x9c   :  { %2787 = vmatpush1.bf16.msra.mxu0 %v2786_v41  ;;  %v2870_v41 = vpack.c.bf16 %v701_v32, %v697_v31  ;;  %v741_v31 = vld [vmem:[#allocation5 + $0x9a0] sm:$0xff]  ;;  %v739_v32 = vld [vmem:[#allocation5 + $0x990] sm:$0xff]  ;;  %v784_v24 = vld [vmem:[#allocation5 + $0xaf8] sm:$0xff] }
  0x9d   :  { %2851 = vmatpush1.bf16.msra.mxu1 %v2850_v42  ;;  %2789 = vmatprep.subr.bf16.mxu0 %v2788_v43  ;;  %v2934_v42 = vpack.c.bf16 %v703_v35, %v699_v33  ;;  %v2872_v43 = vpack.c.bf16 %v710_v37, %v706_v36  ;;  %v2952_v33 = vpack.c.bf16 %v744_v26, %v740_v25  ;;  %v746_v35 = vld [vmem:[#allocation5 + $0x9c8] sm:$0xff]  ;;  %v748_v37 = vld [vmem:[#allocation5 + $0x9d8] sm:$0xff] }
  0x9e   :  { %2853 = vmatprep.subr.bf16.mxu1 %v2852_v47  ;;  %v2936_v47 = vpack.c.bf16 %v712_v40, %v708_v39  ;;  %v750_v36 = vld [vmem:[#allocation5 + $0x9e8] sm:$0xff] }
  0xa0   :  { %2791 = vmatpush1.bf16.msra.mxu0 %v2790_v53  ;;  %v2938_v53 = vpack.c.bf16 %v711_v48, %v707_v46  ;;  %v751_v46 = vld [vmem:[#allocation5 + $0x9f0] sm:$0xff]  ;;  %v758_v48 = vld [vmem:[#allocation5 + $0xa28] sm:$0xff] }
  0xa1   :  { %2855 = vmatpush1.bf16.msra.mxu1 %v2854_v54  ;;  %2793 = vmatprep.subr.bf16.mxu0 %v2792_v55  ;;  %v2876_v54 = vpack.c.bf16 %v718_v50, %v714_v49  ;;  %v713_v55 = vld [vmem:[#allocation5 + $0x8c0] sm:$0xff]  ;;  %v756_v49 = vld [vmem:[#allocation5 + $0xa18] sm:$0xff] }
  0xa2   :  { %2857 = vmatprep.subr.bf16.mxu1 %v2856_v59  ;;  %v719_v59 = vld [vmem:[#allocation5 + $0x8f0] sm:$0xff]  ;;  %v2878_v0 = vpack.c.bf16 %v717_v56, %v713_v55  ;;  %v760_v50 = vld [vmem:[#allocation5 + $0xa38] sm:$0xff] }
  0xa3   :  { %v755_v55 = vld [vmem:[#allocation5 + $0xa10] sm:$0xff]  ;;  %v2960_v56 = vpack.c.bf16 %v760_v50, %v756_v49 }
  0xa4   :  { %2795 = vmatpush1.bf16.msra.mxu0 %v2794_v1  ;;  %v2942_v1 = vpack.c.bf16 %v719_v59, %v715_v57  ;;  %v759_v57 = vld [vmem:[#allocation5 + $0xa30] sm:$0xff]  ;;  %v766_v59 = vld [vmem:[#allocation5 + $0xa68] sm:$0xff] }
  0xa5   :  { %2859 = vmatpush1.bf16.msra.mxu1 %v2858_v2  ;;  %2797 = vmatprep.subr.bf16.mxu0 %v2796_v3  ;;  %v2880_v2 = vpack.c.bf16 %v726_v61, %v722_v60  ;;  %v721_v3 = vld [vmem:[#allocation5 + $0x900] sm:$0xff]  ;;  %v764_v60 = vld [vmem:[#allocation5 + $0xa58] sm:$0xff]  ;;  %v2962_v63 = vpack.c.bf16 %v759_v57, %v755_v55  ;;  %v799_v55 = vld [vmem:[#allocation5 + $0xb70] sm:$0xff] }
  0xa6   :  { %2861 = vmatprep.subr.bf16.mxu1 %v2860_v7  ;;  %v727_v7 = vld [vmem:[#allocation5 + $0x930] sm:$0xff]  ;;  %v2882_v12 = vpack.c.bf16 %v725_v4, %v721_v3  ;;  %v768_v61 = vld [vmem:[#allocation5 + $0xa78] sm:$0xff]  ;;  %v806_v57 = vld [vmem:[#allocation5 + $0xba8] sm:$0xff] }
  0xa7   :  { %v763_v3 = vld [vmem:[#allocation5 + $0xa50] sm:$0xff]  ;;  %v2964_v4 = vpack.c.bf16 %v768_v61, %v764_v60 }
  0xa8   :  { %2799 = vmatpush1.bf16.msra.mxu0 %v2798_v14  ;;  %v2884_v14 = vpack.c.bf16 %v734_v9, %v730_v8  ;;  %v772_v8 = vld [vmem:[#allocation5 + $0xa98] sm:$0xff] }
  0xa9   :  { %2863 = vmatpush1.bf16.msra.mxu1 %v2862_v18  ;;  %2865 = vmatprep.subr.bf16.mxu0 %v2864_v19  ;;  %v729_v18 = vld [vmem:[#allocation5 + $0x940] sm:$0xff]  ;;  %v776_v9 = vld [vmem:[#allocation5 + $0xab8] sm:$0xff] }
  0xaa   :  { %2929 = vmatprep.subr.bf16.mxu1 %v2928_v22  ;;  %v733_v19 = vld [vmem:[#allocation5 + $0x960] sm:$0xff]  ;;  %v735_v22 = vld [vmem:[#allocation5 + $0x970] sm:$0xff] }
  0xab   :  { %565 = vmatmul.mubr.f32.vlgmr.msra.gmra.mrb[4].mxu0 %v3776_v15  ;;  %v2950_v28 = vpack.c.bf16 %v735_v22, %v731_v20  ;;  %v775_v20 = vld [vmem:[#allocation5 + $0xab0] sm:$0xff]  ;;  %v782_v22 = vld [vmem:[#allocation5 + $0xae8] sm:$0xff] }
  0xac   :  { %642 = vmatmul.mubr.f32.vlgmr.msra.gmra.mrb[4].mxu1 %v3776_v15  ;;  %2867 = vmatpush1.bf16.msra.mxu0 %v2866_v27  ;;  %v716_v15 = vld [vmem:[#allocation5 + $0x8d8] sm:$0xff]  ;;  %v2886_v27 = vpack.c.bf16 %v733_v19, %v729_v18  ;;  %v771_v18 = vld [vmem:[#allocation5 + $0xa90] sm:$0xff]  ;;  %v2968_v19 = vpack.c.bf16 %v776_v9, %v772_v8 }
  0xad   :  { %2931 = vmatpush1.bf16.msra.mxu1 %v2930_v30  ;;  %570 = vmatprep.mubr.f32.mxu0 %v3780_v13  ;;  %v2940_v58 = vpack.c.bf16 %v720_v51, %v716_v15  ;;  %v737_v30 = vld [vmem:[#allocation5 + $0x980] sm:$0xff]  ;;  %v2958_v51 = vpack.c.bf16 %v751_v46, %v747_v44  ;;  %v2970_v26 = vpack.c.bf16 %v775_v20, %v771_v18  ;;  %v791_v44 = vld [vmem:[#allocation5 + $0xb30] sm:$0xff]  ;;  %v798_v46 = vld [vmem:[#allocation5 + $0xb68] sm:$0xff] }
  0xae   :  { %647 = vmatprep.mubr.f32.mxu1 %v3780_v13  ;;  %2869 = vmatprep.subr.bf16.mxu0 %v2868_v34  ;;  %v743_v34 = vld [vmem:[#allocation5 + $0x9b0] sm:$0xff]  ;;  %v2890_v39 = vpack.c.bf16 %v741_v31, %v737_v30  ;;  %v2972_v31 = vpack.c.bf16 %v784_v24, %v780_v23  ;;  %v1011_v20 = vld [vmem:[#allocation5 + $0xc28] sm:$0xff] }
  0xaf   :  { %571 = vmatmul.mubr.f32.gmra.mrb[6].mxu0 %v3783_v17  ;;  %2933 = vmatprep.subr.bf16.mxu1 %v2932_v38  ;;  %v752_v38 = vld [vmem:[#allocation5 + $0x9f8] sm:$0xff]  ;;  %v2954_v40 = vpack.c.bf16 %v743_v34, %v739_v32  ;;  %v779_v30 = vld [vmem:[#allocation5 + $0xad0] sm:$0xff]  ;;  %v790_v34 = vld [vmem:[#allocation5 + $0xb28] sm:$0xff] }
  0xb0   :  { %648 = vmatmul.mubr.f32.gmra.mrb[6].mxu1 %v3783_v17  ;;  %2871 = vmatpush1.bf16.msra.mxu0 %v2870_v41  ;;  %v2892_v41 = vpack.c.bf16 %v750_v36, %v746_v35  ;;  %v2956_v45 = vpack.c.bf16 %v752_v38, %v748_v37  ;;  %v783_v32 = vld [vmem:[#allocation5 + $0xaf0] sm:$0xff]  ;;  %v788_v35 = vld [vmem:[#allocation5 + $0xb18] sm:$0xff] }
  0xb1   :  { %2935 = vmatpush1.bf16.msra.mxu1 %v2934_v42  ;;  %2873 = vmatprep.subr.bf16.mxu0 %v2872_v43  ;;  %v745_v42 = vld [vmem:[#allocation5 + $0x9c0] sm:$0xff]  ;;  %v792_v36 = vld [vmem:[#allocation5 + $0xb38] sm:$0xff]  ;;  %v2974_v38 = vpack.c.bf16 %v783_v32, %v779_v30  ;;  %v815_v18 = vld [vmem:[#allocation5 + $0xbf0] sm:$0xff] }
  0xb2   :  { %2937 = vmatprep.subr.bf16.mxu1 %v2936_v47  ;;  %881 = vmatprep.mubr.f32.mxu0 %v3772_v16  ;;  %v749_v43 = vld [vmem:[#allocation5 + $0x9e0] sm:$0xff]  ;;  %v754_v47 = vld [vmem:[#allocation5 + $0xa08] sm:$0xff]  ;;  %v1012_v30 = vld [vmem:[#allocation5 + $0xc30] sm:$0xff] }
  0xb3   :  { %958 = vmatprep.mubr.f32.mxu1 %v3772_v16  ;;  %v2946_v16 = vpack.c.bf16 %v727_v7, %v723_v5  ;;  %v2894_v15 = vpack.c.bf16 %v749_v43, %v745_v42  ;;  %v767_v5 = vld [vmem:[#allocation5 + $0xa70] sm:$0xff]  ;;  %v774_v7 = vld [vmem:[#allocation5 + $0xaa8] sm:$0xff]  ;;  %v2976_v43 = vpack.c.bf16 %v792_v36, %v788_v35  ;;  %v1021_v35 = vld [vmem:[#allocation5 + $0xc78] sm:$0xff] }
  0xb4   :  { %2875 = vmatpush1.bf16.msra.mxu0 %v2874_v52  ;;  %v2896_v52 = vpack.c.bf16 %v758_v48, %v754_v47  ;;  %v2966_v11 = vpack.c.bf16 %v767_v5, %v763_v3  ;;  %v787_v42 = vld [vmem:[#allocation5 + $0xb10] sm:$0xff]  ;;  %v796_v47 = vld [vmem:[#allocation5 + $0xb58] sm:$0xff]  ;;  %v814_v5 = vld [vmem:[#allocation5 + $0xbe8] sm:$0xff] }
  0xb5   :  { %2939 = vmatpush1.bf16.msra.mxu1 %v2938_v53  ;;  %2877 = vmatprep.subr.bf16.mxu0 %v2876_v54  ;;  %v753_v53 = vld [vmem:[#allocation5 + $0xa00] sm:$0xff]  ;;  %v800_v48 = vld [vmem:[#allocation5 + $0xb78] sm:$0xff]  ;;  %v2978_v50 = vpack.c.bf16 %v791_v44, %v787_v42  ;;  %v807_v3 = vld [vmem:[#allocation5 + $0xbb0] sm:$0xff] }
  0xb6   :  { %2941 = vmatprep.subr.bf16.mxu1 %v2940_v58  ;;  %v757_v54 = vld [vmem:[#allocation5 + $0xa20] sm:$0xff]  ;;  %v762_v58 = vld [vmem:[#allocation5 + $0xa48] sm:$0xff] }
  0xb7   :  { %v2898_v62 = vpack.c.bf16 %v757_v54, %v753_v53  ;;  %v795_v53 = vld [vmem:[#allocation5 + $0xb50] sm:$0xff]  ;;  %v2980_v54 = vpack.c.bf16 %v800_v48, %v796_v47  ;;  %v1019_v32 = vld [vmem:[#allocation5 + $0xc68] sm:$0xff]  ;;  %v3798_v44 = vld [vmem:[#allocation2] sm:$0xff] }
  0xb8   :  { %2879 = vmatpush1.bf16.msra.mxu0 %v2878_v0  ;;  %v2900_v0 = vpack.c.bf16 %v766_v59, %v762_v58  ;;  %v804_v58 = vld [vmem:[#allocation5 + $0xb98] sm:$0xff]  ;;  %v2982_v61 = vpack.c.bf16 %v799_v55, %v795_v53  ;;  %v1023_v42 = vld [vmem:[#allocation5 + $0xc88] sm:$0xff] }
  0xb9   :  { %2943 = vmatpush1.bf16.msra.mxu1 %v2942_v1  ;;  %2881 = vmatprep.subr.bf16.mxu0 %v2880_v2  ;;  %v761_v1 = vld [vmem:[#allocation5 + $0xa40] sm:$0xff]  ;;  %v808_v59 = vld [vmem:[#allocation5 + $0xbb8] sm:$0xff]  ;;  %v1031_v55 = vld [vmem:[#allocation5 + $0xcc8] sm:$0xff] }
  0xba   :  { %2945 = vmatprep.subr.bf16.mxu1 %v2944_v6  ;;  %v765_v2 = vld [vmem:[#allocation5 + $0xa60] sm:$0xff]  ;;  %v770_v6 = vld [vmem:[#allocation5 + $0xa88] sm:$0xff]  ;;  %v1029_v47 = vld [vmem:[#allocation5 + $0xcb8] sm:$0xff] }
  0xbb   :  { %v2902_v10 = vpack.c.bf16 %v765_v2, %v761_v1  ;;  %v803_v1 = vld [vmem:[#allocation5 + $0xb90] sm:$0xff]  ;;  %v2984_v2 = vpack.c.bf16 %v808_v59, %v804_v58  ;;  %v1037_v58 = vld [vmem:[#allocation5 + $0xcf8] sm:$0xff] }
  0xbc   :  { %2883 = vmatpush1.bf16.msra.mxu0 %v2882_v12  ;;  %v2904_v12 = vpack.c.bf16 %v774_v7, %v770_v6  ;;  %v812_v6 = vld [vmem:[#allocation5 + $0xbd8] sm:$0xff]  ;;  %v2986_v9 = vpack.c.bf16 %v807_v3, %v803_v1  ;;  %v1036_v1 = vld [vmem:[#allocation5 + $0xcf0] sm:$0xff]  ;;  %v1043_v3 = vld [vmem:[#allocation5 + $0xd28] sm:$0xff] }
  0xbd   :  { %2947 = vmatpush1.bf16.msra.mxu1 %v2946_v16  ;;  %2885 = vmatprep.subr.bf16.mxu0 %v2884_v14  ;;  %v769_v16 = vld [vmem:[#allocation5 + $0xa80] sm:$0xff]  ;;  %v816_v7 = vld [vmem:[#allocation5 + $0xbf8] sm:$0xff] }
  0xbe   :  { %2949 = vmatprep.subr.bf16.mxu1 %v2948_v21  ;;  %v773_v14 = vld [vmem:[#allocation5 + $0xaa0] sm:$0xff]  ;;  %v778_v21 = vld [vmem:[#allocation5 + $0xac8] sm:$0xff] }
  0xbf   :  { %v2906_v25 = vpack.c.bf16 %v773_v14, %v769_v16  ;;  %v811_v16 = vld [vmem:[#allocation5 + $0xbd0] sm:$0xff]  ;;  %v2988_v14 = vpack.c.bf16 %v816_v7, %v812_v6 }
  0xc0   :  { %2887 = vmatpush1.bf16.msra.mxu0 %v2886_v27  ;;  %v2908_v27 = vpack.c.bf16 %v782_v22, %v778_v21  ;;  %v1009_v21 = vld [vmem:[#allocation5 + $0xc18] sm:$0xff]  ;;  %v2990_v24 = vpack.c.bf16 %v815_v18, %v811_v16  ;;  %v1044_v16 = vld [vmem:[#allocation5 + $0xd30] sm:$0xff]  ;;  %v1051_v18 = vld [vmem:[#allocation5 + $0xd68] sm:$0xff] }
  0xc1   :  { %2951 = vmatpush1.bf16.msra.mxu1 %v2950_v28  ;;  %2889 = vmatprep.subr.bf16.mxu0 %v2888_v29  ;;  %v777_v28 = vld [vmem:[#allocation5 + $0xac0] sm:$0xff]  ;;  %v1013_v22 = vld [vmem:[#allocation5 + $0xc38] sm:$0xff] }
  0xc2   :  { %2953 = vmatprep.subr.bf16.mxu1 %v2952_v33  ;;  %v781_v29 = vld [vmem:[#allocation5 + $0xae0] sm:$0xff]  ;;  %v786_v33 = vld [vmem:[#allocation5 + $0xb08] sm:$0xff] }
  0xc3   :  { %v2910_v37 = vpack.c.bf16 %v781_v29, %v777_v28  ;;  %v3056_v28 = vpack.c.bf16 %v1013_v22, %v1009_v21  ;;  %v1008_v29 = vld [vmem:[#allocation5 + $0xc10] sm:$0xff] }
  0xc4   :  { %2891 = vmatpush1.bf16.msra.mxu0 %v2890_v39  ;;  %v2912_v39 = vpack.c.bf16 %v790_v34, %v786_v33  ;;  %v1017_v34 = vld [vmem:[#allocation5 + $0xc58] sm:$0xff]  ;;  %v3058_v36 = vpack.c.bf16 %v1012_v30, %v1008_v29  ;;  %v1055_v29 = vld [vmem:[#allocation5 + $0xd88] sm:$0xff] }
  0xc5   :  { %2955 = vmatpush1.bf16.msra.mxu1 %v2954_v40  ;;  %2893 = vmatprep.subr.bf16.mxu0 %v2892_v41  ;;  %v785_v40 = vld [vmem:[#allocation5 + $0xb00] sm:$0xff]  ;;  %v1059_v30 = vld [vmem:[#allocation5 + $0xda8] sm:$0xff] }
  0xc6   :  { %2957 = vmatprep.subr.bf16.mxu1 %v2956_v45  ;;  %v789_v41 = vld [vmem:[#allocation5 + $0xb20] sm:$0xff]  ;;  %v794_v45 = vld [vmem:[#allocation5 + $0xb48] sm:$0xff] }
  0xc7   :  { %v2914_v49 = vpack.c.bf16 %v789_v41, %v785_v40  ;;  %v1020_v41 = vld [vmem:[#allocation5 + $0xc70] sm:$0xff] }
  0xc8   :  { %2895 = vmatpush1.bf16.msra.mxu0 %v2894_v15  ;;  %v2916_v15 = vpack.c.bf16 %v798_v46, %v794_v45  ;;  %v3060_v45 = vpack.c.bf16 %v1021_v35, %v1017_v34  ;;  %v1025_v46 = vld [vmem:[#allocation5 + $0xc98] sm:$0xff]  ;;  %v3016_v35 = vpack.c.bf16 %v1059_v30, %v1055_v29 }
  0xc9   :  { %2959 = vmatpush1.bf16.msra.mxu1 %v2958_v51  ;;  %2897 = vmatprep.subr.bf16.mxu0 %v2896_v52  ;;  %v793_v51 = vld [vmem:[#allocation5 + $0xb40] sm:$0xff]  ;;  %v3064_v53 = vpack.c.bf16 %v1029_v47, %v1025_v46  ;;  %v1097_v29 = vld [vmem:[#allocation5 + $0xed8] sm:$0xff] }
  0xca   :  { %2961 = vmatprep.subr.bf16.mxu1 %v2960_v56  ;;  %v797_v52 = vld [vmem:[#allocation5 + $0xb60] sm:$0xff]  ;;  %v802_v56 = vld [vmem:[#allocation5 + $0xb88] sm:$0xff]  ;;  %v1101_v30 = vld [vmem:[#allocation5 + $0xef8] sm:$0xff] }
  0xcb   :  { %v2918_v60 = vpack.c.bf16 %v797_v52, %v793_v51  ;;  %v1026_v51 = vld [vmem:[#allocation5 + $0xca0] sm:$0xff]  ;;  %v1024_v52 = vld [vmem:[#allocation5 + $0xc90] sm:$0xff] }
  0xcc   :  { %2899 = vmatpush1.bf16.msra.mxu0 %v2898_v62  ;;  %v2920_v62 = vpack.c.bf16 %v806_v57, %v802_v56  ;;  %v1035_v56 = vld [vmem:[#allocation5 + $0xce8] sm:$0xff]  ;;  %v1033_v57 = vld [vmem:[#allocation5 + $0xcd8] sm:$0xff] }
  0xcd   :  { %2963 = vmatpush1.bf16.msra.mxu1 %v2962_v63  ;;  %2901 = vmatprep.subr.bf16.mxu0 %v2900_v0  ;;  %v801_v63 = vld [vmem:[#allocation5 + $0xb80] sm:$0xff] }
  0xce   :  { %2965 = vmatprep.subr.bf16.mxu1 %v2964_v4  ;;  %v805_v0 = vld [vmem:[#allocation5 + $0xba0] sm:$0xff]  ;;  %v810_v4 = vld [vmem:[#allocation5 + $0xbc8] sm:$0xff] }
  0xcf   :  { %v2922_v8 = vpack.c.bf16 %v805_v0, %v801_v63  ;;  %v1032_v63 = vld [vmem:[#allocation5 + $0xcd0] sm:$0xff]  ;;  %v3068_v0 = vpack.c.bf16 %v1037_v58, %v1033_v57 }
  0xd0   :  { %2903 = vmatpush1.bf16.msra.mxu0 %v2902_v10  ;;  %v2924_v10 = vpack.c.bf16 %v814_v5, %v810_v4  ;;  %v3806_v4 = vld [vmem:[#allocation2 + $0x8] sm:$0xff]  ;;  %v1041_v5 = vld [vmem:[#allocation5 + $0xd18] sm:$0xff]  ;;  %v3070_v7 = vpack.c.bf16 %v1036_v1, %v1032_v63  ;;  %v1076_v63 = vld [vmem:[#allocation5 + $0xe30] sm:$0xff] }
  0xd1   :  { %2967 = vmatpush1.bf16.msra.mxu1 %v2966_v11  ;;  %2905 = vmatprep.subr.bf16.mxu0 %v2904_v12  ;;  %v809_v11 = vld [vmem:[#allocation5 + $0xbc0] sm:$0xff]  ;;  %v1083_v1 = vld [vmem:[#allocation5 + $0xe68] sm:$0xff] }
  0xd2   :  { %2969 = vmatprep.subr.bf16.mxu1 %v2968_v19  ;;  %v813_v12 = vld [vmem:[#allocation5 + $0xbe0] sm:$0xff]  ;;  %v1007_v19 = vld [vmem:[#allocation5 + $0xc08] sm:$0xff] }
  0xd3   :  { %v2926_v23 = vpack.c.bf16 %v813_v12, %v809_v11  ;;  %v1040_v11 = vld [vmem:[#allocation5 + $0xd10] sm:$0xff] }
  0xd4   :  { %2907 = vmatpush1.bf16.msra.mxu0 %v2906_v25  ;;  %v2992_v25 = vpack.c.bf16 %v1011_v20, %v1007_v19  ;;  %v1049_v19 = vld [vmem:[#allocation5 + $0xd58] sm:$0xff]  ;;  %v3074_v22 = vpack.c.bf16 %v1044_v16, %v1040_v11  ;;  %v1084_v11 = vld [vmem:[#allocation5 + $0xe70] sm:$0xff]  ;;  %v1091_v16 = vld [vmem:[#allocation5 + $0xea8] sm:$0xff] }
  0xd5   :  { %2971 = vmatpush1.bf16.msra.mxu1 %v2970_v26  ;;  %2909 = vmatprep.subr.bf16.mxu0 %v2908_v27  ;;  %v1006_v26 = vld [vmem:[#allocation5 + $0xc00] sm:$0xff]  ;;  %v1053_v20 = vld [vmem:[#allocation5 + $0xd78] sm:$0xff] }
  0xd6   :  { %2973 = vmatprep.subr.bf16.mxu1 %v2972_v31  ;;  %v1010_v27 = vld [vmem:[#allocation5 + $0xc20] sm:$0xff]  ;;  %v1015_v31 = vld [vmem:[#allocation5 + $0xc48] sm:$0xff] }
  0xd7   :  { %v2994_v33 = vpack.c.bf16 %v1010_v27, %v1006_v26  ;;  %v2996_v40 = vpack.c.bf16 %v1019_v32, %v1015_v31  ;;  %v1048_v26 = vld [vmem:[#allocation5 + $0xd50] sm:$0xff]  ;;  %v3076_v27 = vpack.c.bf16 %v1053_v20, %v1049_v19  ;;  %v1057_v31 = vld [vmem:[#allocation5 + $0xd98] sm:$0xff] }
  0xd8   :  { %2911 = vmatpush1.bf16.msra.mxu0 %v2910_v37  ;;  %v1014_v37 = vld [vmem:[#allocation5 + $0xc40] sm:$0xff]  ;;  %v1061_v32 = vld [vmem:[#allocation5 + $0xdb8] sm:$0xff] }
  0xd9   :  { %2975 = vmatpush1.bf16.msra.mxu1 %v2974_v38  ;;  %2913 = vmatprep.subr.bf16.mxu0 %v2912_v39  ;;  %v1018_v38 = vld [vmem:[#allocation5 + $0xc60] sm:$0xff]  ;;  %v1016_v39 = vld [vmem:[#allocation5 + $0xc50] sm:$0xff] }
  0xda   :  { %2977 = vmatprep.subr.bf16.mxu1 %v2976_v43  ;;  %v1027_v43 = vld [vmem:[#allocation5 + $0xca8] sm:$0xff]  ;;  %v2998_v48 = vpack.c.bf16 %v1018_v38, %v1014_v37  ;;  %v1058_v37 = vld [vmem:[#allocation5 + $0xda0] sm:$0xff]  ;;  %v1056_v38 = vld [vmem:[#allocation5 + $0xd90] sm:$0xff] }
  0xdc   :  { %2915 = vmatpush1.bf16.msra.mxu0 %v2914_v49  ;;  %v3062_v49 = vpack.c.bf16 %v1020_v41, %v1016_v39  ;;  %v3080_v39 = vpack.c.bf16 %v1061_v32, %v1057_v31  ;;  %v1063_v41 = vld [vmem:[#allocation5 + $0xdc8] sm:$0xff] }
  0xdd   :  { %2979 = vmatpush1.bf16.msra.mxu1 %v2978_v50  ;;  %2917 = vmatprep.subr.bf16.mxu0 %v2916_v15  ;;  %v3000_v50 = vpack.c.bf16 %v1027_v43, %v1023_v42  ;;  %v1022_v15 = vld [vmem:[#allocation5 + $0xc80] sm:$0xff]  ;;  %v1067_v42 = vld [vmem:[#allocation5 + $0xde8] sm:$0xff]  ;;  %v1065_v43 = vld [vmem:[#allocation5 + $0xdd8] sm:$0xff] }
  0xde   :  { %2981 = vmatprep.subr.bf16.mxu1 %v2980_v54  ;;  %v1028_v54 = vld [vmem:[#allocation5 + $0xcb0] sm:$0xff]  ;;  %v3002_v59 = vpack.c.bf16 %v1026_v51, %v1022_v15 }
  0xdf   :  { %v1064_v15 = vld [vmem:[#allocation5 + $0xdd0] sm:$0xff] }
  0xe0   :  { %2919 = vmatpush1.bf16.msra.mxu0 %v2918_v60  ;;  %v3066_v60 = vpack.c.bf16 %v1028_v54, %v1024_v52  ;;  %v1068_v52 = vld [vmem:[#allocation5 + $0xdf0] sm:$0xff]  ;;  %v1075_v54 = vld [vmem:[#allocation5 + $0xe28] sm:$0xff] }
  0xe1   :  { %2983 = vmatpush1.bf16.msra.mxu1 %v2982_v61  ;;  %2921 = vmatprep.subr.bf16.mxu0 %v2920_v62  ;;  %v3004_v61 = vpack.c.bf16 %v1035_v56, %v1031_v55  ;;  %v1030_v62 = vld [vmem:[#allocation5 + $0xcc0] sm:$0xff]  ;;  %v1073_v55 = vld [vmem:[#allocation5 + $0xe18] sm:$0xff]  ;;  %v3086_v58 = vpack.c.bf16 %v1068_v52, %v1064_v15  ;;  %v1108_v15 = vld [vmem:[#allocation5 + $0xf30] sm:$0xff] }
  0xe2   :  { %2985 = vmatprep.subr.bf16.mxu1 %v2984_v2  ;;  %v1039_v2 = vld [vmem:[#allocation5 + $0xd08] sm:$0xff]  ;;  %v1077_v56 = vld [vmem:[#allocation5 + $0xe38] sm:$0xff] }
  0xe3   :  { %v1115_v52 = vld [vmem:[#allocation5 + $0xf68] sm:$0xff] }
  0xe4   :  { %2923 = vmatpush1.bf16.msra.mxu0 %v2922_v8  ;;  %v3008_v8 = vpack.c.bf16 %v1043_v3, %v1039_v2  ;;  %v1081_v2 = vld [vmem:[#allocation5 + $0xe58] sm:$0xff] }
  0xe5   :  { %2987 = vmatpush1.bf16.msra.mxu1 %v2986_v9  ;;  %2925 = vmatprep.subr.bf16.mxu0 %v2924_v10  ;;  %v1038_v9 = vld [vmem:[#allocation5 + $0xd00] sm:$0xff]  ;;  %v1085_v3 = vld [vmem:[#allocation5 + $0xe78] sm:$0xff] }
  0xe6   :  { %2989 = vmatprep.subr.bf16.mxu1 %v2988_v14  ;;  %v1042_v10 = vld [vmem:[#allocation5 + $0xd20] sm:$0xff]  ;;  %v1047_v14 = vld [vmem:[#allocation5 + $0xd48] sm:$0xff] }
  0xe7   :  { %v3010_v21 = vpack.c.bf16 %v1042_v10, %v1038_v9  ;;  %v1080_v9 = vld [vmem:[#allocation5 + $0xe50] sm:$0xff]  ;;  %v3092_v10 = vpack.c.bf16 %v1085_v3, %v1081_v2 }
  0xe8   :  { %2927 = vmatpush1.bf16.msra.mxu0 %v2926_v23  ;;  %v3012_v23 = vpack.c.bf16 %v1051_v18, %v1047_v14  ;;  %v1089_v14 = vld [vmem:[#allocation5 + $0xe98] sm:$0xff]  ;;  %v3094_v20 = vpack.c.bf16 %v1084_v11, %v1080_v9  ;;  %v1124_v9 = vld [vmem:[#allocation5 + $0xfb0] sm:$0xff]  ;;  %v1131_v11 = vld [vmem:[#allocation5 + $0xfe8] sm:$0xff] }
  0xe9   :  { %2991 = vmatpush1.bf16.msra.mxu1 %v2990_v24  ;;  %2993 = vmatprep.subr.bf16.mxu0 %v2992_v25  ;;  %v1046_v24 = vld [vmem:[#allocation5 + $0xd40] sm:$0xff]  ;;  %v1093_v18 = vld [vmem:[#allocation5 + $0xeb8] sm:$0xff] }
  0xea   :  { %3057 = vmatprep.subr.bf16.mxu1 %v3056_v28  ;;  %v1050_v25 = vld [vmem:[#allocation5 + $0xd60] sm:$0xff]  ;;  %v1052_v28 = vld [vmem:[#allocation5 + $0xd70] sm:$0xff] }
  0xeb   :  { %882 = vmatmul.mubr.f32.vlgmr.msra.gmra.mrb[8].mxu0 %v3798_v44  ;;  %v3078_v34 = vpack.c.bf16 %v1052_v28, %v1048_v26  ;;  %v1092_v26 = vld [vmem:[#allocation5 + $0xeb0] sm:$0xff]  ;;  %v1099_v28 = vld [vmem:[#allocation5 + $0xee8] sm:$0xff] }
  0xec   :  { %959 = vmatmul.mubr.f32.vlgmr.msra.gmra.mrb[8].mxu1 %v3798_v44  ;;  %2995 = vmatpush1.bf16.msra.mxu0 %v2994_v33  ;;  %v3014_v33 = vpack.c.bf16 %v1050_v25, %v1046_v24  ;;  %v1088_v24 = vld [vmem:[#allocation5 + $0xe90] sm:$0xff]  ;;  %v3096_v25 = vpack.c.bf16 %v1093_v18, %v1089_v14 }
  0xed   :  { %3059 = vmatpush1.bf16.msra.mxu1 %v3058_v36  ;;  %887 = vmatprep.mubr.f32.mxu0 %v3780_v13  ;;  %v1054_v36 = vld [vmem:[#allocation5 + $0xd80] sm:$0xff]  ;;  %v3098_v32 = vpack.c.bf16 %v1092_v26, %v1088_v24  ;;  %v1132_v24 = vld [vmem:[#allocation5 + $0xff0] sm:$0xff]  ;;  %v1328_v26 = vld [vmem:[#allocation5 + $0x1028] sm:$0xff] }
  0xee   :  { %964 = vmatprep.mubr.f32.mxu1 %v3780_v13  ;;  %2997 = vmatprep.subr.bf16.mxu0 %v2996_v40  ;;  %v1034_v13 = vld [vmem:[#allocation5 + $0xce0] sm:$0xff]  ;;  %v1060_v40 = vld [vmem:[#allocation5 + $0xdb0] sm:$0xff]  ;;  %v3018_v46 = vpack.c.bf16 %v1058_v37, %v1054_v36  ;;  %v3100_v37 = vpack.c.bf16 %v1101_v30, %v1097_v29 }
  0xef   :  { %888 = vmatmul.mubr.f32.gmra.mrb[10].mxu0 %v3783_v17  ;;  %3061 = vmatprep.subr.bf16.mxu1 %v3060_v45  ;;  %v3006_v6 = vpack.c.bf16 %v1034_v13, %v1030_v62  ;;  %v1069_v45 = vld [vmem:[#allocation5 + $0xdf8] sm:$0xff]  ;;  %v3082_v47 = vpack.c.bf16 %v1060_v40, %v1056_v38  ;;  %v1072_v62 = vld [vmem:[#allocation5 + $0xe10] sm:$0xff]  ;;  %v3088_v13 = vpack.c.bf16 %v1077_v56, %v1073_v55  ;;  %v1107_v40 = vld [vmem:[#allocation5 + $0xf28] sm:$0xff] }
  0xf0   :  { %965 = vmatmul.mubr.f32.gmra.mrb[10].mxu1 %v3783_v17  ;;  %2999 = vmatpush1.bf16.msra.mxu0 %v2998_v48  ;;  %v1045_v17 = vld [vmem:[#allocation5 + $0xd38] sm:$0xff]  ;;  %v3020_v48 = vpack.c.bf16 %v1067_v42, %v1063_v41  ;;  %v3084_v51 = vpack.c.bf16 %v1069_v45, %v1065_v43  ;;  %v1096_v36 = vld [vmem:[#allocation5 + $0xed0] sm:$0xff] }
  0xf1   :  { %3063 = vmatpush1.bf16.msra.mxu1 %v3062_v49  ;;  %3001 = vmatprep.subr.bf16.mxu0 %v3000_v50  ;;  %v3072_v12 = vpack.c.bf16 %v1045_v17, %v1041_v5  ;;  %v1062_v49 = vld [vmem:[#allocation5 + $0xdc0] sm:$0xff]  ;;  %v3090_v17 = vpack.c.bf16 %v1076_v63, %v1072_v62  ;;  %v1100_v38 = vld [vmem:[#allocation5 + $0xef0] sm:$0xff]  ;;  %v1105_v41 = vld [vmem:[#allocation5 + $0xf18] sm:$0xff] }
  0xf2   :  { %3065 = vmatprep.subr.bf16.mxu1 %v3064_v53  ;;  %1198 = vmatprep.mubr.f32.mxu0 %v3806_v4  ;;  %v1066_v50 = vld [vmem:[#allocation5 + $0xde0] sm:$0xff]  ;;  %v1071_v53 = vld [vmem:[#allocation5 + $0xe08] sm:$0xff]  ;;  %v1109_v42 = vld [vmem:[#allocation5 + $0xf38] sm:$0xff]  ;;  %v3102_v45 = vpack.c.bf16 %v1100_v38, %v1096_v36 }
  0xf3   :  { %1275 = vmatprep.mubr.f32.mxu1 %v3806_v4  ;;  %v3022_v57 = vpack.c.bf16 %v1066_v50, %v1062_v49  ;;  %v1104_v49 = vld [vmem:[#allocation5 + $0xf10] sm:$0xff]  ;;  %v3104_v50 = vpack.c.bf16 %v1109_v42, %v1105_v41  ;;  %v1123_v63 = vld [vmem:[#allocation5 + $0xfa8] sm:$0xff]  ;;  %v1338_v41 = vld [vmem:[#allocation5 + $0x1078] sm:$0xff] }
  0xf4   :  { %3003 = vmatpush1.bf16.msra.mxu0 %v3002_v59  ;;  %v3024_v59 = vpack.c.bf16 %v1075_v54, %v1071_v53  ;;  %v1113_v53 = vld [vmem:[#allocation5 + $0xf58] sm:$0xff]  ;;  %v3106_v56 = vpack.c.bf16 %v1108_v15, %v1104_v49  ;;  %v1116_v62 = vld [vmem:[#allocation5 + $0xf70] sm:$0xff]  ;;  %v1336_v38 = vld [vmem:[#allocation5 + $0x1068] sm:$0xff] }
  0xf5   :  { %3067 = vmatpush1.bf16.msra.mxu1 %v3066_v60  ;;  %3005 = vmatprep.subr.bf16.mxu0 %v3004_v61  ;;  %v1070_v60 = vld [vmem:[#allocation5 + $0xe00] sm:$0xff]  ;;  %v1117_v54 = vld [vmem:[#allocation5 + $0xf78] sm:$0xff]  ;;  %v1329_v36 = vld [vmem:[#allocation5 + $0x1030] sm:$0xff] }
  0xf6   :  { %3069 = vmatprep.subr.bf16.mxu1 %v3068_v0  ;;  %v1074_v61 = vld [vmem:[#allocation5 + $0xe20] sm:$0xff]  ;;  %v1079_v0 = vld [vmem:[#allocation5 + $0xe48] sm:$0xff] }
  0xf7   :  { %v3026_v5 = vpack.c.bf16 %v1074_v61, %v1070_v60  ;;  %v1112_v60 = vld [vmem:[#allocation5 + $0xf50] sm:$0xff]  ;;  %v3108_v61 = vpack.c.bf16 %v1117_v54, %v1113_v53  ;;  %v1340_v49 = vld [vmem:[#allocation5 + $0x1088] sm:$0xff]  ;;  %v3812_v54 = vld [vmem:[#allocation2 + $0x18] sm:$0xff] }
  0xf8   :  { %3007 = vmatpush1.bf16.msra.mxu0 %v3006_v6  ;;  %v3028_v6 = vpack.c.bf16 %v1083_v1, %v1079_v0  ;;  %v1121_v0 = vld [vmem:[#allocation5 + $0xf98] sm:$0xff]  ;;  %v3110_v3 = vpack.c.bf16 %v1116_v62, %v1112_v60  ;;  %v1348_v62 = vld [vmem:[#allocation5 + $0x10c8] sm:$0xff] }
  0xf9   :  { %3071 = vmatpush1.bf16.msra.mxu1 %v3070_v7  ;;  %3009 = vmatprep.subr.bf16.mxu0 %v3008_v8  ;;  %v1078_v7 = vld [vmem:[#allocation5 + $0xe40] sm:$0xff]  ;;  %v1125_v1 = vld [vmem:[#allocation5 + $0xfb8] sm:$0xff] }
  0xfa   :  { %3073 = vmatprep.subr.bf16.mxu1 %v3072_v12  ;;  %v1082_v8 = vld [vmem:[#allocation5 + $0xe60] sm:$0xff]  ;;  %v1087_v12 = vld [vmem:[#allocation5 + $0xe88] sm:$0xff] }
  0xfb   :  { %v3030_v19 = vpack.c.bf16 %v1082_v8, %v1078_v7  ;;  %v1120_v7 = vld [vmem:[#allocation5 + $0xf90] sm:$0xff]  ;;  %v3112_v8 = vpack.c.bf16 %v1125_v1, %v1121_v0  ;;  %v1354_v0 = vld [vmem:[#allocation5 + $0x10f8] sm:$0xff] }
  0xfc   :  { %3011 = vmatpush1.bf16.msra.mxu0 %v3010_v21  ;;  %v3032_v21 = vpack.c.bf16 %v1091_v16, %v1087_v12  ;;  %v1129_v12 = vld [vmem:[#allocation5 + $0xfd8] sm:$0xff]  ;;  %v3114_v18 = vpack.c.bf16 %v1124_v9, %v1120_v7  ;;  %v1356_v9 = vld [vmem:[#allocation5 + $0x1108] sm:$0xff] }
  0xfd   :  { %3075 = vmatpush1.bf16.msra.mxu1 %v3074_v22  ;;  %3013 = vmatprep.subr.bf16.mxu0 %v3012_v23  ;;  %v1086_v22 = vld [vmem:[#allocation5 + $0xe80] sm:$0xff]  ;;  %v1133_v16 = vld [vmem:[#allocation5 + $0xff8] sm:$0xff] }
  0xfe   :  { %3077 = vmatprep.subr.bf16.mxu1 %v3076_v27  ;;  %v1090_v23 = vld [vmem:[#allocation5 + $0xea0] sm:$0xff]  ;;  %v1095_v27 = vld [vmem:[#allocation5 + $0xec8] sm:$0xff] }
  0xff   :  { %v3034_v31 = vpack.c.bf16 %v1090_v23, %v1086_v22  ;;  %v1128_v22 = vld [vmem:[#allocation5 + $0xfd0] sm:$0xff]  ;;  %v3116_v23 = vpack.c.bf16 %v1133_v16, %v1129_v12  ;;  %v1362_v12 = vld [vmem:[#allocation5 + $0x1138] sm:$0xff] }
 0x100   :  { %3015 = vmatpush1.bf16.msra.mxu0 %v3014_v33  ;;  %v3036_v33 = vpack.c.bf16 %v1099_v28, %v1095_v27  ;;  %v1326_v27 = vld [vmem:[#allocation5 + $0x1018] sm:$0xff]  ;;  %v3118_v30 = vpack.c.bf16 %v1132_v24, %v1128_v22  ;;  %v1364_v24 = vld [vmem:[#allocation5 + $0x1148] sm:$0xff] }
 0x101   :  { %3079 = vmatpush1.bf16.msra.mxu1 %v3078_v34  ;;  %3017 = vmatprep.subr.bf16.mxu0 %v3016_v35  ;;  %v1094_v34 = vld [vmem:[#allocation5 + $0xec0] sm:$0xff]  ;;  %v1330_v28 = vld [vmem:[#allocation5 + $0x1038] sm:$0xff] }
 0x102   :  { %3081 = vmatprep.subr.bf16.mxu1 %v3080_v39  ;;  %v1098_v35 = vld [vmem:[#allocation5 + $0xee0] sm:$0xff]  ;;  %v1103_v39 = vld [vmem:[#allocation5 + $0xf08] sm:$0xff] }
 0x103   :  { %v3038_v43 = vpack.c.bf16 %v1098_v35, %v1094_v34  ;;  %v3184_v34 = vpack.c.bf16 %v1330_v28, %v1326_v27  ;;  %v1325_v35 = vld [vmem:[#allocation5 + $0x1010] sm:$0xff]  ;;  %v1370_v27 = vld [vmem:[#allocation5 + $0x1178] sm:$0xff] }
 0x104   :  { %3019 = vmatpush1.bf16.msra.mxu0 %v3018_v46  ;;  %v3040_v46 = vpack.c.bf16 %v1107_v40, %v1103_v39  ;;  %v1334_v40 = vld [vmem:[#allocation5 + $0x1058] sm:$0xff]  ;;  %v3186_v42 = vpack.c.bf16 %v1329_v36, %v1325_v35  ;;  %v1372_v35 = vld [vmem:[#allocation5 + $0x1188] sm:$0xff] }
 0x105   :  { %3083 = vmatpush1.bf16.msra.mxu1 %v3082_v47  ;;  %3021 = vmatprep.subr.bf16.mxu0 %v3020_v48  ;;  %v1102_v47 = vld [vmem:[#allocation5 + $0xf00] sm:$0xff]  ;;  %v3188_v15 = vpack.c.bf16 %v1338_v41, %v1334_v40  ;;  %v1376_v36 = vld [vmem:[#allocation5 + $0x11a8] sm:$0xff] }
 0x106   :  { %3085 = vmatprep.subr.bf16.mxu1 %v3084_v51  ;;  %v1106_v48 = vld [vmem:[#allocation5 + $0xf20] sm:$0xff]  ;;  %v1111_v51 = vld [vmem:[#allocation5 + $0xf48] sm:$0xff]  ;;  %v3144_v41 = vpack.c.bf16 %v1376_v36, %v1372_v35  ;;  %v1409_v36 = vld [vmem:[#allocation5 + $0x12b0] sm:$0xff] }
 0x107   :  { %v3042_v55 = vpack.c.bf16 %v1106_v48, %v1102_v47  ;;  %v1337_v48 = vld [vmem:[#allocation5 + $0x1070] sm:$0xff] }
 0x108   :  { %3023 = vmatpush1.bf16.msra.mxu0 %v3022_v57  ;;  %v3044_v57 = vpack.c.bf16 %v1115_v52, %v1111_v51  ;;  %v1342_v51 = vld [vmem:[#allocation5 + $0x1098] sm:$0xff] }
 0x109   :  { %3087 = vmatpush1.bf16.msra.mxu1 %v3086_v58  ;;  %3025 = vmatprep.subr.bf16.mxu0 %v3024_v59  ;;  %v1110_v58 = vld [vmem:[#allocation5 + $0xf40] sm:$0xff]  ;;  %v1346_v52 = vld [vmem:[#allocation5 + $0x10b8] sm:$0xff] }
 0x10a   :  { %3089 = vmatprep.subr.bf16.mxu1 %v3088_v13  ;;  %v1114_v59 = vld [vmem:[#allocation5 + $0xf60] sm:$0xff]  ;;  %v1119_v13 = vld [vmem:[#allocation5 + $0xf88] sm:$0xff]  ;;  %v3192_v60 = vpack.c.bf16 %v1346_v52, %v1342_v51  ;;  %v1382_v52 = vld [vmem:[#allocation5 + $0x11d8] sm:$0xff] }
 0x10b   :  { %v3046_v2 = vpack.c.bf16 %v1114_v59, %v1110_v58  ;;  %v1343_v58 = vld [vmem:[#allocation5 + $0x10a0] sm:$0xff]  ;;  %v1341_v59 = vld [vmem:[#allocation5 + $0x1090] sm:$0xff] }
 0x10c   :  { %3027 = vmatpush1.bf16.msra.mxu0 %v3026_v5  ;;  %v3048_v5 = vpack.c.bf16 %v1123_v63, %v1119_v13  ;;  %v1352_v13 = vld [vmem:[#allocation5 + $0x10e8] sm:$0xff]  ;;  %v1350_v63 = vld [vmem:[#allocation5 + $0x10d8] sm:$0xff] }
 0x10d   :  { %3091 = vmatpush1.bf16.msra.mxu1 %v3090_v17  ;;  %3029 = vmatprep.subr.bf16.mxu0 %v3028_v6  ;;  %v1118_v17 = vld [vmem:[#allocation5 + $0xf80] sm:$0xff]  ;;  %v3196_v7 = vpack.c.bf16 %v1354_v0, %v1350_v63  ;;  %v1388_v63 = vld [vmem:[#allocation5 + $0x1208] sm:$0xff] }
 0x10e   :  { %3093 = vmatprep.subr.bf16.mxu1 %v3092_v10  ;;  %v1122_v6 = vld [vmem:[#allocation5 + $0xfa0] sm:$0xff]  ;;  %v1127_v10 = vld [vmem:[#allocation5 + $0xfc8] sm:$0xff] }
 0x10f   :  { %v3050_v14 = vpack.c.bf16 %v1122_v6, %v1118_v17  ;;  %v1351_v17 = vld [vmem:[#allocation5 + $0x10e0] sm:$0xff]  ;;  %v1349_v6 = vld [vmem:[#allocation5 + $0x10d0] sm:$0xff]  ;;  %v1392_v0 = vld [vmem:[#allocation5 + $0x1228] sm:$0xff] }
 0x110   :  { %3031 = vmatpush1.bf16.msra.mxu0 %v3030_v19  ;;  %v3052_v19 = vpack.c.bf16 %v1131_v11, %v1127_v10  ;;  %v1360_v10 = vld [vmem:[#allocation5 + $0x1128] sm:$0xff]  ;;  %v1358_v11 = vld [vmem:[#allocation5 + $0x1118] sm:$0xff] }
 0x111   :  { %3095 = vmatpush1.bf16.msra.mxu1 %v3094_v20  ;;  %3033 = vmatprep.subr.bf16.mxu0 %v3032_v21  ;;  %v1126_v20 = vld [vmem:[#allocation5 + $0xfc0] sm:$0xff]  ;;  %v3200_v22 = vpack.c.bf16 %v1362_v12, %v1358_v11  ;;  %v1396_v11 = vld [vmem:[#allocation5 + $0x1248] sm:$0xff] }
 0x112   :  { %3097 = vmatprep.subr.bf16.mxu1 %v3096_v25  ;;  %v1130_v21 = vld [vmem:[#allocation5 + $0xfe0] sm:$0xff]  ;;  %v1324_v25 = vld [vmem:[#allocation5 + $0x1008] sm:$0xff] }
 0x113   :  { %v3054_v29 = vpack.c.bf16 %v1130_v21, %v1126_v20  ;;  %v1359_v20 = vld [vmem:[#allocation5 + $0x1120] sm:$0xff]  ;;  %v1357_v21 = vld [vmem:[#allocation5 + $0x1110] sm:$0xff]  ;;  %v1400_v12 = vld [vmem:[#allocation5 + $0x1268] sm:$0xff] }
 0x114   :  { %3035 = vmatpush1.bf16.msra.mxu0 %v3034_v31  ;;  %v3120_v31 = vpack.c.bf16 %v1328_v26, %v1324_v25  ;;  %v1368_v25 = vld [vmem:[#allocation5 + $0x1168] sm:$0xff]  ;;  %v1366_v26 = vld [vmem:[#allocation5 + $0x1158] sm:$0xff] }
 0x115   :  { %3099 = vmatpush1.bf16.msra.mxu1 %v3098_v32  ;;  %3037 = vmatprep.subr.bf16.mxu0 %v3036_v33  ;;  %v1323_v32 = vld [vmem:[#allocation5 + $0x1000] sm:$0xff] }
 0x116   :  { %3101 = vmatprep.subr.bf16.mxu1 %v3100_v37  ;;  %v1327_v33 = vld [vmem:[#allocation5 + $0x1020] sm:$0xff]  ;;  %v1332_v37 = vld [vmem:[#allocation5 + $0x1048] sm:$0xff] }
 0x117   :  { %v3122_v39 = vpack.c.bf16 %v1327_v33, %v1323_v32  ;;  %v3124_v47 = vpack.c.bf16 %v1336_v38, %v1332_v37  ;;  %v1365_v32 = vld [vmem:[#allocation5 + $0x1150] sm:$0xff]  ;;  %v3204_v33 = vpack.c.bf16 %v1370_v27, %v1366_v26  ;;  %v1374_v37 = vld [vmem:[#allocation5 + $0x1198] sm:$0xff]  ;;  %v1404_v26 = vld [vmem:[#allocation5 + $0x1288] sm:$0xff] }
 0x118   :  { %3039 = vmatpush1.bf16.msra.mxu0 %v3038_v43  ;;  %v1331_v43 = vld [vmem:[#allocation5 + $0x1040] sm:$0xff]  ;;  %v1378_v38 = vld [vmem:[#allocation5 + $0x11b8] sm:$0xff]  ;;  %v1408_v27 = vld [vmem:[#allocation5 + $0x12a8] sm:$0xff] }
 0x119   :  { %3103 = vmatpush1.bf16.msra.mxu1 %v3102_v45  ;;  %3041 = vmatprep.subr.bf16.mxu0 %v3040_v46  ;;  %v1335_v45 = vld [vmem:[#allocation5 + $0x1060] sm:$0xff]  ;;  %v1333_v46 = vld [vmem:[#allocation5 + $0x1050] sm:$0xff] }
 0x11a   :  { %3105 = vmatprep.subr.bf16.mxu1 %v3104_v50  ;;  %v1344_v50 = vld [vmem:[#allocation5 + $0x10a8] sm:$0xff]  ;;  %v3126_v53 = vpack.c.bf16 %v1335_v45, %v1331_v43  ;;  %v1375_v43 = vld [vmem:[#allocation5 + $0x11a0] sm:$0xff]  ;;  %v1373_v45 = vld [vmem:[#allocation5 + $0x1190] sm:$0xff] }
 0x11c   :  { %3043 = vmatpush1.bf16.msra.mxu0 %v3042_v55  ;;  %v3190_v55 = vpack.c.bf16 %v1337_v48, %v1333_v46  ;;  %v1377_v48 = vld [vmem:[#allocation5 + $0x11b0] sm:$0xff] }
 0x11d   :  { %3107 = vmatpush1.bf16.msra.mxu1 %v3106_v56  ;;  %3045 = vmatprep.subr.bf16.mxu0 %v3044_v57  ;;  %v3128_v56 = vpack.c.bf16 %v1344_v50, %v1340_v49  ;;  %v1339_v57 = vld [vmem:[#allocation5 + $0x1080] sm:$0xff]  ;;  %v1380_v49 = vld [vmem:[#allocation5 + $0x11c8] sm:$0xff] }
 0x11e   :  { %3109 = vmatprep.subr.bf16.mxu1 %v3108_v61  ;;  %v1345_v61 = vld [vmem:[#allocation5 + $0x10b0] sm:$0xff]  ;;  %v3130_v1 = vpack.c.bf16 %v1343_v58, %v1339_v57  ;;  %v1384_v50 = vld [vmem:[#allocation5 + $0x11e8] sm:$0xff]  ;;  %v3210_v57 = vpack.c.bf16 %v1377_v48, %v1373_v45  ;;  %v1411_v45 = vld [vmem:[#allocation5 + $0x12c0] sm:$0xff] }
 0x11f   :  { %v3148_v58 = vpack.c.bf16 %v1384_v50, %v1380_v49  ;;  %v1413_v48 = vld [vmem:[#allocation5 + $0x12d0] sm:$0xff] }
 0x120   :  { %3047 = vmatpush1.bf16.msra.mxu0 %v3046_v2  ;;  %v3194_v2 = vpack.c.bf16 %v1345_v61, %v1341_v59  ;;  %v1379_v59 = vld [vmem:[#allocation5 + $0x11c0] sm:$0xff]  ;;  %v1381_v61 = vld [vmem:[#allocation5 + $0x11d0] sm:$0xff] }
 0x121   :  { %3111 = vmatpush1.bf16.msra.mxu1 %v3110_v3  ;;  %3049 = vmatprep.subr.bf16.mxu0 %v3048_v5  ;;  %v3132_v3 = vpack.c.bf16 %v1352_v13, %v1348_v62  ;;  %v1347_v5 = vld [vmem:[#allocation5 + $0x10c0] sm:$0xff]  ;;  %v1385_v13 = vld [vmem:[#allocation5 + $0x11f0] sm:$0xff] }
 0x122   :  { %3113 = vmatprep.subr.bf16.mxu1 %v3112_v8  ;;  %v1353_v8 = vld [vmem:[#allocation5 + $0x10f0] sm:$0xff]  ;;  %v3134_v16 = vpack.c.bf16 %v1351_v17, %v1347_v5  ;;  %v3214_v5 = vpack.c.bf16 %v1385_v13, %v1381_v61  ;;  %v3152_v17 = vpack.c.bf16 %v1392_v0, %v1388_v63  ;;  %v1419_v0 = vld [vmem:[#allocation5 + $0x1300] sm:$0xff] }
 0x123   :  { %v1417_v50 = vld [vmem:[#allocation5 + $0x12f0] sm:$0xff] }
 0x124   :  { %3051 = vmatpush1.bf16.msra.mxu0 %v3050_v14  ;;  %v3198_v14 = vpack.c.bf16 %v1353_v8, %v1349_v6  ;;  %v1387_v6 = vld [vmem:[#allocation5 + $0x1200] sm:$0xff]  ;;  %v1389_v8 = vld [vmem:[#allocation5 + $0x1210] sm:$0xff]  ;;  %v3230_v13 = vpack.c.bf16 %v1417_v50, %v1413_v48  ;;  %v1647_v48 = vld [vmem:[#allocation5 + $0x1438] sm:$0xff] }
 0x125   :  { %3115 = vmatpush1.bf16.msra.mxu1 %v3114_v18  ;;  %3053 = vmatprep.subr.bf16.mxu0 %v3052_v19  ;;  %v3136_v18 = vpack.c.bf16 %v1360_v10, %v1356_v9  ;;  %v1355_v19 = vld [vmem:[#allocation5 + $0x1100] sm:$0xff]  ;;  %v1393_v10 = vld [vmem:[#allocation5 + $0x1230] sm:$0xff] }
 0x126   :  { %3117 = vmatprep.subr.bf16.mxu1 %v3116_v23  ;;  %v1361_v23 = vld [vmem:[#allocation5 + $0x1130] sm:$0xff]  ;;  %v3138_v28 = vpack.c.bf16 %v1359_v20, %v1355_v19  ;;  %v3218_v19 = vpack.c.bf16 %v1393_v10, %v1389_v8  ;;  %v3156_v20 = vpack.c.bf16 %v1400_v12, %v1396_v11  ;;  %v1434_v8 = vld [vmem:[#allocation5 + $0x1378] sm:$0xff]  ;;  %v1427_v12 = vld [vmem:[#allocation5 + $0x1340] sm:$0xff] }
 0x128   :  { %3055 = vmatpush1.bf16.msra.mxu0 %v3054_v29  ;;  %v3140_v29 = vpack.c.bf16 %v1368_v25, %v1364_v24  ;;  %v1401_v25 = vld [vmem:[#allocation5 + $0x1270] sm:$0xff] }
 0x129   :  { %3119 = vmatpush1.bf16.msra.mxu1 %v3118_v30  ;;  %3121 = vmatprep.subr.bf16.mxu0 %v3120_v31  ;;  %v1363_v30 = vld [vmem:[#allocation5 + $0x1140] sm:$0xff] }
 0x12a   :  { %3185 = vmatprep.subr.bf16.mxu1 %v3184_v34  ;;  %v1367_v31 = vld [vmem:[#allocation5 + $0x1160] sm:$0xff]  ;;  %v1369_v34 = vld [vmem:[#allocation5 + $0x1170] sm:$0xff] }
 0x12b   :  { %1199 = vmatmul.mubr.f32.vlgmr.msra.gmra.mrb[12].mxu0 %v3798_v44  ;;  %v3206_v40 = vpack.c.bf16 %v1369_v34, %v1365_v32  ;;  %v1403_v32 = vld [vmem:[#allocation5 + $0x1280] sm:$0xff]  ;;  %v1405_v34 = vld [vmem:[#allocation5 + $0x1290] sm:$0xff] }
 0x12c   :  { %1276 = vmatmul.mubr.f32.vlgmr.msra.gmra.mrb[12].mxu1 %v3798_v44  ;;  %3123 = vmatpush1.bf16.msra.mxu0 %v3122_v39  ;;  %v3816_v44 = vld [vmem:[#allocation2 + $0x10] sm:$0xff]  ;;  %v3142_v39 = vpack.c.bf16 %v1367_v31, %v1363_v30  ;;  %v3160_v31 = vpack.c.bf16 %v1408_v27, %v1404_v26  ;;  %v1435_v27 = vld [vmem:[#allocation5 + $0x1380] sm:$0xff] }
 0x12d   :  { %3187 = vmatpush1.bf16.msra.mxu1 %v3186_v42  ;;  %1204 = vmatprep.mubr.f32.mxu0 %v3812_v54  ;;  %v1371_v42 = vld [vmem:[#allocation5 + $0x1180] sm:$0xff] }
 0x12e   :  { %1281 = vmatprep.mubr.f32.mxu1 %v3812_v54  ;;  %3125 = vmatprep.subr.bf16.mxu0 %v3124_v47  ;;  %v3208_v47 = vpack.c.bf16 %v1378_v38, %v1374_v37  ;;  %v1412_v37 = vld [vmem:[#allocation5 + $0x12c8] sm:$0xff] }
 0x12f   :  { %1205 = vmatmul.mubr.f32.gmra.mrb[14].mxu0 %v3816_v44  ;;  %3189 = vmatprep.subr.bf16.mxu1 %v3188_v15  ;;  %v1416_v38 = vld [vmem:[#allocation5 + $0x12e8] sm:$0xff] }
 0x130   :  { %1282 = vmatmul.mubr.f32.gmra.mrb[14].mxu1 %v3816_v44  ;;  %3127 = vmatpush1.bf16.msra.mxu0 %v3126_v53  ;;  %v1386_v53 = vld [vmem:[#allocation5 + $0x11f8] sm:$0xff] }
 0x131   :  { %3191 = vmatpush1.bf16.msra.mxu1 %v3190_v55  ;;  %3129 = vmatprep.subr.bf16.mxu0 %v3128_v56  ;;  %v3146_v56 = vpack.c.bf16 %v1375_v43, %v1371_v42  ;;  %v3212_v62 = vpack.c.bf16 %v1386_v53, %v1382_v52  ;;  %v3226_v42 = vpack.c.bf16 %v1409_v36, %v1405_v34  ;;  %v1420_v52 = vld [vmem:[#allocation5 + $0x1308] sm:$0xff]  ;;  %v1450_v34 = vld [vmem:[#allocation5 + $0x13f8] sm:$0xff] }
 0x132   :  { %3193 = vmatprep.subr.bf16.mxu1 %v3192_v60  ;;  %1515 = vmatprep.mubr.f32.mxu0 %v3806_v4  ;;  %v1383_v60 = vld [vmem:[#allocation5 + $0x11e0] sm:$0xff]  ;;  %v3164_v43 = vpack.c.bf16 %v1416_v38, %v1412_v37  ;;  %v1424_v53 = vld [vmem:[#allocation5 + $0x1328] sm:$0xff] }
 0x133   :  { %1592 = vmatprep.mubr.f32.mxu1 %v3806_v4  ;;  %v3202_v4 = vpack.c.bf16 %v1361_v23, %v1357_v21  ;;  %v1395_v21 = vld [vmem:[#allocation5 + $0x1240] sm:$0xff]  ;;  %v1397_v23 = vld [vmem:[#allocation5 + $0x1250] sm:$0xff]  ;;  %v3168_v63 = vpack.c.bf16 %v1424_v53, %v1420_v52 }
 0x134   :  { %3131 = vmatpush1.bf16.msra.mxu0 %v3130_v1  ;;  %v1390_v1 = vld [vmem:[#allocation5 + $0x1218] sm:$0xff]  ;;  %v3222_v30 = vpack.c.bf16 %v1401_v25, %v1397_v23  ;;  %v1443_v38 = vld [vmem:[#allocation5 + $0x13c0] sm:$0xff] }
 0x135   :  { %3195 = vmatpush1.bf16.msra.mxu1 %v3194_v2  ;;  %3133 = vmatprep.subr.bf16.mxu0 %v3132_v3  ;;  %v1394_v2 = vld [vmem:[#allocation5 + $0x1238] sm:$0xff]  ;;  %v3150_v3 = vpack.c.bf16 %v1383_v60, %v1379_v59  ;;  %v1640_v53 = vld [vmem:[#allocation5 + $0x1400] sm:$0xff] }
 0x136   :  { %3197 = vmatprep.subr.bf16.mxu1 %v3196_v7  ;;  %v1391_v7 = vld [vmem:[#allocation5 + $0x1220] sm:$0xff]  ;;  %v3216_v9 = vpack.c.bf16 %v1394_v2, %v1390_v1  ;;  %v1426_v59 = vld [vmem:[#allocation5 + $0x1338] sm:$0xff]  ;;  %v1421_v2 = vld [vmem:[#allocation5 + $0x1310] sm:$0xff] }
 0x137   :  { %v1423_v1 = vld [vmem:[#allocation5 + $0x1320] sm:$0xff]  ;;  %v1442_v23 = vld [vmem:[#allocation5 + $0x13b8] sm:$0xff] }
 0x138   :  { %3135 = vmatpush1.bf16.msra.mxu0 %v3134_v16  ;;  %v1398_v16 = vld [vmem:[#allocation5 + $0x1258] sm:$0xff] }
 0x139   :  { %3199 = vmatpush1.bf16.msra.mxu1 %v3198_v14  ;;  %3137 = vmatprep.subr.bf16.mxu0 %v3136_v18  ;;  %v1402_v14 = vld [vmem:[#allocation5 + $0x1278] sm:$0xff]  ;;  %v3154_v18 = vpack.c.bf16 %v1391_v7, %v1387_v6  ;;  %v1432_v6 = vld [vmem:[#allocation5 + $0x1368] sm:$0xff] }
 0x13a   :  { %3201 = vmatprep.subr.bf16.mxu1 %v3200_v22  ;;  %v1399_v22 = vld [vmem:[#allocation5 + $0x1260] sm:$0xff]  ;;  %v3220_v24 = vpack.c.bf16 %v1402_v14, %v1398_v16  ;;  %v1430_v7 = vld [vmem:[#allocation5 + $0x1358] sm:$0xff]  ;;  %v1429_v14 = vld [vmem:[#allocation5 + $0x1350] sm:$0xff] }
 0x13b   :  { %v1431_v16 = vld [vmem:[#allocation5 + $0x1360] sm:$0xff] }
 0x13c   :  { %3139 = vmatpush1.bf16.msra.mxu0 %v3138_v28  ;;  %v1406_v28 = vld [vmem:[#allocation5 + $0x1298] sm:$0xff] }
 0x13d   :  { %3203 = vmatpush1.bf16.msra.mxu1 %v3202_v4  ;;  %3141 = vmatprep.subr.bf16.mxu0 %v3140_v29  ;;  %v1410_v4 = vld [vmem:[#allocation5 + $0x12b8] sm:$0xff]  ;;  %v3158_v29 = vpack.c.bf16 %v1399_v22, %v1395_v21  ;;  %v1440_v21 = vld [vmem:[#allocation5 + $0x13a8] sm:$0xff] }
 0x13e   :  { %v3822_v46 = vpop.f32.mrb[0].mxu0  ;;  %3205 = vmatprep.subr.bf16.mxu1 %v3204_v33  ;;  %v1407_v33 = vld [vmem:[#allocation5 + $0x12a0] sm:$0xff]  ;;  %v3224_v35 = vpack.c.bf16 %v1410_v4, %v1406_v28  ;;  %v1438_v22 = vld [vmem:[#allocation5 + $0x1398] sm:$0xff]  ;;  %v1437_v4 = vld [vmem:[#allocation5 + $0x1390] sm:$0xff] }
 0x13f   :  { %v3824_v15 = vpop.f32.mrb[0].mxu1  ;;  %v3826_v51 = vpop.f32.mrb[1].mxu0  ;;  %v1439_v28 = vld [vmem:[#allocation5 + $0x13a0] sm:$0xff] }
 0x140   :  { %v3828_v55 = vpop.f32.mrb[1].mxu1  ;;  %3143 = vmatpush1.bf16.msra.mxu0 %v3142_v39  ;;  %v1414_v39 = vld [vmem:[#allocation5 + $0x12d8] sm:$0xff] }
 0x141   :  { %3207 = vmatpush1.bf16.msra.mxu1 %v3206_v40  ;;  %3145 = vmatprep.subr.bf16.mxu0 %v3144_v41  ;;  %v1418_v40 = vld [vmem:[#allocation5 + $0x12f8] sm:$0xff]  ;;  %v3162_v41 = vpack.c.bf16 %v1407_v33, %v1403_v32  ;;  %v1448_v32 = vld [vmem:[#allocation5 + $0x13e8] sm:$0xff] }
 0x142   :  { %3209 = vmatprep.subr.bf16.mxu1 %v3208_v47  ;;  %v1415_v47 = vld [vmem:[#allocation5 + $0x12e0] sm:$0xff]  ;;  %v3228_v49 = vpack.c.bf16 %v1418_v40, %v1414_v39  ;;  %v1446_v33 = vld [vmem:[#allocation5 + $0x13d8] sm:$0xff]  ;;  %v1445_v40 = vld [vmem:[#allocation5 + $0x13d0] sm:$0xff] }
 0x143   :  { %v1447_v39 = vld [vmem:[#allocation5 + $0x13e0] sm:$0xff] }
 0x144   :  { %3147 = vmatpush1.bf16.msra.mxu0 %v3146_v56  ;;  %v3830_v56 = vpop.f32.mrb[2].mxu0 }
 0x145   :  { %3211 = vmatpush1.bf16.msra.mxu1 %v3210_v57  ;;  %3149 = vmatprep.subr.bf16.mxu0 %v3148_v58  ;;  %v3832_v57 = vpop.f32.mrb[2].mxu1  ;;  %v1422_v58 = vld [vmem:[#allocation5 + $0x1318] sm:$0xff]  ;;  %v3834_v60 = vpop.f32.mrb[3].mxu0 }
 0x146   :  { %3213 = vmatprep.subr.bf16.mxu1 %v3212_v62  ;;  %v3836_v61 = vpop.f32.mrb[3].mxu1  ;;  %v3166_v62 = vpack.c.bf16 %v1415_v47, %v1411_v45  ;;  %v1645_v45 = vld [vmem:[#allocation5 + $0x1428] sm:$0xff]  ;;  %v1643_v47 = vld [vmem:[#allocation5 + $0x1418] sm:$0xff] }
 0x148   :  { %3151 = vmatpush1.bf16.msra.mxu0 %v3150_v3  ;;  %v3232_v3 = vpack.c.bf16 %v1426_v59, %v1422_v58  ;;  %v1644_v58 = vld [vmem:[#allocation5 + $0x1420] sm:$0xff]  ;;  %v3312_v59 = vpack.c.bf16 %v1647_v48, %v1643_v47 }
 0x149   :  { %3215 = vmatpush1.bf16.msra.mxu1 %v3214_v5  ;;  %3153 = vmatprep.subr.bf16.mxu0 %v3152_v17  ;;  %v1425_v5 = vld [vmem:[#allocation5 + $0x1330] sm:$0xff]  ;;  %v1428_v17 = vld [vmem:[#allocation5 + $0x1348] sm:$0xff] }
 0x14a   :  { %3217 = vmatprep.subr.bf16.mxu1 %v3216_v9  ;;  %v3170_v9 = vpack.c.bf16 %v1423_v1, %v1419_v0  ;;  %v3234_v10 = vpack.c.bf16 %v1425_v5, %v1421_v2  ;;  %v3172_v11 = vpack.c.bf16 %v1432_v6, %v1428_v17  ;;  %v1653_v0 = vld [vmem:[#allocation5 + $0x1468] sm:$0xff]  ;;  %v3250_v1 = vpack.c.bf16 %v1644_v58, %v1640_v53  ;;  %v1651_v2 = vld [vmem:[#allocation5 + $0x1458] sm:$0xff]  ;;  %v1648_v17 = vld [vmem:[#allocation5 + $0x1440] sm:$0xff] }
 0x14b   :  { %v1652_v6 = vld [vmem:[#allocation5 + $0x1460] sm:$0xff]  ;;  %v1678_v58 = vld [vmem:[#allocation5 + $0x1530] sm:$0xff] }
 0x14c   :  { %3155 = vmatpush1.bf16.msra.mxu0 %v3154_v18  ;;  %v3236_v18 = vpack.c.bf16 %v1434_v8, %v1430_v7  ;;  %v1650_v7 = vld [vmem:[#allocation5 + $0x1450] sm:$0xff] }
 0x14d   :  { %3219 = vmatpush1.bf16.msra.mxu1 %v3218_v19  ;;  %3157 = vmatprep.subr.bf16.mxu0 %v3156_v20  ;;  %v1433_v19 = vld [vmem:[#allocation5 + $0x1370] sm:$0xff]  ;;  %v1436_v20 = vld [vmem:[#allocation5 + $0x1388] sm:$0xff] }
 0x14e   :  { %3221 = vmatprep.subr.bf16.mxu1 %v3220_v24  ;;  %v3174_v24 = vpack.c.bf16 %v1431_v16, %v1427_v12  ;;  %v3238_v25 = vpack.c.bf16 %v1433_v19, %v1429_v14  ;;  %v3176_v26 = vpack.c.bf16 %v1440_v21, %v1436_v20  ;;  %v3838_v12 = vld [vmem:[#allocation2] sm:$0xff]  ;;  %v1659_v14 = vld [vmem:[#allocation5 + $0x1498] sm:$0xff]  ;;  %v3254_v19 = vpack.c.bf16 %v1652_v6, %v1648_v17 }
 0x150   :  { %3159 = vmatpush1.bf16.msra.mxu0 %v3158_v29  ;;  %v3240_v29 = vpack.c.bf16 %v1442_v23, %v1438_v22  ;;  %v1656_v22 = vld [vmem:[#allocation5 + $0x1480] sm:$0xff] }
 0x151   :  { %3223 = vmatpush1.bf16.msra.mxu1 %v3222_v30  ;;  %3161 = vmatprep.subr.bf16.mxu0 %v3160_v31  ;;  %v1441_v30 = vld [vmem:[#allocation5 + $0x13b0] sm:$0xff]  ;;  %v1444_v31 = vld [vmem:[#allocation5 + $0x13c8] sm:$0xff]  ;;  %v1660_v23 = vld [vmem:[#allocation5 + $0x14a0] sm:$0xff] }
 0x152   :  { %3225 = vmatprep.subr.bf16.mxu1 %v3224_v35  ;;  %v3178_v35 = vpack.c.bf16 %v1439_v28, %v1435_v27  ;;  %v3242_v36 = vpack.c.bf16 %v1441_v30, %v1437_v4  ;;  %v3180_v37 = vpack.c.bf16 %v1448_v32, %v1444_v31  ;;  %v1665_v27 = vld [vmem:[#allocation5 + $0x14c8] sm:$0xff]  ;;  %v40_v4 = vlaneseq  ;;  %v1671_v30 = vld [vmem:[#allocation5 + $0x14f8] sm:$0xff] }
 0x153   :  { %v1669_v28 = vld [vmem:[#allocation5 + $0x14e8] sm:$0xff]  ;;  %v3258_v31 = vpack.c.bf16 %v1660_v23, %v1656_v22 }
 0x154   :  { %3163 = vmatpush1.bf16.msra.mxu0 %v3162_v41  ;;  %v3244_v41 = vpack.c.bf16 %v1450_v34, %v1446_v33  ;;  %v3260_v33 = vpack.c.bf16 %v1669_v28, %v1665_v27  ;;  %v1668_v34 = vld [vmem:[#allocation5 + $0x14e0] sm:$0xff]  ;;  %v3864_v23 = vld [vmem:[#allocation5 + $0x15c8] sm:$0xff]  ;;  %v1699_v27 = vld [vmem:[#allocation5 + $0x15d8] sm:$0xff] }
 0x155   :  { %3227 = vmatpush1.bf16.msra.mxu1 %v3226_v42  ;;  %3165 = vmatprep.subr.bf16.mxu0 %v3164_v43  ;;  %v1449_v42 = vld [vmem:[#allocation5 + $0x13f0] sm:$0xff]  ;;  %v1641_v43 = vld [vmem:[#allocation5 + $0x1408] sm:$0xff]  ;;  %v1703_v28 = vld [vmem:[#allocation5 + $0x15f8] sm:$0xff] }
 0x156   :  { %3229 = vmatprep.subr.bf16.mxu1 %v3228_v49  ;;  %v3182_v49 = vpack.c.bf16 %v1447_v39, %v1443_v38  ;;  %v3246_v50 = vpack.c.bf16 %v1449_v42, %v1445_v40  ;;  %v3248_v52 = vpack.c.bf16 %v1645_v45, %v1641_v43  ;;  %v1673_v38 = vld [vmem:[#allocation5 + $0x1508] sm:$0xff]  ;;  %v1679_v42 = vld [vmem:[#allocation5 + $0x1538] sm:$0xff] }
 0x157   :  { %v1677_v39 = vld [vmem:[#allocation5 + $0x1528] sm:$0xff] }
 0x158   :  { %3167 = vmatpush1.bf16.msra.mxu0 %v3166_v62  ;;  %v1642_v62 = vld [vmem:[#allocation5 + $0x1410] sm:$0xff]  ;;  %v3846_v40 = vld [vmem:[#allocation2 + $0x8] sm:$0xff]  ;;  %v3264_v48 = vpack.c.bf16 %v1677_v39, %v1673_v38 }
 0x159   :  { %3231 = vmatpush1.bf16.msra.mxu1 %v3230_v13  ;;  %3169 = vmatprep.subr.bf16.mxu0 %v3168_v63  ;;  %v1646_v13 = vld [vmem:[#allocation5 + $0x1430] sm:$0xff]  ;;  %v1649_v63 = vld [vmem:[#allocation5 + $0x1448] sm:$0xff] }
 0x15a   :  { %3233 = vmatprep.subr.bf16.mxu1 %v3232_v3  ;;  %v1655_v3 = vld [vmem:[#allocation5 + $0x1478] sm:$0xff]  ;;  %v3314_v5 = vpack.c.bf16 %v1646_v13, %v1642_v62  ;;  %v3252_v8 = vpack.c.bf16 %v1653_v0, %v1649_v63  ;;  %v1685_v62 = vld [vmem:[#allocation5 + $0x1568] sm:$0xff] }
 0x15b   :  { %v3316_v16 = vpack.c.bf16 %v1655_v3, %v1651_v2  ;;  %v1683_v13 = vld [vmem:[#allocation5 + $0x1558] sm:$0xff]  ;;  %v1680_v2 = vld [vmem:[#allocation5 + $0x1540] sm:$0xff] }
 0x15c   :  { %3171 = vmatpush1.bf16.msra.mxu0 %v3170_v9  ;;  %v1654_v9 = vld [vmem:[#allocation5 + $0x1470] sm:$0xff]  ;;  %v1687_v63 = vld [vmem:[#allocation5 + $0x1578] sm:$0xff]  ;;  %v1684_v3 = vld [vmem:[#allocation5 + $0x1560] sm:$0xff] }
 0x15d   :  { %3235 = vmatpush1.bf16.msra.mxu1 %v3234_v10  ;;  %3173 = vmatprep.subr.bf16.mxu0 %v3172_v11  ;;  %v1657_v10 = vld [vmem:[#allocation5 + $0x1488] sm:$0xff]  ;;  %v3318_v20 = vpack.c.bf16 %v1654_v9, %v1650_v7  ;;  %v3270_v22 = vpack.c.bf16 %v1684_v3, %v1680_v2 }
 0x15e   :  { %3237 = vmatprep.subr.bf16.mxu1 %v3236_v18  ;;  %v1661_v11 = vld [vmem:[#allocation5 + $0x14a8] sm:$0xff]  ;;  %v1663_v18 = vld [vmem:[#allocation5 + $0x14b8] sm:$0xff] }
 0x15f   :  { %v3256_v21 = vpack.c.bf16 %v1661_v11, %v1657_v10  ;;  %v1689_v9 = vld [vmem:[#allocation5 + $0x1588] sm:$0xff]  ;;  %v3332_v11 = vpack.c.bf16 %v1687_v63, %v1683_v13  ;;  %v1707_v13 = vld [vmem:[#allocation5 + $0x1618] sm:$0xff] }
 0x160   :  { %3175 = vmatpush1.bf16.msra.mxu0 %v3174_v24  ;;  %v1658_v24 = vld [vmem:[#allocation5 + $0x1490] sm:$0xff]  ;;  %v1693_v10 = vld [vmem:[#allocation5 + $0x15a8] sm:$0xff] }
 0x161   :  { %3239 = vmatpush1.bf16.msra.mxu1 %v3238_v25  ;;  %3177 = vmatprep.subr.bf16.mxu0 %v3176_v26  ;;  %v3320_v25 = vpack.c.bf16 %v1663_v18, %v1659_v14  ;;  %v1662_v26 = vld [vmem:[#allocation5 + $0x14b0] sm:$0xff]  ;;  %v1695_v14 = vld [vmem:[#allocation5 + $0x15b8] sm:$0xff]  ;;  %v3854_v18 = vld [vmem:[#allocation5 + $0x1580] sm:$0xff] }
 0x162   :  { %3241 = vmatprep.subr.bf16.mxu1 %v3240_v29  ;;  %v1667_v29 = vld [vmem:[#allocation5 + $0x14d8] sm:$0xff]  ;;  %v3322_v32 = vpack.c.bf16 %v1662_v26, %v1658_v24  ;;  %v3866_v24 = vld [vmem:[#allocation5 + $0x15e8] sm:$0xff]  ;;  %v3272_v26 = vpack.c.bf16 %v1693_v10, %v1689_v9 }
 0x163   :  { %v3276_v39 = vpack.c.bf16 %v3866_v24, %v3864_v23  ;;  %v1713_v23 = vld [vmem:[#allocation5 + $0x1648] sm:$0xff] }
 0x164   :  { %3179 = vmatpush1.bf16.msra.mxu0 %v3178_v35  ;;  %v1666_v35 = vld [vmem:[#allocation5 + $0x14d0] sm:$0xff]  ;;  %v1717_v24 = vld [vmem:[#allocation5 + $0x1668] sm:$0xff] }
 0x165   :  { %3243 = vmatpush1.bf16.msra.mxu1 %v3242_v36  ;;  %3181 = vmatprep.subr.bf16.mxu0 %v3180_v37  ;;  %v3324_v36 = vpack.c.bf16 %v1671_v30, %v1667_v29  ;;  %v1670_v37 = vld [vmem:[#allocation5 + $0x14f0] sm:$0xff] }
 0x166   :  { %3245 = vmatprep.subr.bf16.mxu1 %v3244_v41  ;;  %v41_v41 = vshrl.u32 %v40_v4, 7  ;;  %v3326_v45 = vpack.c.bf16 %v1670_v37, %v1666_v35 }
 0x168   :  { %3183 = vmatpush1.bf16.msra.mxu0 %v3182_v49  ;;  %v42_v47 = vadd.s32 8, %v41_v41  ;;  %v1672_v49 = vld [vmem:[#allocation5 + $0x1500] sm:$0xff]  ;;  %v3850_v0 = vand.u32 7, %v41_v41  ;;  %v1702_v41 = vld [vmem:[#allocation5 + $0x15f0] sm:$0xff] }
 0x169   :  { %3247 = vmatpush1.bf16.msra.mxu1 %v3246_v50  ;;  %3249 = vmatprep.subr.bf16.mxu0 %v3248_v52  ;;  %v1676_v50 = vld [vmem:[#allocation5 + $0x1520] sm:$0xff]  ;;  %v1674_v52 = vld [vmem:[#allocation5 + $0x1510] sm:$0xff] }
 0x16a   :  { %3313 = vmatprep.subr.bf16.mxu1 %v3312_v59  ;;  %v1681_v59 = vld [vmem:[#allocation5 + $0x1548] sm:$0xff]  ;;  %v3852_v17 = vand.u32 7, %v42_v47  ;;  %v3330_v6 = vpack.c.bf16 %v1678_v58, %v1674_v52  ;;  %vm353_vm0 = vcmp.eq.s32.totalorder %v3850_v0, 0  ;;  %vm654_vm1 = vcmp.eq.s32.totalorder %v3850_v0, 1 }
 0x16b   :  { %1516 = vmatmul.mubr.f32.vlgmr.msra.gmra.mrb[16].mxu0 %v3838_v12  ;;  %v3268_v7 = vpack.c.bf16 %v1685_v62, %v1681_v59  ;;  %v357_v35 = vsel %vm353_vm0, %v3824_v15, 0.0  ;;  %v1709_v47 = vld [vmem:[#allocation5 + $0x1628] sm:$0xff]  ;;  %v3340_v58 = vpack.c.bf16 %v1703_v28, %v1699_v27  ;;  %v3284_v28 = vpack.c.bf16 %v1717_v24, %v1713_v23 }
 0x16c   :  { %1593 = vmatmul.mubr.f32.vlgmr.msra.gmra.mrb[16].mxu1 %v3838_v12  ;;  %3251 = vmatpush1.bf16.msra.mxu0 %v3250_v1  ;;  %v3266_v1 = vpack.c.bf16 %v1676_v50, %v1672_v49  ;;  %vm354_vm2 = vcmp.eq.s32.totalorder %v3852_v17, 0  ;;  %vm655_vm3 = vcmp.eq.s32.totalorder %v3852_v17, 1  ;;  %vm971_vm4 = vcmp.eq.s32.totalorder %v3850_v0, 2 }
 0x16d   :  { %3315 = vmatpush1.bf16.msra.mxu1 %v3314_v5  ;;  %1521 = vmatprep.mubr.f32.mxu0 %v3812_v54  ;;  %v1682_v5 = vld [vmem:[#allocation5 + $0x1550] sm:$0xff]  ;;  %v361_v63 = vsel %vm354_vm2, %v3832_v57, 0.0  ;;  %v362_v10 = vsel %vm354_vm2, %v3836_v61, 0.0  ;;  %v1715_v61 = vld [vmem:[#allocation5 + $0x1658] sm:$0xff]  ;;  %vm972_vm5 = vcmp.eq.s32.totalorder %v3852_v17, 2  ;;  %vm1288_vm6 = vcmp.eq.s32.totalorder %v3850_v0, 3 }
 0x16e   :  { %1598 = vmatprep.mubr.f32.mxu1 %v3812_v54  ;;  %3253 = vmatprep.subr.bf16.mxu0 %v3252_v8  ;;  %v1664_v54 = vld [vmem:[#allocation5 + $0x14c0] sm:$0xff]  ;;  %v1686_v8 = vld [vmem:[#allocation5 + $0x1570] sm:$0xff]  ;;  %vm1289_vm7 = vcmp.eq.s32.totalorder %v3852_v17, 3  ;;  %vm1605_vm8 = vcmp.eq.s32.totalorder %v3850_v0, 4  ;;  %vm1606_vm9 = vcmp.eq.s32.totalorder %v3852_v17, 4  ;;  %vm1922_vm10 = vcmp.eq.s32.totalorder %v3850_v0, 5 }
 0x16f   :  { %1522 = vmatmul.mubr.f32.gmra.mrb[18].mxu0 %v3816_v44  ;;  %3317 = vmatprep.subr.bf16.mxu1 %v3316_v16  ;;  %v3262_v43 = vpack.c.bf16 %v1668_v34, %v1664_v54  ;;  %v1691_v16 = vld [vmem:[#allocation5 + $0x1598] sm:$0xff]  ;;  %v1698_v54 = vld [vmem:[#allocation5 + $0x15d0] sm:$0xff]  ;;  %v355_v34 = vsel %vm353_vm0, %v3822_v46, 0.0  ;;  %vm1923_vm11 = vcmp.eq.s32.totalorder %v3852_v17, 5  ;;  %vm2239_vm12 = vcmp.eq.s32.totalorder %v3850_v0, 6 }
 0x170   :  { %1599 = vmatmul.mubr.f32.gmra.mrb[18].mxu1 %v3816_v44  ;;  %3255 = vmatpush1.bf16.msra.mxu0 %v3254_v19  ;;  %v1675_v44 = vld [vmem:[#allocation5 + $0x1518] sm:$0xff]  ;;  %v3856_v19 = vld [vmem:[#allocation5 + $0x15a0] sm:$0xff]  ;;  %v3336_v29 = vpack.c.bf16 %v1695_v14, %v1691_v16  ;;  %v3342_v62 = vpack.c.bf16 %v1702_v41, %v1698_v54  ;;  %v1725_v54 = vld [vmem:[#allocation5 + $0x16a8] sm:$0xff]  ;;  %vm2240_vm13 = vcmp.eq.s32.totalorder %v3852_v17, 6  ;;  %vm2556_vm14 = vcmp.eq.s32.totalorder %v3850_v0, 7 }
 0x171   :  { %3319 = vmatpush1.bf16.msra.mxu1 %v3318_v20  ;;  %3257 = vmatprep.subr.bf16.mxu0 %v3256_v21  ;;  %v3328_v53 = vpack.c.bf16 %v1679_v42, %v1675_v44  ;;  %v3858_v20 = vld [vmem:[#allocation5 + $0x1590] sm:$0xff]  ;;  %v3274_v30 = vpack.c.bf16 %v3856_v19, %v3854_v18  ;;  %v356_v44 = vsel %vm353_vm0, %v3826_v51, 0.0  ;;  %v1704_v14 = vld [vmem:[#allocation5 + $0x1600] sm:$0xff]  ;;  %vm2557_vm15 = vcmp.eq.s32.totalorder %v3852_v17, 7 }
 0x172   :  { %3321 = vmatprep.subr.bf16.mxu1 %v3320_v25  ;;  %1832 = vmatprep.mubr.f32.mxu0 %v3846_v40  ;;  %v3860_v21 = vld [vmem:[#allocation5 + $0x15b0] sm:$0xff]  ;;  %v3334_v25 = vpack.c.bf16 %v1686_v8, %v1682_v5  ;;  %v1708_v18 = vld [vmem:[#allocation5 + $0x1620] sm:$0xff] }
 0x173   :  { %1909 = vmatprep.mubr.f32.mxu1 %v3846_v40  ;;  %v1706_v19 = vld [vmem:[#allocation5 + $0x1610] sm:$0xff]  ;;  %v1724_v41 = vld [vmem:[#allocation5 + $0x16a0] sm:$0xff] }
 0x174   :  { %3259 = vmatpush1.bf16.msra.mxu0 %v3258_v31  ;;  %v3338_v31 = vpack.c.bf16 %v3860_v21, %v3858_v20 }
 0x175   :  { %3323 = vmatpush1.bf16.msra.mxu1 %v3322_v32  ;;  %3261 = vmatprep.subr.bf16.mxu0 %v3260_v33  ;;  %v1696_v32 = vld [vmem:[#allocation5 + $0x15c0] sm:$0xff] }
 0x176   :  { %3325 = vmatprep.subr.bf16.mxu1 %v3324_v36  ;;  %v1700_v33 = vld [vmem:[#allocation5 + $0x15e0] sm:$0xff] }
 0x177   :  { %v3278_v59 = vpack.c.bf16 %v1700_v33, %v1696_v32  ;;  %v1718_v32 = vld [vmem:[#allocation5 + $0x1670] sm:$0xff]  ;;  %v1721_v33 = vld [vmem:[#allocation5 + $0x1688] sm:$0xff] }
 0x178   :  { %3263 = vmatpush1.bf16.msra.mxu0 %v3262_v43 }
 0x179   :  { %3327 = vmatpush1.bf16.msra.mxu1 %v3326_v45  ;;  %3265 = vmatprep.subr.bf16.mxu0 %v3264_v48  ;;  %v1705_v45 = vld [vmem:[#allocation5 + $0x1608] sm:$0xff]  ;;  %v358_v48 = vsel %vm353_vm0, %v3828_v55, 0.0  ;;  %v359_v55 = vsel %vm354_vm2, %v3830_v56, 0.0 }
 0x17a   :  { %3329 = vmatprep.subr.bf16.mxu1 %v3328_v53  ;;  %v3280_v5 = vpack.c.bf16 %v1709_v47, %v1705_v45  ;;  %v1733_v45 = vld [vmem:[#allocation5 + $0x16e8] sm:$0xff]  ;;  %v1731_v47 = vld [vmem:[#allocation5 + $0x16d8] sm:$0xff] }
 0x17c   :  { %3267 = vmatpush1.bf16.msra.mxu0 %v3266_v1 }
 0x17d   :  { %3331 = vmatpush1.bf16.msra.mxu1 %v3330_v6  ;;  %3269 = vmatprep.subr.bf16.mxu0 %v3268_v7  ;;  %v1711_v6 = vld [vmem:[#allocation5 + $0x1638] sm:$0xff]  ;;  %v360_v7 = vsel %vm354_vm2, %v3834_v60, 0.0 }
 0x17e   :  { %v566_v4 = vpop.f32.mrb[4].mxu0  ;;  %3333 = vmatprep.subr.bf16.mxu1 %v3332_v11  ;;  %v3344_v21 = vpack.c.bf16 %v1711_v6, %v1707_v13  ;;  %v1730_v13 = vld [vmem:[#allocation5 + $0x16d0] sm:$0xff] }
 0x17f   :  { %v656_v36 = vsel %vm654_vm1, %v566_v4, 0.0  ;;  %v643_v37 = vpop.f32.mrb[4].mxu1  ;;  %v568_v38 = vpop.f32.mrb[5].mxu0  ;;  %v1712_v4 = vld [vmem:[#allocation5 + $0x1640] sm:$0xff] }
 0x180   :  { %v3887_v42 = vadd.f32 %v656_v36, %v355_v34  ;;  %v658_v46 = vsel %vm654_vm1, %v643_v37, 0.0  ;;  %v657_v15 = vsel %vm654_vm1, %v568_v38, 0.0  ;;  %v645_v43 = vpop.f32.mrb[5].mxu1  ;;  %3271 = vmatpush1.bf16.msra.mxu0 %v3270_v22  ;;  %v1710_v22 = vld [vmem:[#allocation5 + $0x1630] sm:$0xff]  ;;  %v1723_v34 = vld [vmem:[#allocation5 + $0x1698] sm:$0xff]  ;;  %v3288_v38 = vpack.c.bf16 %v1725_v54, %v1721_v33 }
 0x181   :  { %v3896_v49 = vadd.f32 %v658_v46, %v357_v35  ;;  %v3898_v50 = vadd.f32 %v657_v15, %v356_v44  ;;  %v659_v51 = vsel %vm654_vm1, %v645_v43, 0.0  ;;  %3335 = vmatpush1.bf16.msra.mxu1 %v3334_v25  ;;  %3273 = vmatprep.subr.bf16.mxu0 %v3272_v26  ;;  %v1719_v25 = vld [vmem:[#allocation5 + $0x1678] sm:$0xff]  ;;  %v3282_v26 = vpack.c.bf16 %v1708_v18, %v1704_v14  ;;  %v1722_v44 = vld [vmem:[#allocation5 + $0x1690] sm:$0xff]  ;;  %v1729_v43 = vld [vmem:[#allocation5 + $0x16c8] sm:$0xff] }
 0x182   :  { %v3902_v52 = vadd.f32 %v659_v51, %v358_v48  ;;  %v572_v53 = vpop.f32.mrb[6].mxu0  ;;  %3337 = vmatprep.subr.bf16.mxu1 %v3336_v29  ;;  %v3346_v27 = vpack.c.bf16 %v1710_v22, %v1706_v19  ;;  %v1716_v29 = vld [vmem:[#allocation5 + $0x1660] sm:$0xff]  ;;  %v1727_v35 = vld [vmem:[#allocation5 + $0x16b8] sm:$0xff]  ;;  %v1726_v15 = vld [vmem:[#allocation5 + $0x16b0] sm:$0xff] }
 0x183   :  { %v660_v1 = vsel %vm655_vm3, %v572_v53, 0.0  ;;  %v649_v2 = vpop.f32.mrb[6].mxu1  ;;  %v574_v3 = vpop.f32.mrb[7].mxu0  ;;  %v3286_v36 = vpack.c.bf16 %v1716_v29, %v1712_v4  ;;  %v3352_v46 = vpack.c.bf16 %v1727_v35, %v1723_v34  ;;  %v1735_v48 = vld [vmem:[#allocation5 + $0x16f8] sm:$0xff]  ;;  %v3354_v53 = vpack.c.bf16 %v1726_v15, %v1722_v44  ;;  %v1742_v14 = vld [vmem:[#allocation5 + $0x1730] sm:$0xff]  ;;  %v1745_v18 = vld [vmem:[#allocation5 + $0x1748] sm:$0xff] }
 0x184   :  { %v3915_v8 = vadd.f32 %v660_v1, %v359_v55  ;;  %v662_v56 = vsel %vm655_vm3, %v649_v2, 0.0  ;;  %v661_v9 = vsel %vm655_vm3, %v574_v3, 0.0  ;;  %v651_v57 = vpop.f32.mrb[7].mxu1  ;;  %3275 = vmatpush1.bf16.msra.mxu0 %v3274_v30  ;;  %v1714_v30 = vld [vmem:[#allocation5 + $0x1650] sm:$0xff]  ;;  %v3356_v55 = vpack.c.bf16 %v1735_v48, %v1731_v47  ;;  %v1737_v1 = vld [vmem:[#allocation5 + $0x1708] sm:$0xff]  ;;  %v1739_v3 = vld [vmem:[#allocation5 + $0x1718] sm:$0xff] }
 0x185   :  { %v3924_v11 = vadd.f32 %v662_v56, %v361_v63  ;;  %v3926_v16 = vadd.f32 %v661_v9, %v360_v7  ;;  %v663_v60 = vsel %vm655_vm3, %v651_v57, 0.0  ;;  %3339 = vmatpush1.bf16.msra.mxu1 %v3338_v31  ;;  %3277 = vmatprep.subr.bf16.mxu0 %v3276_v39  ;;  %v3348_v31 = vpack.c.bf16 %v1719_v25, %v1715_v61  ;;  %v1720_v39 = vld [vmem:[#allocation5 + $0x1680] sm:$0xff]  ;;  %v1734_v63 = vld [vmem:[#allocation5 + $0x16f0] sm:$0xff]  ;;  %v1741_v2 = vld [vmem:[#allocation5 + $0x1728] sm:$0xff] }
 0x186   :  { %v3930_v20 = vadd.f32 %v663_v60, %v362_v10  ;;  %3341 = vmatprep.subr.bf16.mxu1 %v3340_v58  ;;  %v3350_v37 = vpack.c.bf16 %v1718_v32, %v1714_v30  ;;  %v3290_v51 = vpack.c.bf16 %v1724_v41, %v1720_v39  ;;  %v3292_v58 = vpack.c.bf16 %v1733_v45, %v1729_v43  ;;  %v1736_v9 = vld [vmem:[#allocation5 + $0x1700] sm:$0xff]  ;;  %v1738_v10 = vld [vmem:[#allocation5 + $0x1710] sm:$0xff]  ;;  %v1749_v19 = vld [vmem:[#allocation5 + $0x1768] sm:$0xff] }
 0x187   :  { %v3358_v7 = vpack.c.bf16 %v1734_v63, %v1730_v13  ;;  %v3296_v56 = vpack.c.bf16 %v1741_v2, %v1737_v1  ;;  %v1740_v57 = vld [vmem:[#allocation5 + $0x1720] sm:$0xff]  ;;  %v1751_v22 = vld [vmem:[#allocation5 + $0x1778] sm:$0xff]  ;;  %v3362_v24 = vpack.c.bf16 %v1742_v14, %v1738_v10  ;;  %v3300_v61 = vpack.c.bf16 %v1749_v19, %v1745_v18  ;;  %v1750_v4 = vld [vmem:[#allocation5 + $0x1770] sm:$0xff] }
 0x188   :  { %3279 = vmatpush1.bf16.msra.mxu0 %v3278_v59  ;;  %v1728_v59 = vld [vmem:[#allocation5 + $0x16c0] sm:$0xff]  ;;  %v3298_v23 = vpack.c.bf16 %v1740_v57, %v1736_v9  ;;  %v1753_v29 = vld [vmem:[#allocation5 + $0x1788] sm:$0xff]  ;;  %v1759_v32 = vld [vmem:[#allocation5 + $0x17b8] sm:$0xff] }
 0x189   :  { %3343 = vmatpush1.bf16.msra.mxu1 %v3342_v62  ;;  %3281 = vmatprep.subr.bf16.mxu0 %v3280_v5  ;;  %v1732_v62 = vld [vmem:[#allocation5 + $0x16e0] sm:$0xff]  ;;  %v1743_v5 = vld [vmem:[#allocation5 + $0x1738] sm:$0xff]  ;;  %v1757_v30 = vld [vmem:[#allocation5 + $0x17a8] sm:$0xff] }
 0x18a   :  { %3345 = vmatprep.subr.bf16.mxu1 %v3344_v21  ;;  %v3294_v6 = vpack.c.bf16 %v1732_v62, %v1728_v59  ;;  %v3360_v60 = vpack.c.bf16 %v1743_v5, %v1739_v3  ;;  %v1747_v21 = vld [vmem:[#allocation5 + $0x1758] sm:$0xff]  ;;  %v1744_v25 = vld [vmem:[#allocation5 + $0x1740] sm:$0xff]  ;;  %v3304_v34 = vpack.c.bf16 %v1757_v30, %v1753_v29  ;;  %v1758_v39 = vld [vmem:[#allocation5 + $0x17b0] sm:$0xff] }
 0x18b   :  { %v1752_v35 = vld [vmem:[#allocation5 + $0x1780] sm:$0xff]  ;;  %v1761_v41 = vld [vmem:[#allocation5 + $0x17c8] sm:$0xff]  ;;  %v1767_v15 = vld [vmem:[#allocation5 + $0x17f8] sm:$0xff] }
 0x18c   :  { %3283 = vmatpush1.bf16.msra.mxu0 %v3282_v26  ;;  %v1748_v26 = vld [vmem:[#allocation5 + $0x1760] sm:$0xff]  ;;  %v1765_v44 = vld [vmem:[#allocation5 + $0x17e8] sm:$0xff]  ;;  %v1766_v59 = vld [vmem:[#allocation5 + $0x17f0] sm:$0xff] }
 0x18d   :  { %3347 = vmatpush1.bf16.msra.mxu1 %v3346_v27  ;;  %3285 = vmatprep.subr.bf16.mxu0 %v3284_v28  ;;  %v1746_v27 = vld [vmem:[#allocation5 + $0x1750] sm:$0xff]  ;;  %v3364_v28 = vpack.c.bf16 %v1751_v22, %v1747_v21  ;;  %v3302_v33 = vpack.c.bf16 %v1748_v26, %v1744_v25  ;;  %v3308_v47 = vpack.c.bf16 %v1765_v44, %v1761_v41  ;;  %v1760_v48 = vld [vmem:[#allocation5 + $0x17c0] sm:$0xff]  ;;  %v1958_v62 = vld [vmem:[#allocation5 + $0x1808] sm:$0xff] }
 0x18e   :  { %3349 = vmatprep.subr.bf16.mxu1 %v3348_v31  ;;  %v1755_v31 = vld [vmem:[#allocation5 + $0x1798] sm:$0xff]  ;;  %v3366_v54 = vpack.c.bf16 %v1750_v4, %v1746_v27  ;;  %v1962_v13 = vld [vmem:[#allocation5 + $0x1828] sm:$0xff]  ;;  %v1957_v5 = vld [vmem:[#allocation5 + $0x1800] sm:$0xff] }
 0x18f   :  { %v1964_v63 = vld [vmem:[#allocation5 + $0x1838] sm:$0xff]  ;;  %v3376_v3 = vpack.c.bf16 %v1962_v13, %v1958_v62  ;;  %v1963_v9 = vld [vmem:[#allocation5 + $0x1830] sm:$0xff]  ;;  %v1966_v57 = vld [vmem:[#allocation5 + $0x1848] sm:$0xff] }
 0x190   :  { %3287 = vmatpush1.bf16.msra.mxu0 %v3286_v36  ;;  %v1756_v36 = vld [vmem:[#allocation5 + $0x17a0] sm:$0xff]  ;;  %v1970_v10 = vld [vmem:[#allocation5 + $0x1868] sm:$0xff]  ;;  %v1968_v14 = vld [vmem:[#allocation5 + $0x1858] sm:$0xff] }
 0x191   :  { %3351 = vmatpush1.bf16.msra.mxu1 %v3350_v37  ;;  %3289 = vmatprep.subr.bf16.mxu0 %v3288_v38  ;;  %v1754_v37 = vld [vmem:[#allocation5 + $0x1790] sm:$0xff]  ;;  %v3368_v38 = vpack.c.bf16 %v1759_v32, %v1755_v31  ;;  %v3306_v43 = vpack.c.bf16 %v1756_v36, %v1752_v35  ;;  %v1972_v18 = vld [vmem:[#allocation5 + $0x1878] sm:$0xff]  ;;  %v1965_v21 = vld [vmem:[#allocation5 + $0x1840] sm:$0xff] }
 0x192   :  { %3353 = vmatprep.subr.bf16.mxu1 %v3352_v46  ;;  %v1763_v46 = vld [vmem:[#allocation5 + $0x17d8] sm:$0xff]  ;;  %v3370_v45 = vpack.c.bf16 %v1758_v39, %v1754_v37  ;;  %v1969_v22 = vld [vmem:[#allocation5 + $0x1860] sm:$0xff]  ;;  %v1974_v25 = vld [vmem:[#allocation5 + $0x1888] sm:$0xff]  ;;  %v3444_v27 = vpack.c.bf16 %v1972_v18, %v1968_v14 }
 0x193   :  { %v1978_v26 = vld [vmem:[#allocation5 + $0x18a8] sm:$0xff]  ;;  %v1980_v4 = vld [vmem:[#allocation5 + $0x18b8] sm:$0xff]  ;;  %v3382_v29 = vpack.c.bf16 %v1969_v22, %v1965_v21  ;;  %v1979_v36 = vld [vmem:[#allocation5 + $0x18b0] sm:$0xff] }
 0x194   :  { %3291 = vmatpush1.bf16.msra.mxu0 %v3290_v51  ;;  %v1764_v51 = vld [vmem:[#allocation5 + $0x17e0] sm:$0xff]  ;;  %v3934_v30 = vld [vmem:[#allocation2 + $0x18] sm:$0xff]  ;;  %v3384_v32 = vpack.c.bf16 %v1978_v26, %v1974_v25  ;;  %v1982_v37 = vld [vmem:[#allocation5 + $0x18c8] sm:$0xff] }
 0x195   :  { %3355 = vmatpush1.bf16.msra.mxu1 %v3354_v53  ;;  %3293 = vmatprep.subr.bf16.mxu0 %v3292_v58  ;;  %v1762_v53 = vld [vmem:[#allocation5 + $0x17d0] sm:$0xff]  ;;  %v3372_v58 = vpack.c.bf16 %v1767_v15, %v1763_v46  ;;  %v3310_v1 = vpack.c.bf16 %v1764_v51, %v1760_v48  ;;  %v1984_v39 = vld [vmem:[#allocation5 + $0x18d8] sm:$0xff]  ;;  %v1997_v14 = vld [vmem:[#allocation5 + $0x1940] sm:$0xff] }
 0x196   :  { %3357 = vmatprep.subr.bf16.mxu1 %v3356_v55  ;;  %v1960_v55 = vld [vmem:[#allocation5 + $0x1818] sm:$0xff]  ;;  %v3374_v2 = vpack.c.bf16 %v1766_v59, %v1762_v53  ;;  %v1987_v51 = vld [vmem:[#allocation5 + $0x18f0] sm:$0xff]  ;;  %v1990_v53 = vld [vmem:[#allocation5 + $0x1908] sm:$0xff] }
 0x197   :  { %v1988_v41 = vld [vmem:[#allocation5 + $0x18f8] sm:$0xff]  ;;  %v2001_v18 = vld [vmem:[#allocation5 + $0x1960] sm:$0xff]  ;;  %v2003_v22 = vld [vmem:[#allocation5 + $0x1970] sm:$0xff] }
 0x198   :  { %3295 = vmatpush1.bf16.msra.mxu0 %v3294_v6  ;;  %v1961_v6 = vld [vmem:[#allocation5 + $0x1820] sm:$0xff]  ;;  %v3452_v48 = vpack.c.bf16 %v1988_v41, %v1984_v39  ;;  %v1992_v59 = vld [vmem:[#allocation5 + $0x1918] sm:$0xff]  ;;  %v3398_v26 = vpack.c.bf16 %v2001_v18, %v1997_v14 }
 0x199   :  { %3359 = vmatpush1.bf16.msra.mxu1 %v3358_v7  ;;  %3297 = vmatprep.subr.bf16.mxu0 %v3296_v56  ;;  %v3440_v7 = vpack.c.bf16 %v1964_v63, %v1960_v55  ;;  %v1959_v56 = vld [vmem:[#allocation5 + $0x1810] sm:$0xff]  ;;  %v1996_v62 = vld [vmem:[#allocation5 + $0x1938] sm:$0xff] }
 0x19a   :  { %3361 = vmatprep.subr.bf16.mxu1 %v3360_v60  ;;  %v3378_v60 = vpack.c.bf16 %v1961_v6, %v1957_v5  ;;  %v3442_v19 = vpack.c.bf16 %v1963_v9, %v1959_v56  ;;  %v3456_v5 = vpack.c.bf16 %v1996_v62, %v1992_v59  ;;  %v1995_v6 = vld [vmem:[#allocation5 + $0x1930] sm:$0xff]  ;;  %v2002_v56 = vld [vmem:[#allocation5 + $0x1968] sm:$0xff]  ;;  %v2000_v9 = vld [vmem:[#allocation5 + $0x1958] sm:$0xff] }
 0x19b   :  { %v2012_v25 = vld [vmem:[#allocation5 + $0x19b8] sm:$0xff]  ;;  %v2015_v62 = vld [vmem:[#allocation5 + $0x19d0] sm:$0xff] }
 0x19c   :  { %3299 = vmatpush1.bf16.msra.mxu0 %v3298_v23  ;;  %v1967_v23 = vld [vmem:[#allocation5 + $0x1850] sm:$0xff]  ;;  %v2016_v41 = vld [vmem:[#allocation5 + $0x19d8] sm:$0xff] }
 0x19d   :  { %3363 = vmatpush1.bf16.msra.mxu1 %v3362_v24  ;;  %3301 = vmatprep.subr.bf16.mxu0 %v3300_v61  ;;  %v3380_v24 = vpack.c.bf16 %v1970_v10, %v1966_v57  ;;  %v1971_v61 = vld [vmem:[#allocation5 + $0x1870] sm:$0xff]  ;;  %v2004_v57 = vld [vmem:[#allocation5 + $0x1978] sm:$0xff] }
 0x19e   :  { %3365 = vmatprep.subr.bf16.mxu1 %v3364_v28  ;;  %v1976_v28 = vld [vmem:[#allocation5 + $0x1898] sm:$0xff]  ;;  %v3446_v31 = vpack.c.bf16 %v1971_v61, %v1967_v23  ;;  %v3460_v21 = vpack.c.bf16 %v2004_v57, %v2000_v9  ;;  %v2006_v23 = vld [vmem:[#allocation5 + $0x1988] sm:$0xff] }
 0x19f   :  { %v3448_v35 = vpack.c.bf16 %v1980_v4, %v1976_v28  ;;  %v2008_v61 = vld [vmem:[#allocation5 + $0x1998] sm:$0xff]  ;;  %v2009_v28 = vld [vmem:[#allocation5 + $0x19a0] sm:$0xff] }
 0x1a0   :  { %3303 = vmatpush1.bf16.msra.mxu0 %v3302_v33  ;;  %v1973_v33 = vld [vmem:[#allocation5 + $0x1880] sm:$0xff] }
 0x1a1   :  { %3367 = vmatpush1.bf16.msra.mxu1 %v3366_v54  ;;  %3305 = vmatprep.subr.bf16.mxu0 %v3304_v34  ;;  %v1977_v54 = vld [vmem:[#allocation5 + $0x18a0] sm:$0xff]  ;;  %v1975_v34 = vld [vmem:[#allocation5 + $0x1890] sm:$0xff] }
 0x1a2   :  { %3369 = vmatprep.subr.bf16.mxu1 %v3368_v38  ;;  %v1986_v38 = vld [vmem:[#allocation5 + $0x18e8] sm:$0xff]  ;;  %v3386_v44 = vpack.c.bf16 %v1977_v54, %v1973_v33  ;;  %v3450_v46 = vpack.c.bf16 %v1979_v36, %v1975_v34  ;;  %v3464_v54 = vpack.c.bf16 %v2012_v25, %v2008_v61  ;;  %v2027_v61 = vld [vmem:[#allocation5 + $0x1a30] sm:$0xff] }
 0x1a3   :  { %v3388_v15 = vpack.c.bf16 %v1986_v38, %v1982_v37  ;;  %v2014_v34 = vld [vmem:[#allocation5 + $0x19c8] sm:$0xff] }
 0x1a4   :  { %3307 = vmatpush1.bf16.msra.mxu0 %v3306_v43  ;;  %v1981_v43 = vld [vmem:[#allocation5 + $0x18c0] sm:$0xff]  ;;  %v2034_v25 = vld [vmem:[#allocation5 + $0x1a68] sm:$0xff] }
 0x1a5   :  { %3371 = vmatpush1.bf16.msra.mxu1 %v3370_v45  ;;  %3309 = vmatprep.subr.bf16.mxu0 %v3308_v47  ;;  %v1985_v45 = vld [vmem:[#allocation5 + $0x18e0] sm:$0xff]  ;;  %v1983_v47 = vld [vmem:[#allocation5 + $0x18d0] sm:$0xff] }
 0x1a6   :  { %3373 = vmatprep.subr.bf16.mxu1 %v3372_v58  ;;  %v1994_v58 = vld [vmem:[#allocation5 + $0x1928] sm:$0xff]  ;;  %v3390_v13 = vpack.c.bf16 %v1985_v45, %v1981_v43  ;;  %v3454_v55 = vpack.c.bf16 %v1987_v51, %v1983_v47  ;;  %v2017_v51 = vld [vmem:[#allocation5 + $0x19e0] sm:$0xff] }
 0x1a7   :  { %v3392_v63 = vpack.c.bf16 %v1994_v58, %v1990_v53 }
 0x1a8   :  { %3311 = vmatpush1.bf16.msra.mxu0 %v3310_v1  ;;  %v1989_v1 = vld [vmem:[#allocation5 + $0x1900] sm:$0xff] }
 0x1a9   :  { %3375 = vmatpush1.bf16.msra.mxu1 %v3374_v2  ;;  %3377 = vmatprep.subr.bf16.mxu0 %v3376_v3  ;;  %v1993_v2 = vld [vmem:[#allocation5 + $0x1920] sm:$0xff]  ;;  %v1991_v3 = vld [vmem:[#allocation5 + $0x1910] sm:$0xff] }
 0x1aa   :  { %3441 = vmatprep.subr.bf16.mxu1 %v3440_v7  ;;  %v1998_v7 = vld [vmem:[#allocation5 + $0x1948] sm:$0xff]  ;;  %v3394_v10 = vpack.c.bf16 %v1993_v2, %v1989_v1 }
 0x1ab   :  { %1833 = vmatmul.mubr.f32.vlgmr.msra.gmra.mrb[20].mxu0 %v3838_v12  ;;  %v2022_v2 = vld [vmem:[#allocation5 + $0x1a08] sm:$0xff] }
 0x1ac   :  { %1910 = vmatmul.mubr.f32.vlgmr.msra.gmra.mrb[20].mxu1 %v3838_v12  ;;  %3379 = vmatpush1.bf16.msra.mxu0 %v3378_v60  ;;  %v3938_v12 = vld [vmem:[#allocation2 + $0x10] sm:$0xff]  ;;  %v3396_v60 = vpack.c.bf16 %v2002_v56, %v1998_v7  ;;  %v2024_v7 = vld [vmem:[#allocation5 + $0x1a18] sm:$0xff] }
 0x1ad   :  { %3443 = vmatpush1.bf16.msra.mxu1 %v3442_v19  ;;  %1838 = vmatprep.mubr.f32.mxu0 %v3934_v30  ;;  %v1999_v19 = vld [vmem:[#allocation5 + $0x1950] sm:$0xff]  ;;  %v2028_v56 = vld [vmem:[#allocation5 + $0x1a38] sm:$0xff] }
 0x1ae   :  { %1915 = vmatprep.mubr.f32.mxu1 %v3934_v30  ;;  %3381 = vmatprep.subr.bf16.mxu0 %v3380_v24  ;;  %v2010_v24 = vld [vmem:[#allocation5 + $0x19a8] sm:$0xff]  ;;  %v3462_v4 = vpack.c.bf16 %v2003_v22, %v1999_v19  ;;  %v2021_v19 = vld [vmem:[#allocation5 + $0x1a00] sm:$0xff]  ;;  %v2023_v22 = vld [vmem:[#allocation5 + $0x1a10] sm:$0xff] }
 0x1af   :  { %1839 = vmatmul.mubr.f32.gmra.mrb[22].mxu0 %v3938_v12  ;;  %3445 = vmatprep.subr.bf16.mxu1 %v3444_v27  ;;  %v2005_v27 = vld [vmem:[#allocation5 + $0x1980] sm:$0xff] }
 0x1b0   :  { %1916 = vmatmul.mubr.f32.gmra.mrb[22].mxu1 %v3938_v12  ;;  %3383 = vmatpush1.bf16.msra.mxu0 %v3382_v29  ;;  %v3400_v29 = vpack.c.bf16 %v2010_v24, %v2006_v23  ;;  %v3402_v39 = vpack.c.bf16 %v2009_v28, %v2005_v27  ;;  %v3472_v24 = vpack.c.bf16 %v2028_v56, %v2024_v7  ;;  %v2060_v7 = vld [vmem:[#allocation5 + $0x1b38] sm:$0xff] }
 0x1b1   :  { %3447 = vmatpush1.bf16.msra.mxu1 %v3446_v31  ;;  %3385 = vmatprep.subr.bf16.mxu0 %v3384_v32  ;;  %v2007_v31 = vld [vmem:[#allocation5 + $0x1990] sm:$0xff]  ;;  %v3474_v28 = vpack.c.bf16 %v2027_v61, %v2023_v22  ;;  %v2066_v22 = vld [vmem:[#allocation5 + $0x1b68] sm:$0xff]  ;;  %v2068_v61 = vld [vmem:[#allocation5 + $0x1b78] sm:$0xff] }
 0x1b2   :  { %3449 = vmatprep.subr.bf16.mxu1 %v3448_v35  ;;  %2149 = vmatprep.mubr.f32.mxu0 %v3846_v40  ;;  %v2011_v32 = vld [vmem:[#allocation5 + $0x19b0] sm:$0xff]  ;;  %v2018_v35 = vld [vmem:[#allocation5 + $0x19e8] sm:$0xff] }
 0x1b3   :  { %2226 = vmatprep.mubr.f32.mxu1 %v3846_v40  ;;  %v3458_v40 = vpack.c.bf16 %v1995_v6, %v1991_v3  ;;  %v3466_v47 = vpack.c.bf16 %v2011_v32, %v2007_v31  ;;  %v3404_v59 = vpack.c.bf16 %v2018_v35, %v2014_v34  ;;  %v2033_v31 = vld [vmem:[#allocation5 + $0x1a60] sm:$0xff]  ;;  %v2031_v32 = vld [vmem:[#allocation5 + $0x1a50] sm:$0xff]  ;;  %v2042_v34 = vld [vmem:[#allocation5 + $0x1aa8] sm:$0xff] }
 0x1b4   :  { %3387 = vmatpush1.bf16.msra.mxu0 %v3386_v44  ;;  %v2020_v44 = vld [vmem:[#allocation5 + $0x19f8] sm:$0xff] }
 0x1b5   :  { %3451 = vmatpush1.bf16.msra.mxu1 %v3450_v46  ;;  %3389 = vmatprep.subr.bf16.mxu0 %v3388_v15  ;;  %v3468_v1 = vpack.c.bf16 %v2020_v44, %v2016_v41  ;;  %v2040_v35 = vld [vmem:[#allocation5 + $0x1a98] sm:$0xff]  ;;  %v2037_v41 = vld [vmem:[#allocation5 + $0x1a80] sm:$0xff] }
 0x1b6   :  { %3453 = vmatprep.subr.bf16.mxu1 %v3452_v48  ;;  %v2013_v48 = vld [vmem:[#allocation5 + $0x19c0] sm:$0xff] }
 0x1b7   :  { %v3406_v6 = vpack.c.bf16 %v2017_v51, %v2013_v48  ;;  %v2041_v44 = vld [vmem:[#allocation5 + $0x1aa0] sm:$0xff]  ;;  %v2050_v48 = vld [vmem:[#allocation5 + $0x1ae8] sm:$0xff]  ;;  %v2048_v51 = vld [vmem:[#allocation5 + $0x1ad8] sm:$0xff] }
 0x1b8   :  { %3391 = vmatpush1.bf16.msra.mxu0 %v3390_v13  ;;  %v2019_v13 = vld [vmem:[#allocation5 + $0x19f0] sm:$0xff] }
 0x1b9   :  { %3455 = vmatpush1.bf16.msra.mxu1 %v3454_v55  ;;  %3393 = vmatprep.subr.bf16.mxu0 %v3392_v63 }
 0x1ba   :  { %3457 = vmatprep.subr.bf16.mxu1 %v3456_v5 }
 0x1bc   :  { %3395 = vmatpush1.bf16.msra.mxu0 %v3394_v10 }
 0x1bd   :  { %3459 = vmatpush1.bf16.msra.mxu1 %v3458_v40  ;;  %3397 = vmatprep.subr.bf16.mxu0 %v3396_v60  ;;  %v3470_v40 = vpack.c.bf16 %v2019_v13, %v2015_v62 }
 0x1be   :  { %v883_v33 = vpop.f32.mrb[8].mxu0  ;;  %3461 = vmatprep.subr.bf16.mxu1 %v3460_v21  ;;  %v2025_v21 = vld [vmem:[#allocation5 + $0x1a20] sm:$0xff] }
 0x1bf   :  { %v973_v36 = vsel %vm971_vm4, %v883_v33, 0.0  ;;  %v960_v37 = vpop.f32.mrb[8].mxu1  ;;  %v885_v38 = vpop.f32.mrb[9].mxu0  ;;  %v3410_v27 = vpack.c.bf16 %v2025_v21, %v2021_v19  ;;  %v2059_v19 = vld [vmem:[#allocation5 + $0x1b30] sm:$0xff]  ;;  %v2062_v21 = vld [vmem:[#allocation5 + $0x1b48] sm:$0xff] }
 0x1c0   :  { %v3949_v46 = vadd.f32 %v973_v36, %v3887_v42  ;;  %v975_v15 = vsel %vm971_vm4, %v960_v37, 0.0  ;;  %v974_v43 = vsel %vm971_vm4, %v885_v38, 0.0  ;;  %v962_v45 = vpop.f32.mrb[9].mxu1  ;;  %3399 = vmatpush1.bf16.msra.mxu0 %v3398_v26  ;;  %v2032_v26 = vld [vmem:[#allocation5 + $0x1a58] sm:$0xff] }
 0x1c1   :  { %v3956_v53 = vadd.f32 %v975_v15, %v3896_v49  ;;  %v3959_v58 = vadd.f32 %v974_v43, %v3898_v50  ;;  %v976_v42 = vsel %vm971_vm4, %v962_v45, 0.0  ;;  %3463 = vmatpush1.bf16.msra.mxu1 %v3462_v4  ;;  %3401 = vmatprep.subr.bf16.mxu0 %v3400_v29  ;;  %v2026_v49 = vld [vmem:[#allocation5 + $0x1a28] sm:$0xff]  ;;  %v2029_v29 = vld [vmem:[#allocation5 + $0x1a40] sm:$0xff]  ;;  %v2044_v36 = vld [vmem:[#allocation5 + $0x1ab8] sm:$0xff] }
 0x1c2   :  { %v3964_v55 = vadd.f32 %v976_v42, %v3902_v52  ;;  %v889_v63 = vpop.f32.mrb[10].mxu0  ;;  %3465 = vmatprep.subr.bf16.mxu1 %v3464_v54  ;;  %v2038_v54 = vld [vmem:[#allocation5 + $0x1a88] sm:$0xff]  ;;  %v3414_v37 = vpack.c.bf16 %v2033_v31, %v2029_v29  ;;  %v2039_v15 = vld [vmem:[#allocation5 + $0x1a90] sm:$0xff]  ;;  %v3480_v43 = vpack.c.bf16 %v2044_v36, %v2040_v35  ;;  %v2052_v42 = vld [vmem:[#allocation5 + $0x1af8] sm:$0xff] }
 0x1c3   :  { %v977_v50 = vsel %vm972_vm5, %v889_v63, 0.0  ;;  %v966_v3 = vpop.f32.mrb[10].mxu1  ;;  %v891_v5 = vpop.f32.mrb[11].mxu0  ;;  %v2043_v45 = vld [vmem:[#allocation5 + $0x1ab0] sm:$0xff]  ;;  %v2045_v63 = vld [vmem:[#allocation5 + $0x1ac0] sm:$0xff]  ;;  %v2070_v31 = vld [vmem:[#allocation5 + $0x1b88] sm:$0xff] }
 0x1c4   :  { %v3969_v9 = vadd.f32 %v977_v50, %v3915_v8  ;;  %v979_v52 = vsel %vm972_vm5, %v966_v3, 0.0  ;;  %v978_v57 = vsel %vm972_vm5, %v891_v5, 0.0  ;;  %v968_v10 = vpop.f32.mrb[11].mxu1  ;;  %3403 = vmatpush1.bf16.msra.mxu0 %v3402_v39  ;;  %v3408_v8 = vpack.c.bf16 %v2026_v49, %v2022_v2  ;;  %v2047_v2 = vld [vmem:[#allocation5 + $0x1ad0] sm:$0xff]  ;;  %v2054_v3 = vld [vmem:[#allocation5 + $0x1b08] sm:$0xff]  ;;  %v2069_v36 = vld [vmem:[#allocation5 + $0x1b80] sm:$0xff] }
 0x1c5   :  { %v3976_v60 = vadd.f32 %v979_v52, %v3924_v11  ;;  %v3979_v14 = vadd.f32 %v978_v57, %v3926_v16  ;;  %v980_v18 = vsel %vm972_vm5, %v968_v10, 0.0  ;;  %3467 = vmatpush1.bf16.msra.mxu1 %v3466_v47  ;;  %3405 = vmatprep.subr.bf16.mxu0 %v3404_v59  ;;  %v2030_v11 = vld [vmem:[#allocation5 + $0x1a48] sm:$0xff]  ;;  %v2036_v16 = vld [vmem:[#allocation5 + $0x1a78] sm:$0xff]  ;;  %v3416_v39 = vpack.c.bf16 %v2042_v34, %v2038_v54  ;;  %v2051_v50 = vld [vmem:[#allocation5 + $0x1af0] sm:$0xff] }
 0x1c6   :  { %v3984_v23 = vadd.f32 %v980_v18, %v3930_v20  ;;  %3469 = vmatprep.subr.bf16.mxu1 %v3468_v1  ;;  %v3412_v4 = vpack.c.bf16 %v2034_v25, %v2030_v11  ;;  %v3476_v33 = vpack.c.bf16 %v2036_v16, %v2032_v26  ;;  %v2035_v20 = vld [vmem:[#allocation5 + $0x1a70] sm:$0xff]  ;;  %v2046_v47 = vld [vmem:[#allocation5 + $0x1ac8] sm:$0xff]  ;;  %v3418_v59 = vpack.c.bf16 %v2041_v44, %v2037_v41  ;;  %v2049_v1 = vld [vmem:[#allocation5 + $0x1ae0] sm:$0xff] }
 0x1c7   :  { %v3478_v38 = vpack.c.bf16 %v2035_v20, %v2031_v32  ;;  %v3482_v62 = vpack.c.bf16 %v2043_v45, %v2039_v15  ;;  %v3420_v13 = vpack.c.bf16 %v2050_v48, %v2046_v47  ;;  %v3484_v49 = vpack.c.bf16 %v2052_v42, %v2048_v51  ;;  %v2058_v5 = vld [vmem:[#allocation5 + $0x1b28] sm:$0xff]  ;;  %v2053_v10 = vld [vmem:[#allocation5 + $0x1b00] sm:$0xff]  ;;  %v2055_v18 = vld [vmem:[#allocation5 + $0x1b10] sm:$0xff] }
 0x1c8   :  { %3407 = vmatpush1.bf16.msra.mxu0 %v3406_v6  ;;  %v2056_v6 = vld [vmem:[#allocation5 + $0x1b18] sm:$0xff]  ;;  %v3422_v56 = vpack.c.bf16 %v2049_v1, %v2045_v63  ;;  %v3486_v52 = vpack.c.bf16 %v2051_v50, %v2047_v2  ;;  %v3424_v57 = vpack.c.bf16 %v2058_v5, %v2054_v3  ;;  %v3490_v25 = vpack.c.bf16 %v2059_v19, %v2055_v18  ;;  %v2061_v16 = vld [vmem:[#allocation5 + $0x1b40] sm:$0xff]  ;;  %v2067_v29 = vld [vmem:[#allocation5 + $0x1b70] sm:$0xff] }
 0x1c9   :  { %3471 = vmatpush1.bf16.msra.mxu1 %v3470_v40  ;;  %3409 = vmatprep.subr.bf16.mxu0 %v3408_v8  ;;  %v2057_v40 = vld [vmem:[#allocation5 + $0x1b20] sm:$0xff]  ;;  %v3488_v8 = vpack.c.bf16 %v2060_v7, %v2056_v6  ;;  %v3428_v26 = vpack.c.bf16 %v2066_v22, %v2062_v21  ;;  %v2074_v32 = vld [vmem:[#allocation5 + $0x1ba8] sm:$0xff]  ;;  %v2076_v20 = vld [vmem:[#allocation5 + $0x1bb8] sm:$0xff] }
 0x1ca   :  { %3473 = vmatprep.subr.bf16.mxu1 %v3472_v24  ;;  %v2064_v24 = vld [vmem:[#allocation5 + $0x1b58] sm:$0xff]  ;;  %v3426_v11 = vpack.c.bf16 %v2057_v40, %v2053_v10  ;;  %v3432_v35 = vpack.c.bf16 %v2074_v32, %v2070_v31  ;;  %v2075_v41 = vld [vmem:[#allocation5 + $0x1bb0] sm:$0xff]  ;;  %v2078_v44 = vld [vmem:[#allocation5 + $0x1bc8] sm:$0xff] }
 0x1cb   :  { %v2082_v15 = vld [vmem:[#allocation5 + $0x1be8] sm:$0xff]  ;;  %v2084_v45 = vld [vmem:[#allocation5 + $0x1bf8] sm:$0xff]  ;;  %v2077_v42 = vld [vmem:[#allocation5 + $0x1bc0] sm:$0xff] }
 0x1cc   :  { %3411 = vmatpush1.bf16.msra.mxu0 %v3410_v27  ;;  %v2065_v27 = vld [vmem:[#allocation5 + $0x1b60] sm:$0xff]  ;;  %v3436_v51 = vpack.c.bf16 %v2082_v15, %v2078_v44  ;;  %v2083_v63 = vld [vmem:[#allocation5 + $0x1bf0] sm:$0xff]  ;;  %v2275_v1 = vld [vmem:[#allocation5 + $0x1c08] sm:$0xff] }
 0x1cd   :  { %3475 = vmatpush1.bf16.msra.mxu1 %v3474_v28  ;;  %3413 = vmatprep.subr.bf16.mxu0 %v3412_v4  ;;  %v2063_v28 = vld [vmem:[#allocation5 + $0x1b50] sm:$0xff]  ;;  %v3492_v4 = vpack.c.bf16 %v2068_v61, %v2064_v24  ;;  %v3430_v54 = vpack.c.bf16 %v2065_v27, %v2061_v16  ;;  %v2279_v2 = vld [vmem:[#allocation5 + $0x1c28] sm:$0xff]  ;;  %v2281_v50 = vld [vmem:[#allocation5 + $0x1c38] sm:$0xff] }
 0x1ce   :  { %3477 = vmatprep.subr.bf16.mxu1 %v3476_v33  ;;  %v2072_v33 = vld [vmem:[#allocation5 + $0x1b98] sm:$0xff]  ;;  %v3494_v34 = vpack.c.bf16 %v2067_v29, %v2063_v28  ;;  %v3504_v6 = vpack.c.bf16 %v2279_v2, %v2275_v1  ;;  %v2274_v7 = vld [vmem:[#allocation5 + $0x1c00] sm:$0xff]  ;;  %v2280_v10 = vld [vmem:[#allocation5 + $0x1c30] sm:$0xff] }
 0x1cf   :  { %v2283_v40 = vld [vmem:[#allocation5 + $0x1c48] sm:$0xff]  ;;  %v2285_v19 = vld [vmem:[#allocation5 + $0x1c58] sm:$0xff]  ;;  %v2282_v24 = vld [vmem:[#allocation5 + $0x1c40] sm:$0xff] }
 0x1d0   :  { %3415 = vmatpush1.bf16.msra.mxu0 %v3414_v37  ;;  %v2073_v37 = vld [vmem:[#allocation5 + $0x1ba0] sm:$0xff]  ;;  %v2287_v18 = vld [vmem:[#allocation5 + $0x1c68] sm:$0xff]  ;;  %v2289_v21 = vld [vmem:[#allocation5 + $0x1c78] sm:$0xff] }
 0x1d1   :  { %3479 = vmatpush1.bf16.msra.mxu1 %v3478_v38  ;;  %3417 = vmatprep.subr.bf16.mxu0 %v3416_v39  ;;  %v2071_v38 = vld [vmem:[#allocation5 + $0x1b90] sm:$0xff]  ;;  %v3496_v39 = vpack.c.bf16 %v2076_v20, %v2072_v33  ;;  %v3434_v47 = vpack.c.bf16 %v2073_v37, %v2069_v36  ;;  %v2286_v61 = vld [vmem:[#allocation5 + $0x1c60] sm:$0xff]  ;;  %v2291_v16 = vld [vmem:[#allocation5 + $0x1c88] sm:$0xff] }
 0x1d2   :  { %3481 = vmatprep.subr.bf16.mxu1 %v3480_v43  ;;  %v2080_v43 = vld [vmem:[#allocation5 + $0x1bd8] sm:$0xff]  ;;  %v3498_v48 = vpack.c.bf16 %v2075_v41, %v2071_v38  ;;  %v2295_v27 = vld [vmem:[#allocation5 + $0x1ca8] sm:$0xff]  ;;  %v3986_v28 = vld [vmem:[#allocation2] sm:$0xff]  ;;  %v3510_v32 = vpack.c.bf16 %v2286_v61, %v2282_v24 }
 0x1d3   :  { %v2293_v29 = vld [vmem:[#allocation5 + $0x1c98] sm:$0xff]  ;;  %v3512_v20 = vpack.c.bf16 %v2295_v27, %v2291_v16  ;;  %v2296_v37 = vld [vmem:[#allocation5 + $0x1cb0] sm:$0xff]  ;;  %v2299_v38 = vld [vmem:[#allocation5 + $0x1cc8] sm:$0xff] }
 0x1d4   :  { %3419 = vmatpush1.bf16.msra.mxu0 %v3418_v59  ;;  %v2081_v59 = vld [vmem:[#allocation5 + $0x1be0] sm:$0xff]  ;;  %v2297_v31 = vld [vmem:[#allocation5 + $0x1cb8] sm:$0xff]  ;;  %v2320_v61 = vld [vmem:[#allocation5 + $0x1d70] sm:$0xff] }
 0x1d5   :  { %3483 = vmatpush1.bf16.msra.mxu1 %v3482_v62  ;;  %3421 = vmatprep.subr.bf16.mxu0 %v3420_v13  ;;  %v2079_v62 = vld [vmem:[#allocation5 + $0x1bd0] sm:$0xff]  ;;  %v3500_v13 = vpack.c.bf16 %v2084_v45, %v2080_v43  ;;  %v3438_v3 = vpack.c.bf16 %v2081_v59, %v2077_v42  ;;  %v3576_v36 = vpack.c.bf16 %v2297_v31, %v2293_v29  ;;  %v2301_v41 = vld [vmem:[#allocation5 + $0x1cd8] sm:$0xff]  ;;  %v2307_v59 = vld [vmem:[#allocation5 + $0x1d08] sm:$0xff] }
 0x1d6   :  { %3485 = vmatprep.subr.bf16.mxu1 %v3484_v49  ;;  %v2277_v49 = vld [vmem:[#allocation5 + $0x1c18] sm:$0xff]  ;;  %v3502_v5 = vpack.c.bf16 %v2083_v63, %v2079_v62  ;;  %v2304_v42 = vld [vmem:[#allocation5 + $0x1cf0] sm:$0xff]  ;;  %v2311_v62 = vld [vmem:[#allocation5 + $0x1d28] sm:$0xff] }
 0x1d7   :  { %v2305_v44 = vld [vmem:[#allocation5 + $0x1cf8] sm:$0xff]  ;;  %v2326_v29 = vld [vmem:[#allocation5 + $0x1da0] sm:$0xff] }
 0x1d8   :  { %3423 = vmatpush1.bf16.msra.mxu0 %v3422_v56  ;;  %v2278_v56 = vld [vmem:[#allocation5 + $0x1c20] sm:$0xff]  ;;  %v2309_v63 = vld [vmem:[#allocation5 + $0x1d18] sm:$0xff] }
 0x1d9   :  { %3487 = vmatpush1.bf16.msra.mxu1 %v3486_v52  ;;  %3425 = vmatprep.subr.bf16.mxu0 %v3424_v57  ;;  %v3568_v52 = vpack.c.bf16 %v2281_v50, %v2277_v49  ;;  %v2276_v57 = vld [vmem:[#allocation5 + $0x1c10] sm:$0xff]  ;;  %v2313_v1 = vld [vmem:[#allocation5 + $0x1d38] sm:$0xff]  ;;  %v3520_v49 = vpack.c.bf16 %v2311_v62, %v2307_v59  ;;  %v2306_v50 = vld [vmem:[#allocation5 + $0x1d00] sm:$0xff] }
 0x1da   :  { %3489 = vmatprep.subr.bf16.mxu1 %v3488_v8  ;;  %v3506_v8 = vpack.c.bf16 %v2278_v56, %v2274_v7  ;;  %v3570_v22 = vpack.c.bf16 %v2280_v10, %v2276_v57  ;;  %v2312_v7 = vld [vmem:[#allocation5 + $0x1d30] sm:$0xff]  ;;  %v2315_v56 = vld [vmem:[#allocation5 + $0x1d48] sm:$0xff]  ;;  %v2317_v57 = vld [vmem:[#allocation5 + $0x1d58] sm:$0xff] }
 0x1db   :  { %v2321_v10 = vld [vmem:[#allocation5 + $0x1d78] sm:$0xff] }
 0x1dc   :  { %3427 = vmatpush1.bf16.msra.mxu0 %v3426_v11  ;;  %v2284_v11 = vld [vmem:[#allocation5 + $0x1c50] sm:$0xff]  ;;  %v3588_v24 = vpack.c.bf16 %v2321_v10, %v2317_v57  ;;  %v2329_v16 = vld [vmem:[#allocation5 + $0x1db8] sm:$0xff] }
 0x1dd   :  { %3491 = vmatpush1.bf16.msra.mxu1 %v3490_v25  ;;  %3429 = vmatprep.subr.bf16.mxu0 %v3428_v26  ;;  %v3508_v25 = vpack.c.bf16 %v2287_v18, %v2283_v40  ;;  %v2288_v26 = vld [vmem:[#allocation5 + $0x1c70] sm:$0xff] }
 0x1de   :  { %3493 = vmatprep.subr.bf16.mxu1 %v3492_v4  ;;  %v3572_v4 = vpack.c.bf16 %v2289_v21, %v2285_v19  ;;  %v3574_v33 = vpack.c.bf16 %v2288_v26, %v2284_v11  ;;  %v2314_v19 = vld [vmem:[#allocation5 + $0x1d40] sm:$0xff]  ;;  %v2323_v11 = vld [vmem:[#allocation5 + $0x1d88] sm:$0xff]  ;;  %v2325_v26 = vld [vmem:[#allocation5 + $0x1d98] sm:$0xff] }
 0x1df   :  { %v2318_v21 = vld [vmem:[#allocation5 + $0x1d60] sm:$0xff] }
 0x1e0   :  { %3431 = vmatpush1.bf16.msra.mxu0 %v3430_v54  ;;  %v2290_v54 = vld [vmem:[#allocation5 + $0x1c80] sm:$0xff]  ;;  %v3526_v27 = vpack.c.bf16 %v2318_v21, %v2314_v19 }
 0x1e1   :  { %3495 = vmatpush1.bf16.msra.mxu1 %v3494_v34  ;;  %3433 = vmatprep.subr.bf16.mxu0 %v3432_v35  ;;  %v2294_v34 = vld [vmem:[#allocation5 + $0x1ca0] sm:$0xff]  ;;  %v2292_v35 = vld [vmem:[#allocation5 + $0x1c90] sm:$0xff] }
 0x1e2   :  { %3497 = vmatprep.subr.bf16.mxu1 %v3496_v39  ;;  %v2303_v39 = vld [vmem:[#allocation5 + $0x1ce8] sm:$0xff]  ;;  %v3514_v15 = vpack.c.bf16 %v2294_v34, %v2290_v54  ;;  %v3578_v43 = vpack.c.bf16 %v2296_v37, %v2292_v35  ;;  %v3592_v34 = vpack.c.bf16 %v2329_v16, %v2325_v26  ;;  %v2338_v21 = vld [vmem:[#allocation5 + $0x1e00] sm:$0xff]  ;;  %v2349_v16 = vld [vmem:[#allocation5 + $0x1e58] sm:$0xff] }
 0x1e3   :  { %v3516_v45 = vpack.c.bf16 %v2303_v39, %v2299_v38  ;;  %v2331_v35 = vld [vmem:[#allocation5 + $0x1dc8] sm:$0xff] }
 0x1e4   :  { %3435 = vmatpush1.bf16.msra.mxu0 %v3434_v47  ;;  %v2298_v47 = vld [vmem:[#allocation5 + $0x1cc0] sm:$0xff]  ;;  %v2351_v26 = vld [vmem:[#allocation5 + $0x1e68] sm:$0xff] }
 0x1e5   :  { %3499 = vmatpush1.bf16.msra.mxu1 %v3498_v48  ;;  %3437 = vmatprep.subr.bf16.mxu0 %v3436_v51  ;;  %v2300_v48 = vld [vmem:[#allocation5 + $0x1cd0] sm:$0xff]  ;;  %v3580_v51 = vpack.c.bf16 %v2305_v44, %v2301_v41  ;;  %v2333_v44 = vld [vmem:[#allocation5 + $0x1dd8] sm:$0xff] }
 0x1e6   :  { %3501 = vmatprep.subr.bf16.mxu1 %v3500_v13  ;;  %v3648_v13 = vld [vmem:[#allocation2 + $0x8] sm:$0xff]  ;;  %v3582_v2 = vpack.c.bf16 %v2304_v42, %v2300_v48  ;;  %v2334_v42 = vld [vmem:[#allocation5 + $0x1de0] sm:$0xff] }
 0x1e8   :  { %3439 = vmatpush1.bf16.msra.mxu0 %v3438_v3  ;;  %v2310_v3 = vld [vmem:[#allocation5 + $0x1d20] sm:$0xff] }
 0x1e9   :  { %3503 = vmatpush1.bf16.msra.mxu1 %v3502_v5  ;;  %3505 = vmatprep.subr.bf16.mxu0 %v3504_v6  ;;  %v2308_v5 = vld [vmem:[#allocation5 + $0x1d10] sm:$0xff]  ;;  %v3584_v6 = vpack.c.bf16 %v2313_v1, %v2309_v63  ;;  %v3522_v40 = vpack.c.bf16 %v2310_v3, %v2306_v50  ;;  %v2339_v50 = vld [vmem:[#allocation5 + $0x1e08] sm:$0xff] }
 0x1ea   :  { %3569 = vmatprep.subr.bf16.mxu1 %v3568_v52  ;;  %v2319_v52 = vld [vmem:[#allocation5 + $0x1d68] sm:$0xff]  ;;  %v3586_v18 = vpack.c.bf16 %v2312_v7, %v2308_v5  ;;  %v2332_v63 = vld [vmem:[#allocation5 + $0x1dd0] sm:$0xff]  ;;  %v2341_v7 = vld [vmem:[#allocation5 + $0x1e18] sm:$0xff] }
 0x1eb   :  { %2150 = vmatmul.mubr.f32.vlgmr.msra.gmra.mrb[24].mxu0 %v3986_v28  ;;  %v2336_v1 = vld [vmem:[#allocation5 + $0x1df0] sm:$0xff] }
 0x1ec   :  { %2227 = vmatmul.mubr.f32.vlgmr.msra.gmra.mrb[24].mxu1 %v3986_v28  ;;  %3507 = vmatpush1.bf16.msra.mxu0 %v3506_v8  ;;  %v3524_v8 = vpack.c.bf16 %v2319_v52, %v2315_v56  ;;  %v2345_v56 = vld [vmem:[#allocation5 + $0x1e38] sm:$0xff] }
 0x1ed   :  { %3571 = vmatpush1.bf16.msra.mxu1 %v3570_v22  ;;  %2155 = vmatprep.mubr.f32.mxu0 %v3934_v30  ;;  %v2316_v22 = vld [vmem:[#allocation5 + $0x1d50] sm:$0xff] }
 0x1ee   :  { %2232 = vmatprep.mubr.f32.mxu1 %v3934_v30  ;;  %3509 = vmatprep.subr.bf16.mxu0 %v3508_v25  ;;  %v2302_v30 = vld [vmem:[#allocation5 + $0x1ce0] sm:$0xff]  ;;  %v2327_v25 = vld [vmem:[#allocation5 + $0x1da8] sm:$0xff]  ;;  %v3590_v31 = vpack.c.bf16 %v2320_v61, %v2316_v22 }
 0x1ef   :  { %2156 = vmatmul.mubr.f32.gmra.mrb[26].mxu0 %v3938_v12  ;;  %3573 = vmatprep.subr.bf16.mxu1 %v3572_v4  ;;  %v2322_v4 = vld [vmem:[#allocation5 + $0x1d80] sm:$0xff] }
 0x1f0   :  { %2233 = vmatmul.mubr.f32.gmra.mrb[26].mxu1 %v3938_v12  ;;  %3511 = vmatpush1.bf16.msra.mxu0 %v3510_v32  ;;  %v3518_v12 = vpack.c.bf16 %v2302_v30, %v2298_v47  ;;  %v3528_v32 = vpack.c.bf16 %v2327_v25, %v2323_v11  ;;  %v3530_v41 = vpack.c.bf16 %v2326_v29, %v2322_v4  ;;  %v2342_v22 = vld [vmem:[#allocation5 + $0x1e20] sm:$0xff]  ;;  %v2344_v25 = vld [vmem:[#allocation5 + $0x1e30] sm:$0xff] }
 0x1f1   :  { %3575 = vmatpush1.bf16.msra.mxu1 %v3574_v33  ;;  %3513 = vmatprep.subr.bf16.mxu0 %v3512_v20  ;;  %v2324_v33 = vld [vmem:[#allocation5 + $0x1d90] sm:$0xff]  ;;  %v3600_v11 = vpack.c.bf16 %v2345_v56, %v2341_v7 }
 0x1f2   :  { %3577 = vmatprep.subr.bf16.mxu1 %v3576_v36  ;;  %2466 = vmatprep.mubr.f32.mxu0 %v3648_v13  ;;  %v2328_v20 = vld [vmem:[#allocation5 + $0x1db0] sm:$0xff]  ;;  %v2335_v36 = vld [vmem:[#allocation5 + $0x1de8] sm:$0xff] }
 0x1f3   :  { %2543 = vmatprep.mubr.f32.mxu1 %v3648_v13  ;;  %v3594_v48 = vpack.c.bf16 %v2328_v20, %v2324_v33  ;;  %v3532_v13 = vpack.c.bf16 %v2335_v36, %v2331_v35  ;;  %v2348_v33 = vld [vmem:[#allocation5 + $0x1e50] sm:$0xff]  ;;  %v2357_v35 = vld [vmem:[#allocation5 + $0x1e98] sm:$0xff] }
 0x1f4   :  { %3515 = vmatpush1.bf16.msra.mxu0 %v3514_v15  ;;  %v2337_v15 = vld [vmem:[#allocation5 + $0x1df8] sm:$0xff] }
 0x1f5   :  { %3579 = vmatpush1.bf16.msra.mxu1 %v3578_v43  ;;  %3517 = vmatprep.subr.bf16.mxu0 %v3516_v45  ;;  %v2361_v36 = vld [vmem:[#allocation5 + $0x1eb8] sm:$0xff] }
 0x1f6   :  { %3581 = vmatprep.subr.bf16.mxu1 %v3580_v51  ;;  %v2330_v51 = vld [vmem:[#allocation5 + $0x1dc0] sm:$0xff] }
 0x1f8   :  { %3519 = vmatpush1.bf16.msra.mxu0 %v3518_v12 }
 0x1f9   :  { %3583 = vmatpush1.bf16.msra.mxu1 %v3582_v2  ;;  %3521 = vmatprep.subr.bf16.mxu0 %v3520_v49  ;;  %v3596_v49 = vpack.c.bf16 %v2337_v15, %v2333_v44  ;;  %v2358_v44 = vld [vmem:[#allocation5 + $0x1ea0] sm:$0xff]  ;;  %v2356_v15 = vld [vmem:[#allocation5 + $0x1e90] sm:$0xff] }
 0x1fa   :  { %3585 = vmatprep.subr.bf16.mxu1 %v3584_v6  ;;  %v3534_v6 = vpack.c.bf16 %v2334_v42, %v2330_v51  ;;  %v2365_v51 = vld [vmem:[#allocation5 + $0x1ed8] sm:$0xff] }
 0x1fb   :  { %v2369_v42 = vld [vmem:[#allocation5 + $0x1ef8] sm:$0xff] }
 0x1fc   :  { %3523 = vmatpush1.bf16.msra.mxu0 %v3522_v40  ;;  %v3598_v40 = vpack.c.bf16 %v2336_v1, %v2332_v63  ;;  %v2362_v1 = vld [vmem:[#allocation5 + $0x1ec0] sm:$0xff] }
 0x1fd   :  { %3587 = vmatpush1.bf16.msra.mxu1 %v3586_v18  ;;  %3525 = vmatprep.subr.bf16.mxu0 %v3524_v8 }
 0x1fe   :  { %v1200_v54 = vpop.f32.mrb[12].mxu0  ;;  %3589 = vmatprep.subr.bf16.mxu1 %v3588_v24  ;;  %v2340_v24 = vld [vmem:[#allocation5 + $0x1e10] sm:$0xff] }
 0x1ff   :  { %v1290_v37 = vsel %vm1288_vm6, %v1200_v54, 0.0  ;;  %v1277_v38 = vpop.f32.mrb[12].mxu1  ;;  %v1202_v39 = vpop.f32.mrb[13].mxu0  ;;  %v3602_v4 = vpack.c.bf16 %v2344_v25, %v2340_v24  ;;  %v2355_v54 = vld [vmem:[#allocation5 + $0x1e88] sm:$0xff]  ;;  %v2381_v24 = vld [vmem:[#allocation5 + $0x1f58] sm:$0xff] }
 0x200   :  { %v3999_v43 = vadd.f32 %v1290_v37, %v3949_v46  ;;  %v1292_v45 = vsel %vm1288_vm6, %v1277_v38, 0.0  ;;  %v1291_v47 = vsel %vm1288_vm6, %v1202_v39, 0.0  ;;  %v1279_v30 = vpop.f32.mrb[13].mxu1  ;;  %3527 = vmatpush1.bf16.msra.mxu0 %v3526_v27  ;;  %v3538_v27 = vpack.c.bf16 %v2342_v22, %v2338_v21  ;;  %v2379_v21 = vld [vmem:[#allocation5 + $0x1f48] sm:$0xff] }
 0x201   :  { %v4006_v59 = vadd.f32 %v1292_v45, %v3956_v53  ;;  %v4009_v62 = vadd.f32 %v1291_v47, %v3959_v58  ;;  %v1293_v46 = vsel %vm1288_vm6, %v1279_v30, 0.0  ;;  %3591 = vmatpush1.bf16.msra.mxu1 %v3590_v31  ;;  %3529 = vmatprep.subr.bf16.mxu0 %v3528_v32  ;;  %v2343_v53 = vld [vmem:[#allocation5 + $0x1e28] sm:$0xff]  ;;  %v2346_v31 = vld [vmem:[#allocation5 + $0x1e40] sm:$0xff]  ;;  %v3608_v45 = vpack.c.bf16 %v2361_v36, %v2357_v35  ;;  %v2360_v47 = vld [vmem:[#allocation5 + $0x1eb0] sm:$0xff] }
 0x202   :  { %v4014_v12 = vadd.f32 %v1293_v46, %v3964_v55  ;;  %v1206_v2 = vpop.f32.mrb[14].mxu0  ;;  %3593 = vmatprep.subr.bf16.mxu1 %v3592_v34  ;;  %v2350_v32 = vld [vmem:[#allocation5 + $0x1e60] sm:$0xff]  ;;  %v2359_v34 = vld [vmem:[#allocation5 + $0x1ea8] sm:$0xff] }
 0x203   :  { %v1294_v58 = vsel %vm1289_vm7, %v1206_v2, 0.0  ;;  %v1283_v3 = vpop.f32.mrb[14].mxu1  ;;  %v1208_v5 = vpop.f32.mrb[15].mxu0  ;;  %v3542_v37 = vpack.c.bf16 %v2350_v32, %v2346_v31  ;;  %v3544_v39 = vpack.c.bf16 %v2359_v34, %v2355_v54  ;;  %v2363_v30 = vld [vmem:[#allocation5 + $0x1ec8] sm:$0xff]  ;;  %v2366_v2 = vld [vmem:[#allocation5 + $0x1ee0] sm:$0xff] }
 0x204   :  { %v4019_v52 = vadd.f32 %v1294_v58, %v3969_v9  ;;  %v1296_v55 = vsel %vm1289_vm7, %v1283_v3, 0.0  ;;  %v1295_v57 = vsel %vm1289_vm7, %v1208_v5, 0.0  ;;  %v1285_v10 = vpop.f32.mrb[15].mxu1  ;;  %3531 = vmatpush1.bf16.msra.mxu0 %v3530_v41  ;;  %v3536_v9 = vpack.c.bf16 %v2343_v53, %v2339_v50  ;;  %v2354_v41 = vld [vmem:[#allocation5 + $0x1e80] sm:$0xff]  ;;  %v2368_v53 = vld [vmem:[#allocation5 + $0x1ef0] sm:$0xff]  ;;  %v2371_v58 = vld [vmem:[#allocation5 + $0x1f08] sm:$0xff] }
 0x205   :  { %v4026_v18 = vadd.f32 %v1296_v55, %v3976_v60  ;;  %v4029_v8 = vadd.f32 %v1295_v57, %v3979_v14  ;;  %v1297_v19 = vsel %vm1289_vm7, %v1285_v10, 0.0  ;;  %3595 = vmatpush1.bf16.msra.mxu1 %v3594_v48  ;;  %3533 = vmatprep.subr.bf16.mxu0 %v3532_v13  ;;  %v2347_v60 = vld [vmem:[#allocation5 + $0x1e48] sm:$0xff]  ;;  %v2353_v14 = vld [vmem:[#allocation5 + $0x1e78] sm:$0xff]  ;;  %v3546_v46 = vpack.c.bf16 %v2358_v44, %v2354_v41  ;;  %v2370_v57 = vld [vmem:[#allocation5 + $0x1f00] sm:$0xff] }
 0x206   :  { %v4034_v61 = vadd.f32 %v1297_v19, %v3984_v23  ;;  %3597 = vmatprep.subr.bf16.mxu1 %v3596_v49  ;;  %v3540_v29 = vpack.c.bf16 %v2351_v26, %v2347_v60  ;;  %v3604_v20 = vpack.c.bf16 %v2353_v14, %v2349_v16  ;;  %v2352_v23 = vld [vmem:[#allocation5 + $0x1e70] sm:$0xff]  ;;  %v2367_v48 = vld [vmem:[#allocation5 + $0x1ee8] sm:$0xff]  ;;  %v3610_v13 = vpack.c.bf16 %v2360_v47, %v2356_v15  ;;  %v2373_v5 = vld [vmem:[#allocation5 + $0x1f18] sm:$0xff] }
 0x207   :  { %v3606_v38 = vpack.c.bf16 %v2352_v23, %v2348_v33  ;;  %v3548_v63 = vpack.c.bf16 %v2367_v48, %v2363_v30  ;;  %v2364_v49 = vld [vmem:[#allocation5 + $0x1ed0] sm:$0xff]  ;;  %v3612_v50 = vpack.c.bf16 %v2369_v42, %v2365_v51  ;;  %v2375_v3 = vld [vmem:[#allocation5 + $0x1f28] sm:$0xff]  ;;  %v3550_v7 = vpack.c.bf16 %v2366_v2, %v2362_v1  ;;  %v2374_v10 = vld [vmem:[#allocation5 + $0x1f20] sm:$0xff] }
 0x208   :  { %3535 = vmatpush1.bf16.msra.mxu0 %v3534_v6  ;;  %v2377_v6 = vld [vmem:[#allocation5 + $0x1f38] sm:$0xff]  ;;  %v3614_v56 = vpack.c.bf16 %v2368_v53, %v2364_v49  ;;  %v3552_v55 = vpack.c.bf16 %v2375_v3, %v2371_v58  ;;  %v2383_v22 = vld [vmem:[#allocation5 + $0x1f68] sm:$0xff]  ;;  %v3554_v25 = vpack.c.bf16 %v2374_v10, %v2370_v57  ;;  %v2378_v16 = vld [vmem:[#allocation5 + $0x1f40] sm:$0xff] }
 0x209   :  { %3599 = vmatpush1.bf16.msra.mxu1 %v3598_v40  ;;  %3537 = vmatprep.subr.bf16.mxu0 %v3536_v9  ;;  %v2372_v40 = vld [vmem:[#allocation5 + $0x1f10] sm:$0xff]  ;;  %v3616_v19 = vpack.c.bf16 %v2377_v6, %v2373_v5  ;;  %v3556_v26 = vpack.c.bf16 %v2383_v22, %v2379_v21  ;;  %v2382_v14 = vld [vmem:[#allocation5 + $0x1f60] sm:$0xff]  ;;  %v2387_v31 = vld [vmem:[#allocation5 + $0x1f88] sm:$0xff] }
 0x20a   :  { %3601 = vmatprep.subr.bf16.mxu1 %v3600_v11  ;;  %v2376_v9 = vld [vmem:[#allocation5 + $0x1f30] sm:$0xff]  ;;  %v2385_v11 = vld [vmem:[#allocation5 + $0x1f78] sm:$0xff]  ;;  %v2391_v32 = vld [vmem:[#allocation5 + $0x1fa8] sm:$0xff]  ;;  %v3558_v23 = vpack.c.bf16 %v2382_v14, %v2378_v16 }
 0x20b   :  { %v3618_v60 = vpack.c.bf16 %v2376_v9, %v2372_v40  ;;  %v2389_v33 = vld [vmem:[#allocation5 + $0x1f98] sm:$0xff]  ;;  %v3560_v34 = vpack.c.bf16 %v2391_v32, %v2387_v31  ;;  %v2386_v35 = vld [vmem:[#allocation5 + $0x1f80] sm:$0xff]  ;;  %v2395_v41 = vld [vmem:[#allocation5 + $0x1fc8] sm:$0xff] }
 0x20c   :  { %3539 = vmatpush1.bf16.msra.mxu0 %v3538_v27  ;;  %v2380_v27 = vld [vmem:[#allocation5 + $0x1f50] sm:$0xff]  ;;  %v2390_v36 = vld [vmem:[#allocation5 + $0x1fa0] sm:$0xff]  ;;  %v2399_v44 = vld [vmem:[#allocation5 + $0x1fe8] sm:$0xff] }
 0x20d   :  { %3603 = vmatpush1.bf16.msra.mxu1 %v3602_v4  ;;  %3541 = vmatprep.subr.bf16.mxu0 %v3540_v29  ;;  %v3620_v4 = vpack.c.bf16 %v2385_v11, %v2381_v24  ;;  %v2384_v29 = vld [vmem:[#allocation5 + $0x1f70] sm:$0xff]  ;;  %v2397_v15 = vld [vmem:[#allocation5 + $0x1fd8] sm:$0xff]  ;;  %v3562_v47 = vpack.c.bf16 %v2390_v36, %v2386_v35  ;;  %v3564_v48 = vpack.c.bf16 %v2399_v44, %v2395_v41  ;;  %v2394_v51 = vld [vmem:[#allocation5 + $0x1fc0] sm:$0xff] }
 0x20e   :  { %3605 = vmatprep.subr.bf16.mxu1 %v3604_v20  ;;  %v2393_v20 = vld [vmem:[#allocation5 + $0x1fb8] sm:$0xff]  ;;  %v3622_v54 = vpack.c.bf16 %v2384_v29, %v2380_v27  ;;  %v2398_v42 = vld [vmem:[#allocation5 + $0x1fe0] sm:$0xff] }
 0x20f   :  { %v3566_v1 = vpack.c.bf16 %v2398_v42, %v2394_v51  ;;  %v3649_v49 = vld [vmem:[#allocation2 + $0x18] sm:$0xff] }
 0x210   :  { %3543 = vmatpush1.bf16.msra.mxu0 %v3542_v37  ;;  %v2388_v37 = vld [vmem:[#allocation5 + $0x1f90] sm:$0xff] }
 0x211   :  { %3607 = vmatpush1.bf16.msra.mxu1 %v3606_v38  ;;  %3545 = vmatprep.subr.bf16.mxu0 %v3544_v39  ;;  %v3624_v38 = vpack.c.bf16 %v2393_v20, %v2389_v33  ;;  %v2392_v39 = vld [vmem:[#allocation5 + $0x1fb0] sm:$0xff] }
 0x212   :  { %3609 = vmatprep.subr.bf16.mxu1 %v3608_v45  ;;  %v2401_v45 = vld [vmem:[#allocation5 + $0x1ff8] sm:$0xff]  ;;  %v3626_v30 = vpack.c.bf16 %v2392_v39, %v2388_v37 }
 0x214   :  { %3547 = vmatpush1.bf16.msra.mxu0 %v3546_v46  ;;  %v3628_v46 = vpack.c.bf16 %v2401_v45, %v2397_v15 }
 0x215   :  { %3611 = vmatpush1.bf16.msra.mxu1 %v3610_v13  ;;  %3549 = vmatprep.subr.bf16.mxu0 %v3548_v63  ;;  %v2396_v13 = vld [vmem:[#allocation5 + $0x1fd0] sm:$0xff] }
 0x216   :  { %3613 = vmatprep.subr.bf16.mxu1 %v3612_v50  ;;  %v2400_v63 = vld [vmem:[#allocation5 + $0x1ff0] sm:$0xff] }
 0x217   :  { %v3630_v2 = vpack.c.bf16 %v2400_v63, %v2396_v13  ;;  %v3650_v50 = vld [vmem:[#allocation2 + $0x10] sm:$0xff] }
 0x218   :  { %3551 = vmatpush1.bf16.msra.mxu0 %v3550_v7 }
 0x219   :  { %3615 = vmatpush1.bf16.msra.mxu1 %v3614_v56  ;;  %3553 = vmatprep.subr.bf16.mxu0 %v3552_v55 }
 0x21a   :  { %3617 = vmatprep.subr.bf16.mxu1 %v3616_v19 }
 0x21c   :  { %3555 = vmatpush1.bf16.msra.mxu0 %v3554_v25 }
 0x21d   :  { %3619 = vmatpush1.bf16.msra.mxu1 %v3618_v60  ;;  %3557 = vmatprep.subr.bf16.mxu0 %v3556_v26 }
 0x21e   :  { %3621 = vmatprep.subr.bf16.mxu1 %v3620_v4 }
 0x220   :  { %3559 = vmatpush1.bf16.msra.mxu0 %v3558_v23 }
 0x221   :  { %3623 = vmatpush1.bf16.msra.mxu1 %v3622_v54  ;;  %3561 = vmatprep.subr.bf16.mxu0 %v3560_v34 }
 0x222   :  { %3625 = vmatprep.subr.bf16.mxu1 %v3624_v38 }
 0x224   :  { %3563 = vmatpush1.bf16.msra.mxu0 %v3562_v47 }
 0x225   :  { %3627 = vmatpush1.bf16.msra.mxu1 %v3626_v30  ;;  %3565 = vmatprep.subr.bf16.mxu0 %v3564_v48 }
 0x226   :  { %3629 = vmatprep.subr.bf16.mxu1 %v3628_v46 }
 0x228   :  { %3567 = vmatpush1.bf16.msra.mxu0 %v3566_v1 }
 0x229   :  { %3631 = vmatpush1.bf16.msra.mxu1 %v3630_v2 }
 0x22b   :  { %2467 = vmatmul.mubr.f32.vlgmr.msra.gmra.mrb[28].mxu0 %v3986_v28 }
 0x22c   :  { %2544 = vmatmul.mubr.f32.vlgmr.msra.gmra.mrb[28].mxu1 %v3986_v28  ;;  %2472 = vmatprep.mubr.f32.mxu0 %v3649_v49 }
 0x22d   :  { %2549 = vmatprep.mubr.f32.mxu1 %v3649_v49 }
 0x22f   :  { %2473 = vmatmul.mubr.f32.gmra.mrb[30].mxu0 %v3650_v50 }
 0x230   :  { %2550 = vmatmul.mubr.f32.gmra.mrb[30].mxu1 %v3650_v50 }
 0x23e   :  { %v1517_v53 = vpop.f32.mrb[16].mxu0 }
 0x23f   :  { %v1607_v58 = vsel %vm1605_vm8, %v1517_v53, 0.0  ;;  %v1594_v3 = vpop.f32.mrb[16].mxu1  ;;  %v1519_v5 = vpop.f32.mrb[17].mxu0 }
 0x240   :  { %v1623_v6 = vadd.f32 %v1607_v58, %v3999_v43  ;;  %v1609_v7 = vsel %vm1605_vm8, %v1594_v3, 0.0  ;;  %v1608_v56 = vsel %vm1605_vm8, %v1519_v5, 0.0  ;;  %v1596_v55 = vpop.f32.mrb[17].mxu1 }
 0x241   :  { %v1625_v28 = vadd.f32 %v1609_v7, %v4006_v59  ;;  %v1624_v57 = vadd.f32 %v1608_v56, %v4009_v62  ;;  %v1610_v10 = vsel %vm1605_vm8, %v1596_v55, 0.0 }
 0x242   :  { %v1626_v40 = vadd.f32 %v1610_v10, %v4014_v12  ;;  %v1523_v19 = vpop.f32.mrb[18].mxu0 }
 0x243   :  { %v1611_v9 = vsel %vm1606_vm9, %v1523_v19, 0.0  ;;  %v1600_v21 = vpop.f32.mrb[18].mxu1  ;;  %v1525_v22 = vpop.f32.mrb[19].mxu0 }
 0x244   :  { %v1627_v24 = vadd.f32 %v1611_v9, %v4019_v52  ;;  %v1613_v11 = vsel %vm1606_vm9, %v1600_v21, 0.0  ;;  %v1612_v43 = vsel %vm1606_vm9, %v1525_v22, 0.0  ;;  %v1602_v25 = vpop.f32.mrb[19].mxu1 }
 0x245   :  { %v1629_v60 = vadd.f32 %v1613_v11, %v4026_v18  ;;  %v1628_v26 = vadd.f32 %v1612_v43, %v4029_v8  ;;  %v1614_v16 = vsel %vm1606_vm9, %v1602_v25, 0.0 }
 0x246   :  { %v1630_v59 = vadd.f32 %v1614_v16, %v4034_v61 }
 0x27e   :  { %v1834_v62 = vpop.f32.mrb[20].mxu0 }
 0x27f   :  { %v1924_v12 = vsel %vm1922_vm10, %v1834_v62, 0.0  ;;  %v1911_v14 = vpop.f32.mrb[20].mxu1  ;;  %v1836_v27 = vpop.f32.mrb[21].mxu0 }
 0x280   :  { %v1940_v4 = vadd.f32 %v1924_v12, %v1623_v6  ;;  %v1926_v29 = vsel %vm1922_vm10, %v1911_v14, 0.0  ;;  %v1925_v31 = vsel %vm1922_vm10, %v1836_v27, 0.0  ;;  %v1913_v52 = vpop.f32.mrb[21].mxu1 }
 0x281   :  { %v1942_v32 = vadd.f32 %v1926_v29, %v1625_v28  ;;  %v1941_v33 = vadd.f32 %v1925_v31, %v1624_v57  ;;  %v1927_v18 = vsel %vm1922_vm10, %v1913_v52, 0.0 }
 0x282   :  { %v1943_v20 = vadd.f32 %v1927_v18, %v1626_v40  ;;  %v1840_v8 = vpop.f32.mrb[22].mxu0 }
 0x283   :  { %v1928_v23 = vsel %vm1923_vm11, %v1840_v8, 0.0  ;;  %v1917_v54 = vpop.f32.mrb[22].mxu1  ;;  %v1842_v61 = vpop.f32.mrb[23].mxu0 }
 0x284   :  { %v1944_v34 = vadd.f32 %v1928_v23, %v1627_v24  ;;  %v1930_v35 = vsel %vm1923_vm11, %v1917_v54, 0.0  ;;  %v1929_v36 = vsel %vm1923_vm11, %v1842_v61, 0.0  ;;  %v1919_v37 = vpop.f32.mrb[23].mxu1 }
 0x285   :  { %v1946_v38 = vadd.f32 %v1930_v35, %v1629_v60  ;;  %v1945_v39 = vadd.f32 %v1929_v36, %v1628_v26  ;;  %v1931_v41 = vsel %vm1923_vm11, %v1919_v37, 0.0 }
 0x286   :  { %v1947_v44 = vadd.f32 %v1931_v41, %v1630_v59 }
 0x2be   :  { %v2151_v15 = vpop.f32.mrb[24].mxu0 }
 0x2bf   :  { %v2241_v45 = vsel %vm2239_vm12, %v2151_v15, 0.0  ;;  %v2228_v47 = vpop.f32.mrb[24].mxu1  ;;  %v2153_v30 = vpop.f32.mrb[25].mxu0 }
 0x2c0   :  { %v2257_v48 = vadd.f32 %v2241_v45, %v1940_v4  ;;  %v2243_v51 = vsel %vm2239_vm12, %v2228_v47, 0.0  ;;  %v2242_v42 = vsel %vm2239_vm12, %v2153_v30, 0.0  ;;  %v2230_v46 = vpop.f32.mrb[25].mxu1 }
 0x2c1   :  { %v2259_v13 = vadd.f32 %v2243_v51, %v1942_v32  ;;  %v2258_v63 = vadd.f32 %v2242_v42, %v1941_v33  ;;  %v2244_v1 = vsel %vm2239_vm12, %v2230_v46, 0.0 }
 0x2c2   :  { %v2260_v2 = vadd.f32 %v2244_v1, %v1943_v20  ;;  %v2157_v49 = vpop.f32.mrb[26].mxu0 }
 0x2c3   :  { %v2245_v50 = vsel %vm2240_vm13, %v2157_v49, 0.0  ;;  %v2234_v53 = vpop.f32.mrb[26].mxu1  ;;  %v2159_v58 = vpop.f32.mrb[27].mxu0 }
 0x2c4   :  { %v2261_v3 = vadd.f32 %v2245_v50, %v1944_v34  ;;  %v2247_v5 = vsel %vm2240_vm13, %v2234_v53, 0.0  ;;  %v2246_v6 = vsel %vm2240_vm13, %v2159_v58, 0.0  ;;  %v2236_v7 = vpop.f32.mrb[27].mxu1 }
 0x2c5   :  { %v2263_v56 = vadd.f32 %v2247_v5, %v1946_v38  ;;  %v2262_v55 = vadd.f32 %v2246_v6, %v1945_v39  ;;  %v2248_v28 = vsel %vm2240_vm13, %v2236_v7, 0.0 }
 0x2c6   :  { %v2264_v57 = vadd.f32 %v2248_v28, %v1947_v44 }
 0x2fe   :  { %v2468_v10 = vpop.f32.mrb[28].mxu0 }
 0x2ff   :  { %v2558_v40 = vsel %vm2556_vm14, %v2468_v10, 0.0  ;;  %v2545_v19 = vpop.f32.mrb[28].mxu1  ;;  %v2470_v9 = vpop.f32.mrb[29].mxu0 }
 0x300   :  { %v2574_v21 = vadd.f32 %v2558_v40, %v2257_v48  ;;  %v2560_v22 = vsel %vm2556_vm14, %v2545_v19, 0.0  ;;  %v2559_v24 = vsel %vm2556_vm14, %v2470_v9, 0.0  ;;  %v2547_v11 = vpop.f32.mrb[29].mxu1 }
 0x301   :  { %v2576_v43 = vadd.f32 %v2560_v22, %v2259_v13  ;;  %v2575_v25 = vadd.f32 %v2559_v24, %v2258_v63  ;;  %v2561_v60 = vsel %vm2556_vm14, %v2547_v11, 0.0 }
 0x302   :  { %2582 = vst [vmem:[#allocation7] sm:$0xff] %v2574_v21  ;;  %v2577_v26 = vadd.f32 %v2561_v60, %v2260_v2  ;;  %v2474_v16 = vpop.f32.mrb[30].mxu0 }
 0x303   :  { %2584 = vst [vmem:[#allocation7 + $0x10] sm:$0xff] %v2576_v43  ;;  %2583 = vst [vmem:[#allocation7 + $0x8] sm:$0xff] %v2575_v25  ;;  %v2562_v0 = vsel %vm2557_vm15, %v2474_v16, 0.0  ;;  %v2551_v59 = vpop.f32.mrb[30].mxu1  ;;  %v2476_v62 = vpop.f32.mrb[31].mxu0 }
 0x304   :  { %2585 = vst [vmem:[#allocation7 + $0x18] sm:$0xff] %v2577_v26  ;;  %v2578_v12 = vadd.f32 %v2562_v0, %v2261_v3  ;;  %v2564_v14 = vsel %vm2557_vm15, %v2551_v59, 0.0  ;;  %v2563_v27 = vsel %vm2557_vm15, %v2476_v62, 0.0  ;;  %v2553_v4 = vpop.f32.mrb[31].mxu1 }
 0x305   :  { %v2580_v29 = vadd.f32 %v2564_v14, %v2263_v56  ;;  %v2579_v31 = vadd.f32 %v2563_v27, %v2262_v55  ;;  %v2565_v52 = vsel %vm2557_vm15, %v2553_v4, 0.0 }
 0x306   :  { %2586 = vst [vmem:[#allocation7 + $0x20] sm:$0xff] %v2578_v12  ;;  %v2581_v32 = vadd.f32 %v2565_v52, %v2264_v57 }
 0x307   :  { %2588 = vst [vmem:[#allocation7 + $0x30] sm:$0xff] %v2580_v29  ;;  %2587 = vst [vmem:[#allocation7 + $0x28] sm:$0xff] %v2579_v31 }
 0x308   :  { %2589 = vst [vmem:[#allocation7 + $0x38] sm:$0xff] %v2581_v32 }
 0x309   :  { %3706 = shalt.err (!%p3703_p6)
}
 0x30a   :  { %s3707_s12 = scalar_lea.hbm %s4079_s2, 1024 }
 0x30b   :  { %p3708_p7 = scmp.ne.s32.totalorder %s4079_s2, %s3707_s12  ;;  %p3711_p8 = scmp.lt.u32.totalorder %s3707_s12, %s4079_s2 }
 0x30d   :  { %p3713_p9 = pnand %p3711_p8, %p3708_p7 }
 0x30f   :  { %3716 = shalt.err (!%p3713_p9)
}
 0x310   :  { %2601 = dma.vmem_to_hbm [thread:$0]  %s2596_s8, 1024, %s4079_s2, [#allocation4], %s3727_s0, %s3727_s0, %s3728_s5  }
 0x311   :  { %3721 = dma.done.wait [#allocation4], 1024  }
 0x312   :  { %3722 = vsyncadd [#allocation4], 4294966272 }
 0x313   :  { %2605 = vsyncpa [#allocation3], 1 }
 0x314   :  { %2606 = vsyncpa [#allocation6], 1 }
 0x315   :  { %2607 = vsyncpa [#allocation4], 1 }

</bundles_post_ra>
